<compile_context>
chip_gen: v5e
topology: v5e:2x2
jax: 0.10.0
libtpu: 0.0.40
codegen_flags: <defaults>
</compile_context>

<pallas_src>
from functools import partial

import jax
import jax.numpy as jnp
from jax import lax
from jax.experimental import pallas as pl
from jax.experimental.pallas import tpu as pltpu

_SQRT1_2 = 0.7071067811865476

# ---- per-generation budgets (v5e/v6e: 128 MiB VMEM, v7x: 64 MiB) ----------
try:
    _VMEM_CAP = int(pltpu.get_tpu_info().vmem_capacity_bytes)
except Exception:  # pragma: no cover - conservative fallback
    _VMEM_CAP = 64 * 1024 * 1024
_VMEM_LIMIT = min(64 * 1024 * 1024, (_VMEM_CAP * 3) // 4)
_TM_TARGET = 512 if _VMEM_CAP >= 100 * 1024 * 1024 else 256


# ----------------------------- helpers -------------------------------------

def _gelu(x):
    # exact (erf-based) GELU, matching torch.nn.GELU default
    return 0.5 * x * (1.0 + lax.erf(x * _SQRT1_2))


def _tile(dim, target, align):
    """Largest multiple of `align` <= target that evenly divides `dim`,
    falling back to the full dimension (always legal for BlockSpec)."""
    if dim <= target:
        return dim
    t = (target // align) * align
    while t >= align:
        if dim % t == 0:
            return t
        t -= align
    return dim


# ----------------------------- matmul kernels -------------------------------

def _matmul_kernel(x_ref, w_ref, bias_ref, *rest, activation, has_residual):
    """(tm, K) @ (K, tn) with fused bias / GELU / residual epilogue."""
    if has_residual:
        res_ref, o_ref = rest
    else:
        (o_ref,) = rest
    y = jnp.dot(x_ref[...], w_ref[...],
                preferred_element_type=jnp.float32) + bias_ref[...]
    if activation == "gelu":
        y = _gelu(y)
    if has_residual:
        y = y + res_ref[...]
    o_ref[...] = y.astype(o_ref.dtype)


def pallas_matmul_bias(x, w, b, *, activation=None, residual=None,
                       out_dtype=jnp.float32, tm_target=None, tn_target=256):
    """Full-K tiled matmul: grid (M/tm, N/tn), K resident per step."""
    M, K = x.shape
    K2, N = w.shape
    assert K == K2
    tm = _tile(M, tm_target or _TM_TARGET, 8)
    tn = _tile(N, tn_target, 128)
    grid = (M // tm, N // tn)

    if x.dtype != jnp.bfloat16:
        x = x.astype(jnp.bfloat16)
    if w.dtype != jnp.bfloat16:
        w = w.astype(jnp.bfloat16)

    in_specs = [
        pl.BlockSpec((tm, K), lambda i, j: (i, 0)),
        pl.BlockSpec((K, tn), lambda i, j: (0, j)),
        pl.BlockSpec((1, tn), lambda i, j: (0, j)),
    ]
    args = [x, w, b.reshape(1, N).astype(jnp.float32)]
    if residual is not None:
        in_specs.append(pl.BlockSpec((tm, tn), lambda i, j: (i, j)))
        args.append(residual.astype(jnp.float32))

    return pl.pallas_call(
        partial(_matmul_kernel, activation=activation,
                has_residual=residual is not None),
        out_shape=jax.ShapeDtypeStruct((M, N), out_dtype),
        grid=grid,
        in_specs=in_specs,
        out_specs=pl.BlockSpec((tm, tn), lambda i, j: (i, j)),
        compiler_params=pltpu.CompilerParams(
            dimension_semantics=("parallel", "parallel"),
            vmem_limit_bytes=_VMEM_LIMIT),
    )(*args)


def _ln_matmul_kernel(x_ref, g_ref, b_ref, w_ref, bias_ref, o_ref,
                      *, eps, activation):
    """LayerNorm prologue (full-K row slab) fused into the matmul."""
    x = x_ref[...]                                       # (tm, K) f32
    mean = jnp.mean(x, axis=-1, keepdims=True)
    var = jnp.mean(jnp.square(x - mean), axis=-1, keepdims=True)
    xn = ((x - mean) * lax.rsqrt(var + eps) * g_ref[...] + b_ref[...]
          ).astype(jnp.bfloat16)
    y = jnp.dot(xn, w_ref[...],
                preferred_element_type=jnp.float32) + bias_ref[...]
    if activation == "gelu":
        y = _gelu(y)
    o_ref[...] = y.astype(o_ref.dtype)


def pallas_ln_matmul_bias(x, gamma, beta, w, b, *, activation=None, eps=1e-5,
                          out_dtype=jnp.bfloat16, tm_target=None,
                          tn_target=256):
    """Fused LayerNorm(x) @ w + b (+ GELU). x is the f32 residual stream."""
    M, K = x.shape
    K2, N = w.shape
    assert K == K2
    tm = _tile(M, tm_target or _TM_TARGET, 8)
    tn = _tile(N, tn_target, 128)
    grid = (M // tm, N // tn)

    if w.dtype != jnp.bfloat16:
        w = w.astype(jnp.bfloat16)

    return pl.pallas_call(
        partial(_ln_matmul_kernel, eps=eps, activation=activation),
        out_shape=jax.ShapeDtypeStruct((M, N), out_dtype),
        grid=grid,
        in_specs=[
            pl.BlockSpec((tm, K), lambda i, j: (i, 0)),   # x slab (dedup'd over j)
            pl.BlockSpec((1, K), lambda i, j: (0, 0)),    # gamma
            pl.BlockSpec((1, K), lambda i, j: (0, 0)),    # beta
            pl.BlockSpec((K, tn), lambda i, j: (0, j)),   # weight
            pl.BlockSpec((1, tn), lambda i, j: (0, j)),   # bias
        ],
        out_specs=pl.BlockSpec((tm, tn), lambda i, j: (i, j)),
        compiler_params=pltpu.CompilerParams(
            dimension_semantics=("parallel", "parallel"),
            vmem_limit_bytes=_VMEM_LIMIT),
    )(x.astype(jnp.float32),
      gamma.reshape(1, K).astype(jnp.float32),
      beta.reshape(1, K).astype(jnp.float32),
      w, b.reshape(1, N).astype(jnp.float32))


# ----------------------------- flash attention ------------------------------

def _flash_attn_kernel(q_ref, k_ref, v_ref, o_ref, m_sc, l_sc, acc_sc):
    """Online-softmax attention; q is pre-scaled by D^-0.5 (folded into W_q)."""
    ki = pl.program_id(3)

    @pl.when(ki == 0)
    def _():
        m_sc[...] = jnp.full_like(m_sc, -jnp.inf)
        l_sc[...] = jnp.zeros_like(l_sc)
        acc_sc[...] = jnp.zeros_like(acc_sc)

    q = q_ref[0]                                   # (tq, D) bf16
    k = k_ref[0]                                   # (tk, D) bf16
    v = v_ref[0]                                   # (tk, D) bf16

    s = lax.dot_general(q, k, (((1,), (1,)), ((), ())),
                        preferred_element_type=jnp.float32)   # (tq, tk) f32

    m_prev = m_sc[...]
    m_new = jnp.maximum(m_prev, jnp.max(s, axis=-1, keepdims=True))
    alpha = jnp.exp(m_prev - m_new)
    p = jnp.exp(s - m_new)
    l_sc[...] = alpha * l_sc[...] + jnp.sum(p, axis=-1, keepdims=True)
    acc_sc[...] = alpha * acc_sc[...] + jnp.dot(
        p.astype(v.dtype), v, preferred_element_type=jnp.float32)
    m_sc[...] = m_new

    @pl.when(ki == pl.num_programs(3) - 1)
    def _():
        o_ref[0] = (acc_sc[...] * pl.reciprocal(l_sc[...], approx=True)
                    ).astype(o_ref.dtype)


def pallas_flash_attention(qkv, n_head, *, tq_target=256, tk_target=512):
    """qkv: (B, T, 3N) bf16 laid out as [q heads | k heads | v heads] columns.

    Reads q/k/v head slabs straight out of the projection output (no
    transposes) and writes (B, T, N) so the following reshape is free.
    """
    B, T, threeN = qkv.shape
    N = threeN // 3
    H = n_head
    D = N // H
    tq = _tile(T, tq_target, 8)
    tk = _tile(T, tk_target, 8)
    grid = (B, H, T // tq, T // tk)

    def q_map(b, h, qi, ki):
        return (b, qi, h)

    def k_map(b, h, qi, ki):
        return (b, ki, H + h)

    def v_map(b, h, qi, ki):
        return (b, ki, 2 * H + h)

    return pl.pallas_call(
        _flash_attn_kernel,
        out_shape=jax.ShapeDtypeStruct((B, T, N), jnp.bfloat16),
        grid=grid,
        in_specs=[pl.BlockSpec((1, tq, D), q_map),
                  pl.BlockSpec((1, tk, D), k_map),
                  pl.BlockSpec((1, tk, D), v_map)],
        out_specs=pl.BlockSpec((1, tq, D), lambda b, h, qi, ki: (b, qi, h)),
        scratch_shapes=[pltpu.VMEM((tq, 1), jnp.float32),   # running max
                        pltpu.VMEM((tq, 1), jnp.float32),   # running denom
                        pltpu.VMEM((tq, D), jnp.float32)],  # output accum
        compiler_params=pltpu.CompilerParams(
            dimension_semantics=("parallel", "parallel", "parallel",
                                 "arbitrary"),
            vmem_limit_bytes=_VMEM_LIMIT),
    )(qkv, qkv, qkv)


# ----------------------------- block forward --------------------------------

def residual_attention_block(x, packed, n_head):
    """Forward of ResidualAttentionBlock (cross_attention=False, mask=None)."""
    B, T, N = x.shape
    M = B * T
    x2 = x.reshape(M, N).astype(jnp.float32)

    # --- self-attention (pre-LN), LN fused into the QKV projection ---
    qkv = pallas_ln_matmul_bias(x2, packed["attn_ln_g"], packed["attn_ln_b"],
                                packed["w_qkv"], packed["b_qkv"],
                                out_dtype=jnp.bfloat16)          # (M, 3N)
    oh = pallas_flash_attention(qkv.reshape(B, T, 3 * N), n_head)  # (B, T, N)
    x2 = pallas_matmul_bias(oh.reshape(M, N), packed["o_w"], packed["o_b"],
                            residual=x2, out_dtype=jnp.float32)  # fused +res

    # --- MLP (pre-LN), LN fused into fc1, GELU fused in epilogue ---
    h = pallas_ln_matmul_bias(x2, packed["mlp_ln_g"], packed["mlp_ln_b"],
                              packed["fc1_w"], packed["fc1_b"],
                              activation="gelu", out_dtype=jnp.bfloat16)
    x2 = pallas_matmul_bias(h, packed["fc2_w"], packed["fc2_b"],
                            residual=x2, out_dtype=jnp.float32)  # fused +res
    return x2.reshape(B, T, N)


# ----------------------------- params ---------------------------------------

def init_block_params(key, n_state):
    ks = jax.random.split(key, 11)

    def w(k, shape, s=0.02):
        return jax.random.normal(k, shape, jnp.float32) * s

    return {
        "attn_ln_g": jnp.ones((n_state,), jnp.float32),
        "attn_ln_b": jnp.zeros((n_state,), jnp.float32),
        "q_w": w(ks[0], (n_state, n_state)), "q_b": w(ks[1], (n_state,)),
        "k_w": w(ks[2], (n_state, n_state)),                    # key: no bias
        "v_w": w(ks[3], (n_state, n_state)), "v_b": w(ks[4], (n_state,)),
        "o_w": w(ks[5], (n_state, n_state)), "o_b": w(ks[6], (n_state,)),
        "mlp_ln_g": jnp.ones((n_state,), jnp.float32),
        "mlp_ln_b": jnp.zeros((n_state,), jnp.float32),
        "fc1_w": w(ks[7], (n_state, 4 * n_state)), "fc1_b": w(ks[8], (4 * n_state,)),
        "fc2_w": w(ks[9], (4 * n_state, n_state)), "fc2_b": w(ks[10], (n_state,)),
    }


def pack_block_params(p, n_head):
    """One-time packing: fused QKV weights, folded D^-0.5 scale, bf16 weights."""
    N = p["q_w"].shape[0]
    D = N // n_head
    scale = float(D) ** (-0.5)   # (D^-0.25 on q) * (D^-0.25 on k), folded into q
    w_qkv = jnp.concatenate(
        [p["q_w"] * scale, p["k_w"], p["v_w"]], axis=1).astype(jnp.bfloat16)
    b_qkv = jnp.concatenate(
        [p["q_b"] * scale, jnp.zeros((N,), jnp.float32), p["v_b"]]
    ).astype(jnp.float32)
    return {
        "attn_ln_g": p["attn_ln_g"].astype(jnp.float32),
        "attn_ln_b": p["attn_ln_b"].astype(jnp.float32),
        "w_qkv": w_qkv, "b_qkv": b_qkv,
        "o_w": p["o_w"].astype(jnp.bfloat16), "o_b": p["o_b"].astype(jnp.float32),
        "mlp_ln_g": p["mlp_ln_g"].astype(jnp.float32),
        "mlp_ln_b": p["mlp_ln_b"].astype(jnp.float32),
        "fc1_w": p["fc1_w"].astype(jnp.bfloat16), "fc1_b": p["fc1_b"].astype(jnp.float32),
        "fc2_w": p["fc2_w"].astype(jnp.bfloat16), "fc2_b": p["fc2_b"].astype(jnp.float32),
    }


# ----------------------------- reference (plain JAX, f32) -------------------

def ref_block(x, p, n_head):
    hp = lax.Precision.HIGHEST

    def linear(h, w, b=None):
        y = jnp.dot(h, w, precision=hp)
        return y if b is None else y + b

    def ln(h, g, b, eps=1e-5):
        m = jnp.mean(h, -1, keepdims=True)
        v = jnp.mean((h - m) ** 2, -1, keepdims=True)
        return (h - m) / jnp.sqrt(v + eps) * g + b

    def gelu(h):
        return 0.5 * h * (1.0 + lax.erf(h * _SQRT1_2))

    B, T, N = x.shape
    D = N // n_head
    scale = float(D) ** (-0.25)

    xn = ln(x, p["attn_ln_g"], p["attn_ln_b"])
    q = linear(xn, p["q_w"], p["q_b"])
    k = linear(xn, p["k_w"])
    v = linear(xn, p["v_w"], p["v_b"])
    qh = q.reshape(B, T, n_head, D).transpose(0, 2, 1, 3) * scale
    kh = k.reshape(B, T, n_head, D).transpose(0, 2, 3, 1) * scale
    vh = v.reshape(B, T, n_head, D).transpose(0, 2, 1, 3)
    qk = jnp.einsum("bhqd,bhdk->bhqk", qh, kh, precision=hp)
    w = jax.nn.softmax(qk, axis=-1)
    wv = jnp.einsum("bhqk,bhkd->bhqd", w, vh,
                    precision=hp).transpose(0, 2, 1, 3).reshape(B, T, N)
    h = x + linear(wv, p["o_w"], p["o_b"])
    xn = ln(h, p["mlp_ln_g"], p["mlp_ln_b"])
    h = h + linear(gelu(linear(xn, p["fc1_w"], p["fc1_b"])),
                   p["fc2_w"], p["fc2_b"])
    return h


# ----------------------------- main ------------------------------------------

if __name__ == "__main__":
    B, T, n_state, n_head = 2, 16, 256, 2   # head_dim = 128 (lane-dense)

    key = jax.random.PRNGKey(0)
    pkey, xkey = jax.random.split(key)
    params = init_block_params(pkey, n_state)
    packed = pack_block_params(params, n_head)   # one-time weight packing
    x = jax.random.normal(xkey, (B, T, n_state), jnp.float32)

    fwd = jax.jit(residual_attention_block, static_argnums=(2,))
    out = jax.block_until_ready(fwd(x, packed, n_head))

    assert out.shape == (B, T, n_state), out.shape
    assert bool(jnp.isfinite(out).all())

    ref = jax.block_until_ready(ref_block(x, params, n_head))
    max_err = float(jnp.max(jnp.abs(out - ref)))
    # bf16 MXU inputs + approx softmax reciprocal vs f32 reference -> small slack
    if not bool(jnp.allclose(out, ref, atol=3e-2, rtol=3e-2)):
        raise RuntimeError(
            f"Pallas output mismatch vs plain-JAX reference (max abs err {max_err:.4e})")

    print("KERNEL_OK")
</pallas_src>

<mosaic_0001>
module attributes {stable_mosaic.version = 11 : i64} {
  func.func @_flash_attn_kernel(%arg0: i32, %arg1: i32, %arg2: i32, %arg3: i32, %arg4: memref<1x16x128xbf16, #tpu.memory_space<vmem>>, %arg5: memref<1x16x128xbf16, #tpu.memory_space<vmem>>, %arg6: memref<1x16x128xbf16, #tpu.memory_space<vmem>>, %arg7: memref<1x16x128xbf16, #tpu.memory_space<vmem>>, %arg8: memref<16x1xf32, #tpu.memory_space<vmem>>, %arg9: memref<16x1xf32, #tpu.memory_space<vmem>>, %arg10: memref<16x128xf32, #tpu.memory_space<vmem>>) attributes {dimension_semantics = [#tpu.dimension_semantics<parallel>, #tpu.dimension_semantics<parallel>, #tpu.dimension_semantics<parallel>, #tpu.dimension_semantics<arbitrary>], iteration_bounds = array<i64: 2, 2, 1, 1>, scalar_prefetch = 0 : i64, scratch_operands = 3 : i64, tpu.core_type = #tpu.core_type<tc>, window_params = [{transform_indices = @transform_0, window_bounds = array<i64: 1, 16, 128>}, {transform_indices = @transform_1, window_bounds = array<i64: 1, 16, 128>}, {transform_indices = @transform_2, window_bounds = array<i64: 1, 16, 128>}, {transform_indices = @transform_3, window_bounds = array<i64: 1, 16, 128>}]} {
    %c0_i32 = arith.constant 0 : i32
    %0 = arith.cmpi eq, %arg3, %c0_i32 : i32
    %1 = arith.extui %0 : i1 to i32
    %c0_i32_0 = arith.constant 0 : i32
    %2 = arith.cmpi ne, %1, %c0_i32_0 : i32
    scf.if %2 {
      %cst_26 = arith.constant 0xFF800000 : f32
      %36 = vector.broadcast %cst_26 : f32 to vector<16x1xf32>
      %c0_27 = arith.constant 0 : index
      %c0_28 = arith.constant 0 : index
      %37 = vector.load %arg8[%c0_27, %c0_28] : memref<16x1xf32, #tpu.memory_space<vmem>>, vector<16x1xf32>
      tpu.vector_store %arg8[%c0_27, %c0_28], %36 {strides = array<i32>} : memref<16x1xf32, #tpu.memory_space<vmem>>, vector<16x1xf32>,
      %cst_29 = arith.constant 0.000000e+00 : f32
      %38 = vector.broadcast %cst_29 : f32 to vector<16x1xf32>
      %c0_30 = arith.constant 0 : index
      %c0_31 = arith.constant 0 : index
      %39 = vector.load %arg9[%c0_30, %c0_31] : memref<16x1xf32, #tpu.memory_space<vmem>>, vector<16x1xf32>
      tpu.vector_store %arg9[%c0_30, %c0_31], %38 {strides = array<i32>} : memref<16x1xf32, #tpu.memory_space<vmem>>, vector<16x1xf32>,
      %cst_32 = arith.constant 0.000000e+00 : f32
      %40 = vector.broadcast %cst_32 : f32 to vector<16x128xf32>
      %c0_33 = arith.constant 0 : index
      %c0_34 = arith.constant 0 : index
      %41 = vector.load %arg10[%c0_33, %c0_34] : memref<16x128xf32, #tpu.memory_space<vmem>>, vector<16x128xf32>
      tpu.vector_store %arg10[%c0_33, %c0_34], %40 {strides = array<i32>} : memref<16x128xf32, #tpu.memory_space<vmem>>, vector<16x128xf32>,
    } else {
    }
    %c0 = arith.constant 0 : index
    %c0_1 = arith.constant 0 : index
    %c0_2 = arith.constant 0 : index
    %3 = vector.load %arg4[%c0, %c0_1, %c0_2] : memref<1x16x128xbf16, #tpu.memory_space<vmem>>, vector<1x16x128xbf16>
    %4 = vector.shape_cast %3 : vector<1x16x128xbf16> to vector<16x128xbf16>
    %c0_3 = arith.constant 0 : index
    %c0_4 = arith.constant 0 : index
    %c0_5 = arith.constant 0 : index
    %5 = vector.load %arg5[%c0_3, %c0_4, %c0_5] : memref<1x16x128xbf16, #tpu.memory_space<vmem>>, vector<1x16x128xbf16>
    %6 = vector.shape_cast %5 : vector<1x16x128xbf16> to vector<16x128xbf16>
    %c0_6 = arith.constant 0 : index
    %c0_7 = arith.constant 0 : index
    %c0_8 = arith.constant 0 : index
    %7 = vector.load %arg6[%c0_6, %c0_7, %c0_8] : memref<1x16x128xbf16, #tpu.memory_space<vmem>>, vector<1x16x128xbf16>
    %8 = vector.shape_cast %7 : vector<1x16x128xbf16> to vector<16x128xbf16>
    %cst = arith.constant dense<0.000000e+00> : vector<16x16xf32>
    %9 = tpu.matmul %4, %6, %cst {dimension_numbers = #tpu.dot_dimension_numbers<[1], [1], [0], [0], [0, 0, 1, 0], [], []>} : vector<16x128xbf16>, vector<16x128xbf16>, vector<16x16xf32> -> vector<16x16xf32>
    %c0_9 = arith.constant 0 : index
    %c0_10 = arith.constant 0 : index
    %10 = vector.load %arg8[%c0_9, %c0_10] : memref<16x1xf32, #tpu.memory_space<vmem>>, vector<16x1xf32>
    %cst_11 = arith.constant dense<0xFF800000> : vector<16xf32>
    %11 = vector.multi_reduction <maximumf>, %9, %cst_11 [1] : vector<16x16xf32> to vector<16xf32>
    %12 = vector.shape_cast %11 : vector<16xf32> to vector<16x1xf32>
    %13 = arith.maximumf %10, %12 : vector<16x1xf32>
    %14 = arith.subf %10, %13 : vector<16x1xf32>
    %15 = math.exp %14 : vector<16x1xf32>
    %16 = vector.broadcast %13 : vector<16x1xf32> to vector<16x16xf32>
    %17 = arith.subf %9, %16 : vector<16x16xf32>
    %18 = math.exp %17 : vector<16x16xf32>
    %c0_12 = arith.constant 0 : index
    %c0_13 = arith.constant 0 : index
    %19 = vector.load %arg9[%c0_12, %c0_13] : memref<16x1xf32, #tpu.memory_space<vmem>>, vector<16x1xf32>
    %20 = arith.mulf %15, %19 : vector<16x1xf32>
    %cst_14 = arith.constant dense<0.000000e+00> : vector<16xf32>
    %21 = vector.multi_reduction <add>, %18, %cst_14 [1] : vector<16x16xf32> to vector<16xf32>
    %22 = vector.shape_cast %21 : vector<16xf32> to vector<16x1xf32>
    %23 = arith.addf %20, %22 : vector<16x1xf32>
    %c0_15 = arith.constant 0 : index
    %c0_16 = arith.constant 0 : index
    %24 = vector.load %arg9[%c0_15, %c0_16] : memref<16x1xf32, #tpu.memory_space<vmem>>, vector<16x1xf32>
    tpu.vector_store %arg9[%c0_15, %c0_16], %23 {strides = array<i32>} : memref<16x1xf32, #tpu.memory_space<vmem>>, vector<16x1xf32>,
    %c0_17 = arith.constant 0 : index
    %c0_18 = arith.constant 0 : index
    %25 = vector.load %arg10[%c0_17, %c0_18] : memref<16x128xf32, #tpu.memory_space<vmem>>, vector<16x128xf32>
    %26 = vector.broadcast %15 : vector<16x1xf32> to vector<16x128xf32>
    %27 = arith.mulf %26, %25 : vector<16x128xf32>
    %28 = arith.truncf %18 : vector<16x16xf32> to vector<16x16xbf16>
    %cst_19 = arith.constant dense<0.000000e+00> : vector<16x128xf32>
    %29 = tpu.matmul %28, %8, %cst_19 {dimension_numbers = #tpu.dot_dimension_numbers<[1], [0], [0], [1], [0, 0, 1, 1], [], []>} : vector<16x16xbf16>, vector<16x128xbf16>, vector<16x128xf32> -> vector<16x128xf32>
    %30 = arith.addf %27, %29 : vector<16x128xf32>
    %c0_20 = arith.constant 0 : index
    %c0_21 = arith.constant 0 : index
    %31 = vector.load %arg10[%c0_20, %c0_21] : memref<16x128xf32, #tpu.memory_space<vmem>>, vector<16x128xf32>
    tpu.vector_store %arg10[%c0_20, %c0_21], %30 {strides = array<i32>} : memref<16x128xf32, #tpu.memory_space<vmem>>, vector<16x128xf32>,
    %c0_22 = arith.constant 0 : index
    %c0_23 = arith.constant 0 : index
    %32 = vector.load %arg8[%c0_22, %c0_23] : memref<16x1xf32, #tpu.memory_space<vmem>>, vector<16x1xf32>
    tpu.vector_store %arg8[%c0_22, %c0_23], %13 {strides = array<i32>} : memref<16x1xf32, #tpu.memory_space<vmem>>, vector<16x1xf32>,
    %c0_i32_24 = arith.constant 0 : i32
    %33 = arith.cmpi eq, %arg3, %c0_i32_24 : i32
    %34 = arith.extui %33 : i1 to i32
    %c0_i32_25 = arith.constant 0 : i32
    %35 = arith.cmpi ne, %34, %c0_i32_25 : i32
    scf.if %35 {
      %c0_26 = arith.constant 0 : index
      %c0_27 = arith.constant 0 : index
      %36 = vector.load %arg10[%c0_26, %c0_27] : memref<16x128xf32, #tpu.memory_space<vmem>>, vector<16x128xf32>
      %c0_28 = arith.constant 0 : index
      %c0_29 = arith.constant 0 : index
      %37 = vector.load %arg9[%c0_28, %c0_29] : memref<16x1xf32, #tpu.memory_space<vmem>>, vector<16x1xf32>
      %38 = tpu.reciprocal %37 {approx = true} : vector<16x1xf32> -> vector<16x1xf32>
      %39 = vector.broadcast %38 : vector<16x1xf32> to vector<16x128xf32>
      %40 = arith.mulf %36, %39 : vector<16x128xf32>
      %41 = arith.truncf %40 : vector<16x128xf32> to vector<16x128xbf16>
      %c0_30 = arith.constant 0 : index
      %c0_31 = arith.constant 0 : index
      %c0_32 = arith.constant 0 : index
      %42 = vector.load %arg7[%c0_30, %c0_31, %c0_32] : memref<1x16x128xbf16, #tpu.memory_space<vmem>>, vector<1x16x128xbf16>
      %43 = vector.shape_cast %42 : vector<1x16x128xbf16> to vector<16x128xbf16>
      %44 = vector.shape_cast %41 : vector<16x128xbf16> to vector<1x16x128xbf16>
      tpu.vector_store %arg7[%c0_30, %c0_31, %c0_32], %44 {strides = array<i32>} : memref<1x16x128xbf16, #tpu.memory_space<vmem>>, vector<1x16x128xbf16>,
    } else {
    }
    return
  }
  func.func @transform_0(%arg0: i32, %arg1: i32, %arg2: i32, %arg3: i32) -> (i32, i32, i32) {
    %c0_i32 = arith.constant 0 : i32
    return %arg0, %arg2, %arg1 : i32, i32, i32
  }
  func.func @transform_1(%arg0: i32, %arg1: i32, %arg2: i32, %arg3: i32) -> (i32, i32, i32) {
    %c2_i32 = arith.constant 2 : i32
    %0 = arith.addi %c2_i32, %arg1 : i32
    %c0_i32 = arith.constant 0 : i32
    return %arg0, %arg3, %0 : i32, i32, i32
  }
  func.func @transform_2(%arg0: i32, %arg1: i32, %arg2: i32, %arg3: i32) -> (i32, i32, i32) {
    %c4_i32 = arith.constant 4 : i32
    %0 = arith.addi %c4_i32, %arg1 : i32
    %c0_i32 = arith.constant 0 : i32
    return %arg0, %arg3, %0 : i32, i32, i32
  }
  func.func @transform_3(%arg0: i32, %arg1: i32, %arg2: i32, %arg3: i32) -> (i32, i32, i32) {
    %c0_i32 = arith.constant 0 : i32
    return %arg0, %arg2, %arg1 : i32, i32, i32
  }
}

module attributes {stable_mosaic.version = 11 : i64} {
  func.func @_ln_matmul_kernel(%arg0: i32, %arg1: i32, %arg2: memref<32x256xf32, #tpu.memory_space<vmem>>, %arg3: memref<1x256xf32, #tpu.memory_space<vmem>>, %arg4: memref<1x256xf32, #tpu.memory_space<vmem>>, %arg5: memref<256x256xbf16, #tpu.memory_space<vmem>>, %arg6: memref<1x256xf32, #tpu.memory_space<vmem>>, %arg7: memref<32x256xbf16, #tpu.memory_space<vmem>>) attributes {dimension_semantics = [#tpu.dimension_semantics<parallel>, #tpu.dimension_semantics<parallel>], iteration_bounds = array<i64: 1, 3>, scalar_prefetch = 0 : i64, scratch_operands = 0 : i64, tpu.core_type = #tpu.core_type<tc>, window_params = [{transform_indices = @transform_0, window_bounds = array<i64: 32, 256>}, {pipeline_mode = #tpu.pipeline_mode<synchronous>, transform_indices = @transform_1, window_bounds = array<i64: 1, 256>}, {pipeline_mode = #tpu.pipeline_mode<synchronous>, transform_indices = @transform_2, window_bounds = array<i64: 1, 256>}, {transform_indices = @transform_3, window_bounds = array<i64: 256, 256>}, {transform_indices = @transform_4, window_bounds = array<i64: 1, 256>}, {transform_indices = @transform_5, window_bounds = array<i64: 32, 256>}]} {
    %c0 = arith.constant 0 : index
    %c0_0 = arith.constant 0 : index
    %0 = vector.load %arg2[%c0, %c0_0] : memref<32x256xf32, #tpu.memory_space<vmem>>, vector<32x256xf32>
    %cst = arith.constant dense<0.000000e+00> : vector<32xf32>
    %1 = vector.multi_reduction <add>, %0, %cst [1] : vector<32x256xf32> to vector<32xf32>
    %2 = vector.shape_cast %1 : vector<32xf32> to vector<32x1xf32>
    %cst_1 = arith.constant 2.560000e+02 : f32
    %3 = vector.broadcast %cst_1 : f32 to vector<32x1xf32>
    %4 = arith.divf %2, %3 : vector<32x1xf32>
    %5 = vector.broadcast %4 : vector<32x1xf32> to vector<32x256xf32>
    %6 = arith.subf %0, %5 : vector<32x256xf32>
    %7 = arith.mulf %6, %6 : vector<32x256xf32>
    %cst_2 = arith.constant dense<0.000000e+00> : vector<32xf32>
    %8 = vector.multi_reduction <add>, %7, %cst_2 [1] : vector<32x256xf32> to vector<32xf32>
    %9 = vector.shape_cast %8 : vector<32xf32> to vector<32x1xf32>
    %cst_3 = arith.constant 2.560000e+02 : f32
    %10 = vector.broadcast %cst_3 : f32 to vector<32x1xf32>
    %11 = arith.divf %9, %10 : vector<32x1xf32>
    %12 = vector.broadcast %4 : vector<32x1xf32> to vector<32x256xf32>
    %13 = arith.subf %0, %12 : vector<32x256xf32>
    %cst_4 = arith.constant 9.99999974E-6 : f32
    %14 = vector.broadcast %cst_4 : f32 to vector<32x1xf32>
    %15 = arith.addf %11, %14 : vector<32x1xf32>
    %16 = math.rsqrt %15 : vector<32x1xf32>
    %17 = vector.broadcast %16 : vector<32x1xf32> to vector<32x256xf32>
    %18 = arith.mulf %13, %17 : vector<32x256xf32>
    %c0_5 = arith.constant 0 : index
    %c0_6 = arith.constant 0 : index
    %19 = vector.load %arg3[%c0_5, %c0_6] : memref<1x256xf32, #tpu.memory_space<vmem>>, vector<1x256xf32>
    %20 = vector.broadcast %19 : vector<1x256xf32> to vector<32x256xf32>
    %21 = arith.mulf %18, %20 : vector<32x256xf32>
    %c0_7 = arith.constant 0 : index
    %c0_8 = arith.constant 0 : index
    %22 = vector.load %arg4[%c0_7, %c0_8] : memref<1x256xf32, #tpu.memory_space<vmem>>, vector<1x256xf32>
    %23 = vector.broadcast %22 : vector<1x256xf32> to vector<32x256xf32>
    %24 = arith.addf %21, %23 : vector<32x256xf32>
    %25 = arith.truncf %24 : vector<32x256xf32> to vector<32x256xbf16>
    %c0_9 = arith.constant 0 : index
    %c0_10 = arith.constant 0 : index
    %26 = vector.load %arg5[%c0_9, %c0_10] : memref<256x256xbf16, #tpu.memory_space<vmem>>, vector<256x256xbf16>
    %cst_11 = arith.constant dense<0.000000e+00> : vector<32x256xf32>
    %27 = tpu.matmul %25, %26, %cst_11 {dimension_numbers = #tpu.dot_dimension_numbers<[1], [0], [0], [1], [0, 0, 1, 1], [], []>} : vector<32x256xbf16>, vector<256x256xbf16>, vector<32x256xf32> -> vector<32x256xf32>
    %c0_12 = arith.constant 0 : index
    %c0_13 = arith.constant 0 : index
    %28 = vector.load %arg6[%c0_12, %c0_13] : memref<1x256xf32, #tpu.memory_space<vmem>>, vector<1x256xf32>
    %29 = vector.broadcast %28 : vector<1x256xf32> to vector<32x256xf32>
    %30 = arith.addf %27, %29 : vector<32x256xf32>
    %31 = arith.truncf %30 : vector<32x256xf32> to vector<32x256xbf16>
    %c0_14 = arith.constant 0 : index
    %c0_15 = arith.constant 0 : index
    %32 = vector.load %arg7[%c0_14, %c0_15] : memref<32x256xbf16, #tpu.memory_space<vmem>>, vector<32x256xbf16>
    tpu.vector_store %arg7[%c0_14, %c0_15], %31 {strides = array<i32>} : memref<32x256xbf16, #tpu.memory_space<vmem>>, vector<32x256xbf16>,
    return
  }
  func.func @transform_0(%arg0: i32, %arg1: i32) -> (i32, i32) {
    %c0_i32 = arith.constant 0 : i32
    %c0_i32_0 = arith.constant 0 : i32
    return %arg0, %c0_i32 : i32, i32
  }
  func.func @transform_1(%arg0: i32, %arg1: i32) -> (i32, i32) {
    %c0_i32 = arith.constant 0 : i32
    %c0_i32_0 = arith.constant 0 : i32
    %c0_i32_1 = arith.constant 0 : i32
    return %c0_i32, %c0_i32_0 : i32, i32
  }
  func.func @transform_2(%arg0: i32, %arg1: i32) -> (i32, i32) {
    %c0_i32 = arith.constant 0 : i32
    %c0_i32_0 = arith.constant 0 : i32
    %c0_i32_1 = arith.constant 0 : i32
    return %c0_i32, %c0_i32_0 : i32, i32
  }
  func.func @transform_3(%arg0: i32, %arg1: i32) -> (i32, i32) {
    %c0_i32 = arith.constant 0 : i32
    %c0_i32_0 = arith.constant 0 : i32
    return %c0_i32, %arg1 : i32, i32
  }
  func.func @transform_4(%arg0: i32, %arg1: i32) -> (i32, i32) {
    %c0_i32 = arith.constant 0 : i32
    %c0_i32_0 = arith.constant 0 : i32
    return %c0_i32, %arg1 : i32, i32
  }
  func.func @transform_5(%arg0: i32, %arg1: i32) -> (i32, i32) {
    %c0_i32 = arith.constant 0 : i32
    return %arg0, %arg1 : i32, i32
  }
}

module attributes {stable_mosaic.version = 11 : i64} {
  func.func @_matmul_kernel(%arg0: i32, %arg1: i32, %arg2: memref<32x256xbf16, #tpu.memory_space<vmem>>, %arg3: memref<256x256xbf16, #tpu.memory_space<vmem>>, %arg4: memref<1x256xf32, #tpu.memory_space<vmem>>, %arg5: memref<32x256xf32, #tpu.memory_space<vmem>>, %arg6: memref<32x256xf32, #tpu.memory_space<vmem>>) attributes {dimension_semantics = [#tpu.dimension_semantics<parallel>, #tpu.dimension_semantics<parallel>], iteration_bounds = array<i64: 1, 1>, scalar_prefetch = 0 : i64, scratch_operands = 0 : i64, tpu.core_type = #tpu.core_type<tc>, window_params = [{transform_indices = @transform_0, window_bounds = array<i64: 32, 256>}, {transform_indices = @transform_1, window_bounds = array<i64: 256, 256>}, {transform_indices = @transform_2, window_bounds = array<i64: 1, 256>}, {transform_indices = @transform_3, window_bounds = array<i64: 32, 256>}, {transform_indices = @transform_4, window_bounds = array<i64: 32, 256>}]} {
    %c0 = arith.constant 0 : index
    %c0_0 = arith.constant 0 : index
    %0 = vector.load %arg2[%c0, %c0_0] : memref<32x256xbf16, #tpu.memory_space<vmem>>, vector<32x256xbf16>
    %c0_1 = arith.constant 0 : index
    %c0_2 = arith.constant 0 : index
    %1 = vector.load %arg3[%c0_1, %c0_2] : memref<256x256xbf16, #tpu.memory_space<vmem>>, vector<256x256xbf16>
    %cst = arith.constant dense<0.000000e+00> : vector<32x256xf32>
    %2 = tpu.matmul %0, %1, %cst {dimension_numbers = #tpu.dot_dimension_numbers<[1], [0], [0], [1], [0, 0, 1, 1], [], []>} : vector<32x256xbf16>, vector<256x256xbf16>, vector<32x256xf32> -> vector<32x256xf32>
    %c0_3 = arith.constant 0 : index
    %c0_4 = arith.constant 0 : index
    %3 = vector.load %arg4[%c0_3, %c0_4] : memref<1x256xf32, #tpu.memory_space<vmem>>, vector<1x256xf32>
    %4 = vector.broadcast %3 : vector<1x256xf32> to vector<32x256xf32>
    %5 = arith.addf %2, %4 : vector<32x256xf32>
    %c0_5 = arith.constant 0 : index
    %c0_6 = arith.constant 0 : index
    %6 = vector.load %arg5[%c0_5, %c0_6] : memref<32x256xf32, #tpu.memory_space<vmem>>, vector<32x256xf32>
    %7 = arith.addf %5, %6 : vector<32x256xf32>
    %c0_7 = arith.constant 0 : index
    %c0_8 = arith.constant 0 : index
    %8 = vector.load %arg6[%c0_7, %c0_8] : memref<32x256xf32, #tpu.memory_space<vmem>>, vector<32x256xf32>
    tpu.vector_store %arg6[%c0_7, %c0_8], %7 {strides = array<i32>} : memref<32x256xf32, #tpu.memory_space<vmem>>, vector<32x256xf32>,
    return
  }
  func.func @transform_0(%arg0: i32, %arg1: i32) -> (i32, i32) {
    %c0_i32 = arith.constant 0 : i32
    %c0_i32_0 = arith.constant 0 : i32
    return %arg0, %c0_i32 : i32, i32
  }
  func.func @transform_1(%arg0: i32, %arg1: i32) -> (i32, i32) {
    %c0_i32 = arith.constant 0 : i32
    %c0_i32_0 = arith.constant 0 : i32
    return %c0_i32, %arg1 : i32, i32
  }
  func.func @transform_2(%arg0: i32, %arg1: i32) -> (i32, i32) {
    %c0_i32 = arith.constant 0 : i32
    %c0_i32_0 = arith.constant 0 : i32
    return %c0_i32, %arg1 : i32, i32
  }
  func.func @transform_3(%arg0: i32, %arg1: i32) -> (i32, i32) {
    %c0_i32 = arith.constant 0 : i32
    return %arg0, %arg1 : i32, i32
  }
  func.func @transform_4(%arg0: i32, %arg1: i32) -> (i32, i32) {
    %c0_i32 = arith.constant 0 : i32
    return %arg0, %arg1 : i32, i32
  }
}

module attributes {stable_mosaic.version = 11 : i64} {
  func.func @_ln_matmul_kernel(%arg0: i32, %arg1: i32, %arg2: memref<32x256xf32, #tpu.memory_space<vmem>>, %arg3: memref<1x256xf32, #tpu.memory_space<vmem>>, %arg4: memref<1x256xf32, #tpu.memory_space<vmem>>, %arg5: memref<256x256xbf16, #tpu.memory_space<vmem>>, %arg6: memref<1x256xf32, #tpu.memory_space<vmem>>, %arg7: memref<32x256xbf16, #tpu.memory_space<vmem>>) attributes {dimension_semantics = [#tpu.dimension_semantics<parallel>, #tpu.dimension_semantics<parallel>], iteration_bounds = array<i64: 1, 4>, scalar_prefetch = 0 : i64, scratch_operands = 0 : i64, tpu.core_type = #tpu.core_type<tc>, window_params = [{transform_indices = @transform_0, window_bounds = array<i64: 32, 256>}, {pipeline_mode = #tpu.pipeline_mode<synchronous>, transform_indices = @transform_1, window_bounds = array<i64: 1, 256>}, {pipeline_mode = #tpu.pipeline_mode<synchronous>, transform_indices = @transform_2, window_bounds = array<i64: 1, 256>}, {transform_indices = @transform_3, window_bounds = array<i64: 256, 256>}, {transform_indices = @transform_4, window_bounds = array<i64: 1, 256>}, {transform_indices = @transform_5, window_bounds = array<i64: 32, 256>}]} {
    %c0 = arith.constant 0 : index
    %c0_0 = arith.constant 0 : index
    %0 = vector.load %arg2[%c0, %c0_0] : memref<32x256xf32, #tpu.memory_space<vmem>>, vector<32x256xf32>
    %cst = arith.constant dense<0.000000e+00> : vector<32xf32>
    %1 = vector.multi_reduction <add>, %0, %cst [1] : vector<32x256xf32> to vector<32xf32>
    %2 = vector.shape_cast %1 : vector<32xf32> to vector<32x1xf32>
    %cst_1 = arith.constant 2.560000e+02 : f32
    %3 = vector.broadcast %cst_1 : f32 to vector<32x1xf32>
    %4 = arith.divf %2, %3 : vector<32x1xf32>
    %5 = vector.broadcast %4 : vector<32x1xf32> to vector<32x256xf32>
    %6 = arith.subf %0, %5 : vector<32x256xf32>
    %7 = arith.mulf %6, %6 : vector<32x256xf32>
    %cst_2 = arith.constant dense<0.000000e+00> : vector<32xf32>
    %8 = vector.multi_reduction <add>, %7, %cst_2 [1] : vector<32x256xf32> to vector<32xf32>
    %9 = vector.shape_cast %8 : vector<32xf32> to vector<32x1xf32>
    %cst_3 = arith.constant 2.560000e+02 : f32
    %10 = vector.broadcast %cst_3 : f32 to vector<32x1xf32>
    %11 = arith.divf %9, %10 : vector<32x1xf32>
    %12 = vector.broadcast %4 : vector<32x1xf32> to vector<32x256xf32>
    %13 = arith.subf %0, %12 : vector<32x256xf32>
    %cst_4 = arith.constant 9.99999974E-6 : f32
    %14 = vector.broadcast %cst_4 : f32 to vector<32x1xf32>
    %15 = arith.addf %11, %14 : vector<32x1xf32>
    %16 = math.rsqrt %15 : vector<32x1xf32>
    %17 = vector.broadcast %16 : vector<32x1xf32> to vector<32x256xf32>
    %18 = arith.mulf %13, %17 : vector<32x256xf32>
    %c0_5 = arith.constant 0 : index
    %c0_6 = arith.constant 0 : index
    %19 = vector.load %arg3[%c0_5, %c0_6] : memref<1x256xf32, #tpu.memory_space<vmem>>, vector<1x256xf32>
    %20 = vector.broadcast %19 : vector<1x256xf32> to vector<32x256xf32>
    %21 = arith.mulf %18, %20 : vector<32x256xf32>
    %c0_7 = arith.constant 0 : index
    %c0_8 = arith.constant 0 : index
    %22 = vector.load %arg4[%c0_7, %c0_8] : memref<1x256xf32, #tpu.memory_space<vmem>>, vector<1x256xf32>
    %23 = vector.broadcast %22 : vector<1x256xf32> to vector<32x256xf32>
    %24 = arith.addf %21, %23 : vector<32x256xf32>
    %25 = arith.truncf %24 : vector<32x256xf32> to vector<32x256xbf16>
    %c0_9 = arith.constant 0 : index
    %c0_10 = arith.constant 0 : index
    %26 = vector.load %arg5[%c0_9, %c0_10] : memref<256x256xbf16, #tpu.memory_space<vmem>>, vector<256x256xbf16>
    %cst_11 = arith.constant dense<0.000000e+00> : vector<32x256xf32>
    %27 = tpu.matmul %25, %26, %cst_11 {dimension_numbers = #tpu.dot_dimension_numbers<[1], [0], [0], [1], [0, 0, 1, 1], [], []>} : vector<32x256xbf16>, vector<256x256xbf16>, vector<32x256xf32> -> vector<32x256xf32>
    %c0_12 = arith.constant 0 : index
    %c0_13 = arith.constant 0 : index
    %28 = vector.load %arg6[%c0_12, %c0_13] : memref<1x256xf32, #tpu.memory_space<vmem>>, vector<1x256xf32>
    %29 = vector.broadcast %28 : vector<1x256xf32> to vector<32x256xf32>
    %30 = arith.addf %27, %29 : vector<32x256xf32>
    %cst_14 = arith.constant 5.000000e-01 : f32
    %31 = vector.broadcast %cst_14 : f32 to vector<32x256xf32>
    %32 = arith.mulf %31, %30 : vector<32x256xf32>
    %cst_15 = arith.constant 0.707106769 : f32
    %33 = vector.broadcast %cst_15 : f32 to vector<32x256xf32>
    %34 = arith.mulf %30, %33 : vector<32x256xf32>
    %35 = math.erf %34 : vector<32x256xf32>
    %cst_16 = arith.constant 1.000000e+00 : f32
    %36 = vector.broadcast %cst_16 : f32 to vector<32x256xf32>
    %37 = arith.addf %36, %35 : vector<32x256xf32>
    %38 = arith.mulf %32, %37 : vector<32x256xf32>
    %39 = arith.truncf %38 : vector<32x256xf32> to vector<32x256xbf16>
    %c0_17 = arith.constant 0 : index
    %c0_18 = arith.constant 0 : index
    %40 = vector.load %arg7[%c0_17, %c0_18] : memref<32x256xbf16, #tpu.memory_space<vmem>>, vector<32x256xbf16>
    tpu.vector_store %arg7[%c0_17, %c0_18], %39 {strides = array<i32>} : memref<32x256xbf16, #tpu.memory_space<vmem>>, vector<32x256xbf16>,
    return
  }
  func.func @transform_0(%arg0: i32, %arg1: i32) -> (i32, i32) {
    %c0_i32 = arith.constant 0 : i32
    %c0_i32_0 = arith.constant 0 : i32
    return %arg0, %c0_i32 : i32, i32
  }
  func.func @transform_1(%arg0: i32, %arg1: i32) -> (i32, i32) {
    %c0_i32 = arith.constant 0 : i32
    %c0_i32_0 = arith.constant 0 : i32
    %c0_i32_1 = arith.constant 0 : i32
    return %c0_i32, %c0_i32_0 : i32, i32
  }
  func.func @transform_2(%arg0: i32, %arg1: i32) -> (i32, i32) {
    %c0_i32 = arith.constant 0 : i32
    %c0_i32_0 = arith.constant 0 : i32
    %c0_i32_1 = arith.constant 0 : i32
    return %c0_i32, %c0_i32_0 : i32, i32
  }
  func.func @transform_3(%arg0: i32, %arg1: i32) -> (i32, i32) {
    %c0_i32 = arith.constant 0 : i32
    %c0_i32_0 = arith.constant 0 : i32
    return %c0_i32, %arg1 : i32, i32
  }
  func.func @transform_4(%arg0: i32, %arg1: i32) -> (i32, i32) {
    %c0_i32 = arith.constant 0 : i32
    %c0_i32_0 = arith.constant 0 : i32
    return %c0_i32, %arg1 : i32, i32
  }
  func.func @transform_5(%arg0: i32, %arg1: i32) -> (i32, i32) {
    %c0_i32 = arith.constant 0 : i32
    return %arg0, %arg1 : i32, i32
  }
}

module attributes {stable_mosaic.version = 11 : i64} {
  func.func @_matmul_kernel(%arg0: i32, %arg1: i32, %arg2: memref<32x1024xbf16, #tpu.memory_space<vmem>>, %arg3: memref<1024x256xbf16, #tpu.memory_space<vmem>>, %arg4: memref<1x256xf32, #tpu.memory_space<vmem>>, %arg5: memref<32x256xf32, #tpu.memory_space<vmem>>, %arg6: memref<32x256xf32, #tpu.memory_space<vmem>>) attributes {dimension_semantics = [#tpu.dimension_semantics<parallel>, #tpu.dimension_semantics<parallel>], iteration_bounds = array<i64: 1, 1>, scalar_prefetch = 0 : i64, scratch_operands = 0 : i64, tpu.core_type = #tpu.core_type<tc>, window_params = [{transform_indices = @transform_0, window_bounds = array<i64: 32, 1024>}, {transform_indices = @transform_1, window_bounds = array<i64: 1024, 256>}, {transform_indices = @transform_2, window_bounds = array<i64: 1, 256>}, {transform_indices = @transform_3, window_bounds = array<i64: 32, 256>}, {transform_indices = @transform_4, window_bounds = array<i64: 32, 256>}]} {
    %c0 = arith.constant 0 : index
    %c0_0 = arith.constant 0 : index
    %0 = vector.load %arg2[%c0, %c0_0] : memref<32x1024xbf16, #tpu.memory_space<vmem>>, vector<32x1024xbf16>
    %c0_1 = arith.constant 0 : index
    %c0_2 = arith.constant 0 : index
    %1 = vector.load %arg3[%c0_1, %c0_2] : memref<1024x256xbf16, #tpu.memory_space<vmem>>, vector<1024x256xbf16>
    %cst = arith.constant dense<0.000000e+00> : vector<32x256xf32>
    %2 = tpu.matmul %0, %1, %cst {dimension_numbers = #tpu.dot_dimension_numbers<[1], [0], [0], [1], [0, 0, 1, 1], [], []>} : vector<32x1024xbf16>, vector<1024x256xbf16>, vector<32x256xf32> -> vector<32x256xf32>
    %c0_3 = arith.constant 0 : index
    %c0_4 = arith.constant 0 : index
    %3 = vector.load %arg4[%c0_3, %c0_4] : memref<1x256xf32, #tpu.memory_space<vmem>>, vector<1x256xf32>
    %4 = vector.broadcast %3 : vector<1x256xf32> to vector<32x256xf32>
    %5 = arith.addf %2, %4 : vector<32x256xf32>
    %c0_5 = arith.constant 0 : index
    %c0_6 = arith.constant 0 : index
    %6 = vector.load %arg5[%c0_5, %c0_6] : memref<32x256xf32, #tpu.memory_space<vmem>>, vector<32x256xf32>
    %7 = arith.addf %5, %6 : vector<32x256xf32>
    %c0_7 = arith.constant 0 : index
    %c0_8 = arith.constant 0 : index
    %8 = vector.load %arg6[%c0_7, %c0_8] : memref<32x256xf32, #tpu.memory_space<vmem>>, vector<32x256xf32>
    tpu.vector_store %arg6[%c0_7, %c0_8], %7 {strides = array<i32>} : memref<32x256xf32, #tpu.memory_space<vmem>>, vector<32x256xf32>,
    return
  }
  func.func @transform_0(%arg0: i32, %arg1: i32) -> (i32, i32) {
    %c0_i32 = arith.constant 0 : i32
    %c0_i32_0 = arith.constant 0 : i32
    return %arg0, %c0_i32 : i32, i32
  }
  func.func @transform_1(%arg0: i32, %arg1: i32) -> (i32, i32) {
    %c0_i32 = arith.constant 0 : i32
    %c0_i32_0 = arith.constant 0 : i32
    return %c0_i32, %arg1 : i32, i32
  }
  func.func @transform_2(%arg0: i32, %arg1: i32) -> (i32, i32) {
    %c0_i32 = arith.constant 0 : i32
    %c0_i32_0 = arith.constant 0 : i32
    return %c0_i32, %arg1 : i32, i32
  }
  func.func @transform_3(%arg0: i32, %arg1: i32) -> (i32, i32) {
    %c0_i32 = arith.constant 0 : i32
    return %arg0, %arg1 : i32, i32
  }
  func.func @transform_4(%arg0: i32, %arg1: i32) -> (i32, i32) {
    %c0_i32 = arith.constant 0 : i32
    return %arg0, %arg1 : i32, i32
  }
}

</mosaic_0001>

<bundles_post_ra>
// kernel: residual_attention_block.5
= control target key start
LH: loop header
LB: loop body
LE: loop exit
PB: predicated region body
PF: predicated region fallthrough
CT: control target
= control target key end

     0   :  { %s1572_s0 = inlined_call_operand.hbm [shape: f32[32,256], index: 0, kind: input, shape index: {}]   ;;  %s1573_s1 = inlined_call_operand.vmem [shape: f32[1,256], index: 1, kind: input, shape index: {}]   ;;  %s1574_s2 = inlined_call_operand.vmem [shape: f32[1,256], index: 2, kind: input, shape index: {}]   ;;  %s1575_s3 = inlined_call_operand.hbm [shape: bf16[256,768], index: 3, kind: input, shape index: {}]   ;;  %s1576_s4 = inlined_call_operand.vmem [shape: f32[1,768], index: 4, kind: input, shape index: {}]   ;;  %s1577_s5 = inlined_call_operand.vmem [shape: bf16[32,768], index: 5, kind: output, shape index: {}]  }
   0x1   :  { %1578 = sst [smem:[#allocation9_spill]] %s1572_s0 }
   0x2   :  { %10 = vsyncpa [#allocation3], 0 }
   0x3   :  { %11 = vsyncpa [#allocation5], 0 }
   0x4   :  { %13 = vsyncpa [#allocation5 + $0x1], 0  ;;  %s1302_s18 = smov 0   ;;  %s1304_s19 = smov 0  }
   0x5   :  { %s1306_s20 = smov 0   ;;  %s1308_s21 = smov 0  }
   0x6   :  { %s1310_s22 = smov 0   ;;  %s1312_s23 = smov 0  }
   0x7 LB: > { %s887_s24 = sadd.s32 4294967295, %s1263_s23   ;;  %p119_p0 = scmp.ne.s32.totalorder %s1247_s19, %s1243_s18  ;;  %s1263_s23 = sphi %s1312_s23, %s19_s23   ;;  %s1259_s22 = sphi %s1310_s22, %s1590_s22   ;;  %s1255_s21 = sphi %s1308_s21, %s1589_s21   ;;  %s1251_s20 = sphi %s1306_s20, %s1588_s20   ;;  %s1247_s19 = sphi %s1304_s19, %s1587_s19   ;;  %s1243_s18 = sphi %s1302_s18, %s1586_s18  }
   0x8   : > { %p1332_p1 = scmp.eq.s32.totalorder %s887_s24, 0  ;;  %p1336_p2 = scmp.eq.s32.totalorder %s887_s24, 2 }
   0x9   : > { %p889_p3 = scmp.ge.s32.totalorder %s1263_s23, 1  ;;  %p184_p4 = scmp.lt.s32.totalorder %s1263_s23, 4 }
   0xa   : > { %p1344_p5 = por %p1332_p1, %p119_p0  ;;  %s1583_s0 = sld [smem:[#allocation9_spill]] }
   0xb   : > { %p1348_p6 = pnand %p889_p3, %p184_p4  ;;  %s1265_s7 = smov [#allocation2]  }
   0xc   : > { %s201_s8 = sshll.u32 %s1265_s7, 4  ;;  %s1266_s9 = smov 256   ;;  %s202_s8 = int_to_ptr.vmem [resolvable:$true] %s201_s8 }
   0xd   : > { %p1073_p7 = pneg %p1348_p6  ;;  %s1267_s10 = smov 16  }
   0xe   : > { %s28_s11 = sadd.s32 1, %s1259_s22  ;;  %s106_s12 = sadd.s32 1, %s1251_s20 }
   0xf   : > { %p1074_p8 = pnand %p1073_p7, %p1332_p1  ;;  %p29_p9 = scmp.ge.s32.totalorder %s28_s11, 3 }
  0x10   : > { %s199_s6 = sshll.u32 %s1583_s0, 4  ;;  %p113_p10 = scmp.ne.s32.totalorder %s1251_s20, %s1247_s19  ;;  %s200_s6 = int_to_ptr.hbm [resolvable:$true] %s199_s6 }
  0x11   : > { %1076 = dma.hbm_to_vmem [thread:$0]  (!%p1074_p8), %s200_s6, 1024, %s202_s8, [#allocation3], %s1266_s9, %s1266_s9, %s1267_s10  }
  0x12   : > { %p114_p11 = scmp.eq.s32.totalorder %s1263_s23, 0  ;;  %p1082_p12 = scmp.lt.s32.totalorder %s1263_s23, 3 }
  0x13   : > { %s1592_s11 = smov (%p29_p9, %s28_s11), 0  ;;  %p1373_p0 = por %p1336_p2, %p113_p10 }
  0x14   : > { %p1367_p13 = por %p114_p11, %p113_p10  ;;  %s103_s15 = ssub.s32 %s1259_s22, %s1592_s11 }
  0x15   : > { %s221_s16 = sand.u32 1, %s1251_s20   ;;  %p104_p3 = scmp.eq.s32.totalorder %s103_s15, 0 }
  0x16   : > { %s892_s17 = sshll.u32 %s221_s16, 8  ;;  %s1033_s18 = sshll.u32 %s1259_s22, 3 }
  0x17   : > { %s1382_s24 = scalar_select %p104_p3, %s1251_s20, %s106_s12  }
  0x18   : > { %s230_s6 = scalar_lea.hbm %s1575_s3, %s1033_s18  ;;  %s225_s8 = scalar_lea.vmem [#allocation4], %s892_s17 }
  0x19   : > { %s231_s7 = sshll.u32 %s230_s6, 4  ;;  %s233_s9 = sshll.u32 %s225_s8, 4  ;;  %s232_s7 = int_to_ptr.hbm [resolvable:$true] %s231_s7  ;;  %s234_s9 = int_to_ptr.vmem [resolvable:$true] %s233_s9 }
  0x1a   : > { %p1078_p2 = pnand %p1082_p12, %p1367_p13  ;;  %s222_s26 = scalar_lea.sflag [#allocation5], %s221_s16 }
  0x1b   : > { %s1268_s10 = smov 384   ;;  %s1269_s0 = smov 128  }
  0x1c   : > { %s1270_s15 = smov 8   ;;  %253 = sbr.rel (%p1348_p6) target bundleno = 492 (0x1ec), region = 40 }
  0x1d   : > { %1080 = dma.hbm_to_vmem [thread:$0]  (!%p1078_p2), %s232_s7, 4096, %s234_s9, %s222_s26, %s1268_s10, %s1269_s0, %s1270_s15  }
  0x21   : > { %1234 = dma.done.wait (%p1332_p1), [#allocation3], 1024  }
  0x22   : > { %1236 = vsyncadd (%p1332_p1), [#allocation3], 4294966272  ;;  %s1398_s12 = sand.u32 1, %s1247_s19  }
  0x23   : > { %s897_s13 = sshll.u32 %s1398_s12, 8  ;;  %s261_s16 = scalar_lea.sflag [#allocation5], %s1398_s12 }
  0x24   : > { %s1402_s17 = scalar_lea.vmem [#allocation4], %s897_s13 }
  0x25   : > { %1238 = dma.done.wait (%p1344_p5), %s261_s16, 4096  }
  0x26   : > { %1240 = vsyncadd (%p1344_p5), %s261_s16, 4294963200  ;;  %v308_v0 = vld [vmem:[#allocation2 + $0x20] sm:$0xff]  ;;  %v309_v1 = vld [vmem:[#allocation2 + $0x28] sm:$0xff]  ;;  %v1271_v12 = vmov 256.0   ;;  %s899_s18 = sshll.u32 %s1255_s21, 1  ;;  %s898_s7 = sshll.u32 %s1398_s12, 5 }
  0x27   : > { %v304_v2 = vld [vmem:[#allocation2] sm:$0xff]  ;;  %v318_v3 = vadd.f32 %v309_v1, %v308_v0  ;;  %v305_v4 = vld [vmem:[#allocation2 + $0x8] sm:$0xff]  ;;  %v310_v6 = vld [vmem:[#allocation2 + $0x30] sm:$0xff]  ;;  %1139 = vrcp.f32 %v1271_v12  ;;  %p298_p1 = scmp.lt.s32.totalorder %s899_s18, 5  ;;  %s1538_s8 = scalar_lea.vmem [#allocation6], %s898_s7 }
  0x28   : > { %v312_v5 = vadd.f32 %v305_v4, %v304_v2  ;;  %v311_v7 = vld [vmem:[#allocation2 + $0x38] sm:$0xff]  ;;  %v306_v8 = vld [vmem:[#allocation2 + $0x10] sm:$0xff]  ;;  %v950_v59 = vld [vmem:[%s1402_s17 + $0x60] sm:$0xf]  ;;  %s1066_s9 = sshll.u32 (%p1373_p0), %s1255_s21, 3 }
  0x29   : > { %319 = vadd.xlane.f32.xlu1 %v318_v3  ;;  %v307_v9 = vld [vmem:[#allocation2 + $0x18] sm:$0xff]  ;;  %v321_v10 = vadd.f32 %v311_v7, %v310_v6  ;;  %v958_v47 = vld [vmem:[%s1402_s17 + $0x70] sm:$0xf]  ;;  %v1048_v52 = vld [vmem:[%s1402_s17 + $0x74] sm:$0xf]  ;;  %s1594_s18 = smov (!%p298_p1, %s899_s18), 5  ;;  %s745_s15 = scalar_lea.vmem (%p1373_p0), %s1577_s5, %s1066_s9 }
  0x2a   : > { %313 = vadd.xlane.f32.xlu0 %v312_v5  ;;  %v315_v11 = vadd.f32 %v307_v9, %v306_v8  ;;  %v1049_v48 = vld [vmem:[%s1402_s17 + $0x74] sm:$0xf0]  ;;  %v1022_v49 = vld [vmem:[%s1402_s17 + $0xf0] sm:$0xf]  ;;  %v960_v53 = vld [vmem:[%s1402_s17 + $0x78] sm:$0xf0]  ;;  %s300_s6 = scalar_lea.vmem %s1576_s4, %s1594_s18 }
  0x2b   : > { %v959_v50 = vor.u32 %v1049_v48, %v958_v47  ;;  %v1065_v51 = vld [vmem:[%s1402_s17 + $0xf4] sm:$0xf0]  ;;  %v963_v55 = vor.u32 %v1048_v52, %v960_v53  ;;  %v1064_v56 = vld [vmem:[%s1402_s17 + $0xf4] sm:$0xf]  ;;  %v1024_v57 = vld [vmem:[%s1402_s17 + $0xf8] sm:$0xf0] }
  0x2c   : > { %v1023_v54 = vor.u32 %v1065_v51, %v1022_v49  ;;  %v1027_v58 = vor.u32 %v1064_v56, %v1024_v57  ;;  %v1047_v60 = vld [vmem:[%s1402_s17 + $0x64] sm:$0xf0]  ;;  %v1014_v61 = vld [vmem:[%s1402_s17 + $0xe0] sm:$0xf]  ;;  %v1016_v5 = vld [vmem:[%s1402_s17 + $0xe8] sm:$0xf0] }
  0x2d   : > { %v1140_v13 = vpop.eup %1139  ;;  %649 = vmatpush.bf16.msra.mxu0 %v959_v50  ;;  %687 = vmatpush.bf16.msra.mxu2 %v963_v55  ;;  %v951_v62 = vor.u32 %v1047_v60, %v950_v59  ;;  %v1063_v63 = vld [vmem:[%s1402_s17 + $0xe4] sm:$0xf0]  ;;  %v1044_v12 = vld [vmem:[%s1402_s17 + $0x54] sm:$0xf]  ;;  %v992_v50 = vld [vmem:[%s1402_s17 + $0xb8] sm:$0xf0] }
  0x2e   : > { %v325_v14 = vmul.f32 256.0, %v1140_v13  ;;  %vm329_vm0 = vweird.f32 %v1140_v13  ;;  %668 = vmatpush.bf16.msra.mxu1 %v1023_v54  ;;  %706 = vmatpush.bf16.msra.mxu3 %v1027_v58  ;;  %v1056_v49 = vld [vmem:[%s1402_s17 + $0xb4] sm:$0xf]  ;;  %v918_v52 = vld [vmem:[%s1402_s17 + $0x20] sm:$0xf] }
  0x2f   : > { %v995_v51 = vor.u32 %v1056_v49, %v992_v50  ;;  %v1039_v53 = vld [vmem:[%s1402_s17 + $0x24] sm:$0xf0]  ;;  %v982_v54 = vld [vmem:[%s1402_s17 + $0xa0] sm:$0xf]  ;;  %v1038_v57 = vld [vmem:[%s1402_s17 + $0x24] sm:$0xf] }
  0x30   : > { %v326_v15 = vsub.f32 1.0, %v325_v14  ;;  %v919_v55 = vor.u32 %v1039_v53, %v918_v52  ;;  %v1055_v56 = vld [vmem:[%s1402_s17 + $0xa4] sm:$0xf0]  ;;  %v920_v58 = vld [vmem:[%s1402_s17 + $0x28] sm:$0xf0] }
  0x31   : > { %322 = vadd.xlane.f32.xlu1 %v321_v10  ;;  %650 = vmatpush.bf16.msra.mxu0 %v951_v62  ;;  %v983_v59 = vor.u32 %v1055_v56, %v982_v54  ;;  %v923_v60 = vor.u32 %v1038_v57, %v920_v58  ;;  %v984_v62 = vld [vmem:[%s1402_s17 + $0xa8] sm:$0xf0] }
  0x32   : > { %316 = vadd.xlane.f32.xlu0 %v315_v11  ;;  %v327_v16 = vmul.f32 %v1140_v13, %v326_v15  ;;  %v1061_v11 = vld [vmem:[%s1402_s17 + $0xd4] sm:$0xf0] }
  0x34   : > { %v328_v17 = vadd.f32 %v1140_v13, %v327_v16  ;;  %v1060_v16 = vld [vmem:[%s1402_s17 + $0xd4] sm:$0xf] }
  0x36   : > { %v1408_v18 = vsel %vm329_vm0, %v1140_v13, %v328_v17  ;;  %v944_v13 = vld [vmem:[%s1402_s17 + $0x58] sm:$0xf0] }
  0x37   : > { %v947_v15 = vor.u32 %v1044_v12, %v944_v13  ;;  %v1008_v17 = vld [vmem:[%s1402_s17 + $0xd8] sm:$0xf0]  ;;  %v1035_v13 = vld [vmem:[%s1402_s17 + $0x4] sm:$0xf0] }
  0x9c   : > { %v320_v19 = vpop.xlane.xlu1 %319 }
  0x9d   : > { %v333_v20 = vmul.f32 %v1408_v18, %v320_v19  ;;  %v314_v21 = vpop.xlane.xlu0 %313  ;;  %v1011_v19 = vor.u32 %v1060_v16, %v1008_v17 }
  0x9e   : > { %v331_v22 = vmul.f32 %v1408_v18, %v314_v21  ;;  %v1043_v21 = vld [vmem:[%s1402_s17 + $0x44] sm:$0xf0] }
  0x9f   : > { %v1412_v23 = vsub.f32 %v308_v0, %v333_v20  ;;  %v1414_v24 = vsub.f32 %v309_v1, %v333_v20  ;;  %v1046_v0 = vld [vmem:[%s1402_s17 + $0x64] sm:$0xf]  ;;  %v952_v1 = vld [vmem:[%s1402_s17 + $0x68] sm:$0xf0]  ;;  %v934_v20 = vld [vmem:[%s1402_s17 + $0x40] sm:$0xf] }
  0xa0   : > { %v1416_v25 = vsub.f32 %v304_v2, %v331_v22  ;;  %v1418_v26 = vsub.f32 %v305_v4, %v331_v22  ;;  %v1015_v2 = vor.u32 %v1063_v63, %v1014_v61  ;;  %v955_v3 = vor.u32 %v1046_v0, %v952_v1  ;;  %v1062_v4 = vld [vmem:[%s1402_s17 + $0xe4] sm:$0xf]  ;;  %v998_v22 = vld [vmem:[%s1402_s17 + $0xc0] sm:$0xf]  ;;  %v910_v0 = vld [vmem:[%s1402_s17 + $0x10] sm:$0xf] }
  0xa1   : > { %v347_v27 = vmul.f32 %v1412_v23, %v1412_v23  ;;  %v348_v28 = vmul.f32 %v1414_v24, %v1414_v24  ;;  %v1054_v61 = vld [vmem:[%s1402_s17 + $0xa4] sm:$0xf]  ;;  %v1037_v1 = vld [vmem:[%s1402_s17 + $0x14] sm:$0xf0] }
  0xa2   : > { %v343_v29 = vmul.f32 %v1416_v25, %v1416_v25  ;;  %v344_v30 = vmul.f32 %v1418_v26, %v1418_v26  ;;  %669 = vmatpush.bf16.msra.mxu1 %v1015_v2  ;;  %688 = vmatpush.bf16.msra.mxu2 %v955_v3  ;;  %v987_v63 = vor.u32 %v1054_v61, %v984_v62  ;;  %v974_v2 = vld [vmem:[%s1402_s17 + $0x90] sm:$0xf]  ;;  %v419_v61 = vld [vmem:[%s1573_s1] sm:$0x3] }
  0xa3   : > { %v357_v31 = vadd.f32 %v348_v28, %v347_v27  ;;  %v935_v27 = vor.u32 %v1043_v21, %v934_v20  ;;  %v1059_v28 = vld [vmem:[%s1402_s17 + $0xc4] sm:$0xf0]  ;;  %v911_v3 = vor.u32 %v1037_v1, %v910_v0  ;;  %v1034_v20 = vld [vmem:[%s1402_s17 + $0x4] sm:$0xf]  ;;  %v904_v21 = vld [vmem:[%s1402_s17 + $0x8] sm:$0xf0] }
  0xa4   : > { %v323_v32 = vpop.xlane.xlu1 %322  ;;  %v351_v33 = vadd.f32 %v344_v30, %v343_v29  ;;  %v1042_v29 = vld [vmem:[%s1402_s17 + $0x44] sm:$0xf]  ;;  %v936_v30 = vld [vmem:[%s1402_s17 + $0x48] sm:$0xf0]  ;;  %v421_v1 = vperm.slane %v419_v61, 0 }
  0xa5   : > { %v334_v34 = vmul.f32 %v1408_v18, %v323_v32  ;;  %v317_v35 = vpop.xlane.xlu0 %316  ;;  %358 = vadd.xlane.f32.xlu0 %v357_v31  ;;  %v999_v31 = vor.u32 %v1059_v28, %v998_v22  ;;  %v939_v32 = vor.u32 %v1042_v29, %v936_v30  ;;  %v1050_v22 = vld [vmem:[%s1402_s17 + $0x84] sm:$0xf]  ;;  %v907_v29 = vor.u32 %v1034_v20, %v904_v21  ;;  %v968_v30 = vld [vmem:[%s1402_s17 + $0x88] sm:$0xf0] }
  0xa6   : > { %v332_v36 = vmul.f32 %v1408_v18, %v317_v35  ;;  %352 = vadd.xlane.f32.xlu2 %v351_v33  ;;  %689 = vmatpush.bf16.msra.mxu2 %v947_v15  ;;  %v1058_v33 = vld [vmem:[%s1402_s17 + $0xc4] sm:$0xf]  ;;  %v1051_v15 = vld [vmem:[%s1402_s17 + $0x84] sm:$0xf0] }
  0xa7   : > { %v1430_v37 = vsub.f32 %v310_v6, %v334_v34  ;;  %v1432_v38 = vsub.f32 %v311_v7, %v334_v34  ;;  %v1019_v6 = vor.u32 %v1062_v4, %v1016_v5  ;;  %v942_v7 = vld [vmem:[%s1402_s17 + $0x50] sm:$0xf]  ;;  %v1000_v34 = vld [vmem:[%s1402_s17 + $0xc8] sm:$0xf0]  ;;  %v1053_v4 = vld [vmem:[%s1402_s17 + $0x94] sm:$0xf0] }
  0xa8   : > { %v1434_v39 = vsub.f32 %v306_v8, %v332_v36  ;;  %v1436_v40 = vsub.f32 %v307_v9, %v332_v36  ;;  %v1045_v8 = vld [vmem:[%s1402_s17 + $0x54] sm:$0xf0]  ;;  %v1006_v9 = vld [vmem:[%s1402_s17 + $0xd0] sm:$0xf]  ;;  %v1003_v35 = vor.u32 %v1058_v33, %v1000_v34  ;;  %v1036_v5 = vld [vmem:[%s1402_s17 + $0x14] sm:$0xf] }
  0xa9   : > { %v349_v41 = vmul.f32 %v1430_v37, %v1430_v37  ;;  %v350_v42 = vmul.f32 %v1432_v38, %v1432_v38  ;;  %707 = vmatpush.bf16.msra.mxu3 %v1019_v6  ;;  %v943_v10 = vor.u32 %v1045_v8, %v942_v7  ;;  %v1007_v14 = vor.u32 %v1061_v11, %v1006_v9  ;;  %v926_v36 = vld [vmem:[%s1402_s17 + $0x30] sm:$0xf]  ;;  %v912_v6 = vld [vmem:[%s1402_s17 + $0x18] sm:$0xf0]  ;;  %v1052_v9 = vld [vmem:[%s1402_s17 + $0x94] sm:$0xf] }
  0xaa   : > { %v345_v43 = vmul.f32 %v1434_v39, %v1434_v39  ;;  %v346_v44 = vmul.f32 %v1436_v40, %v1436_v40  ;;  %690 = vmatpush.bf16.msra.mxu2 %v939_v32  ;;  %v975_v7 = vor.u32 %v1053_v4, %v974_v2  ;;  %v915_v8 = vor.u32 %v1036_v5, %v912_v6  ;;  %v902_v11 = vld [vmem:[%s1402_s17] sm:$0xf] }
  0xab   : > { %v360_v45 = vadd.f32 %v350_v42, %v349_v41  ;;  %651 = vmatpush.bf16.msra.mxu0 %v943_v10  ;;  %670 = vmatpush.bf16.msra.mxu1 %v1007_v14  ;;  %v1041_v41 = vld [vmem:[%s1402_s17 + $0x34] sm:$0xf0]  ;;  %v990_v42 = vld [vmem:[%s1402_s17 + $0xb0] sm:$0xf]  ;;  %v976_v10 = vld [vmem:[%s1402_s17 + $0x98] sm:$0xf0] }
  0xac   : > { %v354_v46 = vadd.f32 %v346_v44, %v345_v43  ;;  %v927_v43 = vor.u32 %v1041_v41, %v926_v36  ;;  %v1057_v44 = vld [vmem:[%s1402_s17 + $0xb4] sm:$0xf0]  ;;  %v979_v12 = vor.u32 %v1052_v9, %v976_v10  ;;  %v966_v14 = vld [vmem:[%s1402_s17 + $0x80] sm:$0xf]  ;;  %v422_v4 = vperm.slane %v419_v61, 1 }
  0xad   : > { %361 = vadd.xlane.f32.xlu1 %v360_v45  ;;  %708 = vmatpush.bf16.msra.mxu3 %v1011_v19  ;;  %v1040_v45 = vld [vmem:[%s1402_s17 + $0x34] sm:$0xf]  ;;  %v991_v47 = vor.u32 %v1057_v44, %v990_v42  ;;  %v903_v19 = vor.u32 %v1035_v13, %v902_v11  ;;  %v967_v28 = vor.u32 %v1051_v15, %v966_v14  ;;  %v433_v2 = vld [vmem:[%s1574_s2] sm:$0x3] }
  0xae   : > { %355 = vadd.xlane.f32.xlu2 %v354_v46  ;;  %v928_v46 = vld [vmem:[%s1402_s17 + $0x38] sm:$0xf0]  ;;  %v435_v9 = vperm.slane %v433_v2, 0  ;;  %v436_v10 = vperm.slane %v433_v2, 1 }
  0xaf   : > { %652 = vmatpush.bf16.msra.mxu0 %v935_v27  ;;  %671 = vmatpush.bf16.msra.mxu1 %v999_v31  ;;  %v931_v48 = vor.u32 %v1040_v45, %v928_v46  ;;  %v971_v31 = vor.u32 %v1050_v22, %v968_v30 }
  0xb1   : > { %709 = vmatpush.bf16.msra.mxu3 %v1003_v35  ;;  %691 = vmatpush.bf16.msra.mxu2 %v931_v48 }
  0xb3   : > { %653 = vmatpush.bf16.msra.mxu0 %v927_v43  ;;  %672 = vmatpush.bf16.msra.mxu1 %v991_v47 }
  0xb5   : > { %710 = vmatpush.bf16.msra.mxu3 %v995_v51  ;;  %692 = vmatpush.bf16.msra.mxu2 %v923_v60 }
  0xb7   : > { %654 = vmatpush.bf16.msra.mxu0 %v919_v55  ;;  %673 = vmatpush.bf16.msra.mxu1 %v983_v59 }
  0xb9   : > { %711 = vmatpush.bf16.msra.mxu3 %v987_v63  ;;  %693 = vmatpush.bf16.msra.mxu2 %v915_v8 }
  0xbb   : > { %655 = vmatpush.bf16.msra.mxu0 %v911_v3  ;;  %674 = vmatpush.bf16.msra.mxu1 %v975_v7 }
  0xbd   : > { %712 = vmatpush.bf16.msra.mxu3 %v979_v12  ;;  %694 = vmatpush.bf16.msra.mxu2 %v907_v29 }
  0xbf   : > { %656 = vmatpush.bf16.msra.mxu0 %v903_v19  ;;  %675 = vmatpush.bf16.msra.mxu1 %v967_v28 }
  0xc1   : > { %713 = vmatpush.bf16.msra.mxu3 %v971_v31 }
 0x118   : > { %v359_v17 = vpop.xlane.xlu0 %358 }
 0x119   : > { %v353_v16 = vpop.xlane.xlu2 %352  ;;  %v365_v33 = vmul.f32 %v359_v17, %v1408_v18 }
 0x11a   : > { %v363_v27 = vmul.f32 %v353_v16, %v1408_v18 }
 0x11b   : > { %v1512_v34 = vadd.f32 1e-05, %v365_v33 }
 0x11c   : > { %v367_v32 = vadd.f32 1e-05, %v363_v27 }
 0x11d   : > { %vm397_vm9 = vweird.f32 %v1512_v34 }
 0x11e   : > { %1141 = vrsqrt.f32 %v367_v32  ;;  %vm377_vm2 = vweird.f32 %v367_v32 }
 0x11f   : > { %1143 = vrsqrt.f32 %v1512_v34 }
 0x120   : > { %v362_v35 = vpop.xlane.xlu1 %361 }
 0x121   : > { %v366_v36 = vmul.f32 %v362_v35, %v1408_v18  ;;  %v356_v41 = vpop.xlane.xlu2 %355 }
 0x122   : > { %v364_v42 = vmul.f32 %v356_v41, %v1408_v18 }
 0x123   : > { %v370_v43 = vadd.f32 1e-05, %v366_v36 }
 0x124   : > { %v1142_v44 = vpop.eup %1141  ;;  %v368_v45 = vadd.f32 1e-05, %v364_v42 }
 0x125   : > { %v372_v46 = vmul.f32 %v1142_v44, %v367_v32  ;;  %1145 = vrsqrt.f32 %v370_v43  ;;  %v1144_v49 = vpop.eup %1143  ;;  %vm378_vm1 = vweird.f32 %v1142_v44  ;;  %vm407_vm7 = vweird.f32 %v370_v43 }
 0x126   : > { %1147 = vrsqrt.f32 %v368_v45  ;;  %v392_v55 = vmul.f32 %v1144_v49, %v1512_v34  ;;  %vm379_vm3 = vmor %vm377_vm2, %vm378_vm1  ;;  %vm387_vm5 = vweird.f32 %v368_v45  ;;  %vm398_vm10 = vweird.f32 %v1144_v49 }
 0x127   : > { %v373_v47 = vmul.f32 %v1142_v44, %v372_v46  ;;  %vm399_vm12 = vmor %vm397_vm9, %vm398_vm10 }
 0x128   : > { %v393_v58 = vmul.f32 %v1144_v49, %v392_v55 }
 0x129   : > { %v374_v48 = vmul.f32 0.5, %v373_v47 }
 0x12a   : > { %v394_v5 = vmul.f32 0.5, %v393_v58 }
 0x12b   : > { %v1146_v50 = vpop.eup %1145  ;;  %v375_v51 = vsub.f32 1.5, %v374_v48 }
 0x12c   : > { %v1148_v52 = vpop.eup %1147  ;;  %v402_v53 = vmul.f32 %v1146_v50, %v370_v43  ;;  %v395_v14 = vsub.f32 1.5, %v394_v5  ;;  %vm408_vm8 = vweird.f32 %v1146_v50 }
 0x12d   : > { %v376_v54 = vmul.f32 %v1142_v44, %v375_v51  ;;  %v382_v18 = vmul.f32 %v1148_v52, %v368_v45  ;;  %vm388_vm4 = vweird.f32 %v1148_v52  ;;  %vm409_vm11 = vmor %vm407_vm7, %vm408_vm8 }
 0x12e   : > { %v403_v56 = vmul.f32 %v1146_v50, %v402_v53  ;;  %vm389_vm6 = vmor %vm387_vm5, %vm388_vm4  ;;  %v396_v22 = vmul.f32 %v1144_v49, %v395_v14 }
 0x12f   : > { %v383_v57 = vmul.f32 %v1148_v52, %v382_v18  ;;  %v380_v60 = vsel %vm379_vm3, %v1142_v44, %v376_v54 }
 0x130   : > { %v404_v62 = vmul.f32 0.5, %v403_v56  ;;  %v411_v0 = vmul.f32 %v380_v60, %v1416_v25  ;;  %v412_v3 = vmul.f32 %v380_v60, %v1418_v26  ;;  %v400_v28 = vsel %vm399_vm12, %v1144_v49, %v396_v22 }
 0x131   : > { %v384_v59 = vmul.f32 0.5, %v383_v57  ;;  %v415_v31 = vmul.f32 %v400_v28, %v1412_v23  ;;  %v416_v32 = vmul.f32 %v400_v28, %v1414_v24  ;;  %v483_v23 = vld [vmem:[%s300_s6] sm:$0x3] }
 0x132   : > { %v405_v7 = vsub.f32 1.5, %v404_v62  ;;  %v425_v12 = vmul.f32 %v421_v1, %v411_v0  ;;  %v426_v13 = vmul.f32 %v422_v4, %v412_v3  ;;  %v486_v47 = vperm.slane %v483_v23, 1 }
 0x133   : > { %v385_v63 = vsub.f32 1.5, %v384_v59  ;;  %v429_v35 = vmul.f32 %v421_v1, %v415_v31  ;;  %v430_v36 = vmul.f32 %v422_v4, %v416_v32 }
 0x134   : > { %v406_v16 = vmul.f32 %v1146_v50, %v405_v7  ;;  %v439_v17 = vadd.f32 %v435_v9, %v425_v12  ;;  %v440_v20 = vadd.f32 %v436_v10, %v426_v13 }
 0x135   : > { %v386_v6 = vmul.f32 %v1148_v52, %v385_v63  ;;  %v443_v43 = vadd.f32 %v435_v9, %v429_v35  ;;  %v444_v44 = vadd.f32 %v436_v10, %v430_v36 }
 0x137   : > { %v390_v8 = vsel %vm389_vm6, %v1148_v52, %v386_v6 }
 0x138   : > { %v413_v11 = vmul.f32 %v390_v8, %v1434_v39  ;;  %v414_v25 = vmul.f32 %v390_v8, %v1436_v40  ;;  %v410_v40 = vsel %vm409_vm11, %v1146_v50, %v406_v16 }
 0x139   : > { %v417_v29 = vmul.f32 %v410_v40, %v1430_v37  ;;  %v418_v30 = vmul.f32 %v410_v40, %v1432_v38  ;;  %v485_v37 = vperm.slane %v483_v23, 0 }
 0x13a   : > { %v427_v15 = vmul.f32 %v421_v1, %v413_v11  ;;  %v428_v26 = vmul.f32 %v422_v4, %v414_v25 }
 0x13b   : > { %v431_v33 = vmul.f32 %v421_v1, %v417_v29  ;;  %v432_v34 = vmul.f32 %v422_v4, %v418_v30 }
 0x13c   : > { %v441_v19 = vadd.f32 %v435_v9, %v427_v15  ;;  %v442_v21 = vadd.f32 %v436_v10, %v428_v26 }
 0x13d   : > { %v445_v41 = vadd.f32 %v435_v9, %v431_v33  ;;  %v446_v42 = vadd.f32 %v436_v10, %v432_v34 }
 0x13e   : > { %v447_v39 = vpack.c.bf16 %v441_v19, %v439_v17  ;;  %v448_v27 = vpack.c.bf16 %v442_v21, %v440_v20 }
 0x13f   : > { %v449_v45 = vpack.c.bf16 %v445_v41, %v443_v43  ;;  %v450_v46 = vpack.c.bf16 %v446_v42, %v444_v44 }
 0x140   : > { %657 = vmatmul.bf16.vlgmr.msra.gmra.mxu0 %v447_v39  ;;  %676 = vmatmul.bf16.vlgmr.msra.gmra.mxu1 %v448_v27 }
 0x141   : > { %695 = vmatmul.bf16.vlgmr.msra.gmra.mxu2 %v447_v39  ;;  %714 = vmatmul.bf16.vlgmr.msra.gmra.mxu3 %v448_v27 }
 0x150   : > { %662 = vmatmul.bf16.gmra.mxu0 %v449_v45  ;;  %681 = vmatmul.bf16.gmra.mxu1 %v450_v46 }
 0x151   : > { %700 = vmatmul.bf16.gmra.mxu2 %v449_v45  ;;  %719 = vmatmul.bf16.gmra.mxu3 %v450_v46 }
 0x1bd   : > { %v658_v24 = vpop.f32.mrf.mxu0  ;;  %v677_v38 = vpop.f32.mrf.mxu1 }
 0x1be   : > { %v659_v48 = vadd.f32 %v658_v24, %v485_v37 }
 0x1c0   : > { %v678_v53 = vadd.f32 %v677_v38, %v659_v48 }
 0x1c4   : > { %v696_v49 = vpop.f32.mrf.mxu2  ;;  %v715_v50 = vpop.f32.mrf.mxu3 }
 0x1c5   : > { %v697_v51 = vadd.f32 %v696_v49, %v486_v47  ;;  %v660_v52 = vpop.f32.mrf.mxu0  ;;  %v679_v18 = vpop.f32.mrf.mxu1 }
 0x1c6   : > { %v661_v56 = vadd.f32 %v660_v52, %v485_v37 }
 0x1c7   : > { %v716_v54 = vadd.f32 %v715_v50, %v697_v51 }
 0x1c8   : > { %v680_v61 = vadd.f32 %v679_v18, %v661_v56 }
 0x1c9   : > { %v725_v55 = vpack.c.bf16 %v716_v54, %v678_v53 }
 0x1cb   : > { %729 = vst [vmem:[%s1538_s8] sm:$0xff] %v725_v55 }
 0x1cc   : > { %v698_v57 = vpop.f32.mrf.mxu2  ;;  %v717_v58 = vpop.f32.mrf.mxu3 }
 0x1cd   : > { %v699_v59 = vadd.f32 %v698_v57, %v486_v47  ;;  %v663_v60 = vpop.f32.mrf.mxu0  ;;  %v682_v1 = vpop.f32.mrf.mxu1 }
 0x1ce   : > { %v664_v0 = vadd.f32 %v663_v60, %v485_v37 }
 0x1cf   : > { %v718_v62 = vadd.f32 %v717_v58, %v699_v59 }
 0x1d0   : > { %v683_v5 = vadd.f32 %v682_v1, %v664_v0 }
 0x1d1   : > { %v726_v63 = vpack.c.bf16 %v718_v62, %v680_v61 }
 0x1d2   : > { %v780_v26 = vld [vmem:[%s1538_s8] sm:$0xff] (%p1373_p0) }
 0x1d3   : > { %730 = vst [vmem:[%s1538_s8 + $0x8] sm:$0xff] %v726_v63 }
 0x1d4   : > { %v701_v2 = vpop.f32.mrf.mxu2  ;;  %v720_v3 = vpop.f32.mrf.mxu3  ;;  %781 = vst [vmem:[%s745_s15] sm:$0xff] (%p1373_p0), %v780_v26 }
 0x1d5   : > { %v702_v4 = vadd.f32 %v701_v2, %v486_v47  ;;  %v665_v7 = vpop.f32.mrf.mxu0  ;;  %v684_v12 = vpop.f32.mrf.mxu1 }
 0x1d6   : > { %v666_v9 = vadd.f32 %v665_v7, %v485_v37 }
 0x1d7   : > { %v721_v6 = vadd.f32 %v720_v3, %v702_v4 }
 0x1d8   : > { %v685_v13 = vadd.f32 %v684_v12, %v666_v9 }
 0x1d9   : > { %v727_v8 = vpack.c.bf16 %v721_v6, %v683_v5 }
 0x1da   : > { %v782_v16 = vld [vmem:[%s1538_s8 + $0x8] sm:$0xff] (%p1373_p0) }
 0x1db   : > { %731 = vst [vmem:[%s1538_s8 + $0x10] sm:$0xff] %v727_v8 }
 0x1dc   : > { %v703_v10 = vpop.f32.mrf.mxu2  ;;  %v722_v25 = vpop.f32.mrf.mxu3  ;;  %783 = vst [vmem:[%s745_s15 + $0x18] sm:$0xff] (%p1373_p0), %v782_v16 }
 0x1dd   : > { %v704_v11 = vadd.f32 %v703_v10, %v486_v47 }
 0x1df   : > { %v723_v14 = vadd.f32 %v722_v25, %v704_v11  ;;  %739 = sbr.rel (!%p1373_p0) target bundleno = 492 (0x1ec), region = 52 }
 0x1e1   : > { %v728_v15 = vpack.c.bf16 %v723_v14, %v685_v13 }
 0x1e2   : > { %v784_v17 = vld [vmem:[%s1538_s8 + $0x10] sm:$0xff] (%p1373_p0) }
 0x1e3   : > { %732 = vst [vmem:[%s1538_s8 + $0x18] sm:$0xff] %v728_v15 }
 0x1e4   : > { %785 = vst [vmem:[%s745_s15 + $0x30] sm:$0xff] %v784_v17 }
 0x1ea   : > { %v786_v19 = vld [vmem:[%s1538_s8 + $0x18] sm:$0xff] }
 0x1eb   : > { %787 = vst [vmem:[%s745_s15 + $0x48] sm:$0xff] %v786_v19 }
 0x1ec PF: > { %s19_s23 = sadd.s32 1, %s1263_s23   ;;  %s1586_s18 = smov %s1247_s19 }
 0x1ed   : > { %p16_p4 = scmp.ge.s32.totalorder %s19_s23, 5   ;;  %s1587_s19 = smov %s1251_s20 }
 0x1ee   : > { %s1588_s20 = smov %s1382_s24  ;;  %s1589_s21 = smov %s1259_s22 }
 0x1ef   : > { %s1590_s22 = smov %s1592_s11  ;;  %18 = sbr.rel (!%p16_p4) target bundleno = 7 (0x7), region = 127 }
 0x1f4   :  { %803 = vsyncpa [#allocation3], 1 }
 0x1f5   :  { %805 = vsyncpa [#allocation3 + $0x1], 1 }
 0x1f6   :  { %806 = vsyncpa [#allocation5], 1 }
 0x1f7   :  { %808 = vsyncpa [#allocation5 + $0x1], 1 }

// kernel: residual_attention_block.6
= control target key start
LH: loop header
LB: loop body
LE: loop exit
PB: predicated region body
PF: predicated region fallthrough
CT: control target
= control target key end

     0   :  { %s1233_s0 = inlined_call_operand.vmem [shape: bf16[2,16,768], index: 0, kind: input, shape index: {}, may-alias: {0,1,2}]   ;;  %s1234_s1 = inlined_call_operand.vmem [shape: bf16[2,16,768], index: 1, kind: input, shape index: {}, may-alias: {0,1,2}]   ;;  %s1235_s2 = inlined_call_operand.vmem [shape: bf16[2,16,768], index: 2, kind: input, shape index: {}, may-alias: {0,1,2}]   ;;  %s1236_s3 = inlined_call_operand.vmem [shape: bf16[2,16,256], index: 3, kind: output, shape index: {}]  }
   0x1   :  { %1239 = sst [smem:[#allocation12_spill]] %s1236_s3 }
   0x2   :  { %s1026_s12 = smov 0   ;;  %s1028_s13 = smov 0  }
   0x3   :  { %s1030_s14 = smov 0   ;;  %s1032_s15 = smov 0  }
   0x4   :  { %s1034_s16 = smov 0   ;;  %s1036_s17 = smov 0  }
   0x5   :  { %s1038_s18 = smov 0   ;;  %s1040_s19 = smov 0  }
   0x6   :  { %s1042_s20 = smov 0   ;;  %s1044_s21 = smov 0  }
   0x7   :  { %s1046_s22 = smov 0  }
   0x8 LB: > { %s35_s24 = sadd.s32 1, %s993_s20  ;;  %s39_s25 = sadd.s32 1, %s997_s21  ;;  %s1001_s22 = sphi %s1046_s22, %s13_s22   ;;  %s997_s21 = sphi %s1044_s21, %s1261_s21   ;;  %s993_s20 = sphi %s1042_s20, %s1260_s20   ;;  %s989_s19 = sphi %s1040_s19, %s1259_s19   ;;  %s985_s18 = sphi %s1038_s18, %s1258_s18   ;;  %s981_s17 = sphi %s1036_s17, %s1257_s17   ;;  %s977_s16 = sphi %s1034_s16, %s1256_s16   ;;  %s973_s15 = sphi %s1032_s15, %s1255_s15   ;;  %s969_s14 = sphi %s1030_s14, %s1254_s14   ;;  %s965_s13 = sphi %s1028_s13, %s1253_s13   ;;  %s961_s12 = sphi %s1026_s12, %s1252_s12  }
   0x9   : > { %p37_p0 = scmp.ge.s32.totalorder %s35_s24, 2  ;;  %s50_s26 = sadd.s32 1, %s981_s17 }
   0xa   : > { %p57_p1 = scmp.ne.s32.totalorder %s981_s17, %s977_s16  ;;  %p58_p2 = scmp.eq.s32.totalorder %s1001_s22, 0 }
   0xb   : > { %s1263_s24 = smov (%p37_p0, %s35_s24), 0  ;;  %s1265_s25 = smov (!%p37_p0, %s39_s25), %s997_s21 }
   0xc   : > { %1240 = sst [smem:[#allocation9_spill]] %s1263_s24  ;;  %s46_s27 = ssub.s32 %s993_s20, %s1263_s24 }
   0xd   : > { %p41_p3 = scmp.ge.s32.totalorder %s1265_s25, 2  ;;  %s73_s28 = sadd.s32 2, %s993_s20 }
   0xe   : > { %p1099_p4 = por %p58_p2, %p57_p1  ;;  %s74_s30 = sadd.s32 2, %s1263_s24 }
   0xf   : > { %s1267_s25 = smov (%p41_p3, %s1265_s25), 0  ;;  %s78_s4 = ssub.s32 %s73_s28, %s74_s30 }
  0x10   : > { %1242 = sst [smem:[#allocation10_spill]] %s1267_s25  ;;  %s82_s5 = sadd.s32 1, %s973_s15 }
  0x11   : > { %s43_s6 = ssub.s32 %s997_s21, %s1267_s25  ;;  %p89_p5 = scmp.ne.s32.totalorder %s973_s15, %s969_s14 }
  0x12   : > { %s47_s7 = sor.u32 %s46_s27, %s43_s6  ;;  %s79_s8 = sor.u32 %s78_s4, %s43_s6 }
  0x13   : > { %p48_p6 = scmp.eq.s32.totalorder %s47_s7, 0  ;;  %p80_p7 = scmp.eq.s32.totalorder %s79_s8, 0 }
  0x14   : > { %p1113_p8 = por %p89_p5, %p58_p2  ;;  %s105_s10 = sadd.s32 4, %s993_s20 }
  0x15   : > { %s1119_s11 = scalar_select %p48_p6, %s981_s17, %s50_s26  }
  0x16   : > { %s1122_s28 = scalar_select %p80_p7, %s973_s15, %s82_s5  }
  0x17   : > { %1244 = sst [smem:[#allocation11_spill]] %s1119_s11  ;;  %s106_s30 = sadd.s32 4, %s1263_s24 }
  0x18   : > { %s114_s23 = sadd.s32 1, %s965_s13  ;;  %s110_s25 = ssub.s32 %s105_s10, %s106_s30 }
  0x19   : > { %p121_p9 = scmp.ne.s32.totalorder %s965_s13, %s961_s12  ;;  %s111_s27 = sor.u32 %s110_s25, %s43_s6 }
  0x1a   : > { %s1245_s3 = sadd.s32 4294967295, %s1001_s22   ;;  %p112_p11 = scmp.eq.s32.totalorder %s111_s27, 0 }
  0x1b   : > { %p155_p10 = scmp.eq.s32.totalorder %s1245_s3, 3  ;;  %p1132_p12 = por %p121_p9, %p58_p2 }
  0x1c   : > { %s1144_s26 = scalar_select %p112_p11, %s965_s13, %s114_s23  }
  0x1d   : > { %p1139_p13 = por %p155_p10, %p57_p1  ;;  %p766_p0 = scmp.ge.s32.totalorder %s1001_s22, 4 }
  0x1f   : > { %177 = sbr.rel (%p766_p0) target bundleno = 63 (0x3f), region = 16 }
  0x24   : > { %180 = sbr.rel (!%p1099_p4) target bundleno = 45 (0x2d), region = 20  ;;  %s182_s3 = sand.u32 (%p1099_p4), 1, %s981_s17  }
  0x25   : > { %s808_s25 = smul.u32 (%p1099_p4), 12, %s997_s21  ;;  %s767_s5 = sshll.u32 (%p1099_p4), %s182_s3, 3 }
  0x26   : > { %s184_s23 = scalar_lea.vmem (%p1099_p4), [#allocation5], %s767_s5 }
  0x27   : > { %s189_s6 = sadd.s32 (%p1099_p4), %s993_s20, %s808_s25 }
  0x28   : > { %s768_s8 = sshll.u32 (%p1099_p4), %s189_s6, 2 }
  0x29   : > { %s191_s27 = scalar_lea.vmem %s1233_s0, %s768_s8 }
  0x2a   : > { %v208_v0 = vld [vmem:[%s191_s27] sm:$0xf]  ;;  %v210_v1 = vld [vmem:[%s191_s27 + $0x18] sm:$0xf] }
  0x2b   : > { %209 = vst [vmem:[%s184_s23] sm:$0xf] %v208_v0 }
  0x2c   : > { %211 = vst [vmem:[%s184_s23 + $0x4] sm:$0xf] %v210_v1 }
  0x2d PF: > { %239 = sbr.rel (!%p1113_p8) target bundleno = 54 (0x36), region = 61  ;;  %s241_s29 = sand.u32 (%p1113_p8), 1, %s973_s15  }
  0x2e   : > { %s659_s3 = smul.u32 (%p1113_p8), 12, %s997_s21  ;;  %s769_s25 = sshll.u32 (%p1113_p8), %s241_s29, 3 }
  0x2f   : > { %s243_s5 = scalar_lea.vmem (%p1113_p8), [#allocation6], %s769_s25 }
  0x30   : > { %s660_s6 = sadd.s32 (%p1113_p8), %s993_s20, %s659_s3 }
  0x31   : > { %s770_s24 = sshll.u32 (%p1113_p8), %s660_s6, 2 }
  0x32   : > { %s662_s8 = scalar_lea.vmem %s1234_s1, %s770_s24 }
  0x33   : > { %v771_v2 = vld [vmem:[%s662_s8 + $0x8] sm:$0xf]  ;;  %v772_v3 = vld [vmem:[%s662_s8 + $0x20] sm:$0xf] }
  0x34   : > { %269 = vst [vmem:[%s243_s5] sm:$0xf] %v771_v2 }
  0x35   : > { %271 = vst [vmem:[%s243_s5 + $0x4] sm:$0xf] %v772_v3 }
  0x36 PF: > { %299 = sbr.rel (!%p1132_p12) target bundleno = 63 (0x3f), region = 102  ;;  %s301_s9 = sand.u32 (%p1132_p12), 1, %s965_s13  }
  0x37   : > { %s668_s30 = smul.u32 (%p1132_p12), 12, %s997_s21  ;;  %s773_s27 = sshll.u32 (%p1132_p12), %s301_s9, 3 }
  0x38   : > { %s303_s25 = scalar_lea.vmem (%p1132_p12), [#allocation7], %s773_s27 }
  0x39   : > { %s669_s23 = sadd.s32 (%p1132_p12), %s993_s20, %s668_s30 }
  0x3a   : > { %s774_s29 = sshll.u32 (%p1132_p12), %s669_s23, 2 }
  0x3b   : > { %s671_s24 = scalar_lea.vmem %s1235_s2, %s774_s29 }
  0x3c   : > { %v775_v4 = vld [vmem:[%s671_s24 + $0x10] sm:$0xf]  ;;  %v776_v5 = vld [vmem:[%s671_s24 + $0x28] sm:$0xf] }
  0x3d   : > { %329 = vst [vmem:[%s303_s25] sm:$0xf] %v775_v4 }
  0x3e   : > { %331 = vst [vmem:[%s303_s25 + $0x4] sm:$0xf] %v776_v5 }
  0x3f PF: > { %p777_p1 = scmp.ge.s32.totalorder %s1001_s22, 1  ;;  %p358_p2 = scmp.lt.s32.totalorder %s1001_s22, 5 }
  0x41   : > { %p359_p3 = pnand %p777_p1, %p358_p2 }
  0x42   : > { %s372_s4 = sand.u32 (!%p359_p3), 1, %s969_s14   ;;  %s365_s6 = sand.u32 (!%p359_p3), 1, %s977_s16  }
  0x43   : > { %362 = sbr.rel (%p359_p3) target bundleno = 722 (0x2d2), region = 143  ;;  %s779_s10 = sshll.u32 (!%p359_p3), %s372_s4, 3 }
  0x44   : > { %s1175_s8 = sshll.u32 (!%p359_p3), %s365_s6, 3  ;;  %s374_s5 = scalar_lea.vmem (!%p359_p3), [#allocation6], %s779_s10 }
  0x45   : > { %s367_s9 = scalar_lea.vmem (!%p359_p3), [#allocation5], %s1175_s8  ;;  %s379_s14 = sand.u32 (!%p359_p3), 1, %s961_s12  }
  0x46   : > { %s780_s16 = sshll.u32 (!%p359_p3), %s379_s14, 3  ;;  %s408_s12 = scalar_lea.vmem (!%p359_p3), [#allocation8], %s1175_s8 }
  0x47   : > { %s381_s30 = scalar_lea.vmem (!%p359_p3), [#allocation7], %s780_s16 }
  0x48   : > { %v801_v6 = vld [vmem:[%s374_s5] sm:$0xff]  ;;  %v800_v7 = vld [vmem:[%s367_s9] sm:$0xff]  ;;  %vm420_vm0 = vcmask 7168   ;;  %v1003_v8 = vmov -inf   ;;  %vm461_vm1 = vcmask 130048   ;;  %v1004_v13 = vmov 0  }
  0x49   : > { %452 = vmatpush.bf16.xpose.msra.mxu0 %v801_v6  ;;  %421 = vst.msk [vmem:[#allocation2] sm:$0xff] %vm420_vm0, %v1003_v8  ;;  %900 = vset.pattern.permute.xlu1 %v1004_v13  ;;  %v1005_v14 = vmov 0.0   ;;  %v802_v27 = vld [vmem:[%s381_s30] sm:$0xff]  ;;  %s796_s27 = sshll.u32 (%p1139_p13), %s989_s19, 2  ;;  %s1248_s24 = sld [smem:[#allocation12_spill]] (%p1139_p13) }
  0x4a   : > { %422 = vst.msk [vmem:[#allocation2 + $0x8] sm:$0xff] %vm420_vm0, %v1003_v8  ;;  %901 = vset.pattern.permute.xlu0 %v1004_v13  ;;  %902 = vset.pattern.permute.xlu2 %v1004_v13  ;;  %s587_s23 = sadd.s32 (%p1139_p13), %s985_s18, %s796_s27 }
  0x4b   : > { %423 = vst.msk [vmem:[#allocation3] sm:$0xff] %vm420_vm0, %v1005_v14  ;;  %538 = vmatpush.bf16.msra.mxu1 %v802_v27  ;;  %s797_s29 = sshll.u32 (%p1139_p13), %s587_s23, 2 }
  0x4c   : > { %424 = vst.msk [vmem:[#allocation3 + $0x8] sm:$0xff] %vm420_vm0, %v1005_v14 }
  0x4f   : > { %s589_s25 = scalar_lea.vmem (%p1139_p13), %s1248_s24, %s797_s29 }
  0x50   : > { %453 = vmatmul.bf16.vlgmr.msra.gmra.mxu0 %v800_v7  ;;  %v459_v15 = vld [vmem:[#allocation2] sm:$0xff] }
  0x51   : > { %v460_v20 = vld [vmem:[#allocation2 + $0x8] sm:$0xff] }
  0x52   : > { %v492_v39 = vld [vmem:[#allocation3] sm:$0xff] }
  0x53   : > { %v493_v43 = vld [vmem:[#allocation3 + $0x8] sm:$0xff] }
  0xcd   : > { %v454_v9 = vpop.f32.mrf.mxu0 }
  0xce   : > { %v462_v10 = vsel %vm461_vm1, %v454_v9, -inf }
  0xcf   : > { %463 = vmax.xlane.f32.xlu0 %v462_v10 }
  0xd5   : > { %v456_v11 = vpop.f32.mrf.mxu0 }
  0xd6   : > { %v465_v12 = vsel %vm461_vm1, %v456_v11, -inf }
  0xd7   : > { %466 = vmax.xlane.f32.xlu0 %v465_v12 }
 0x142   : > { %v464_v16 = vpop.xlane.xlu0 %463 }
 0x143   : > { %v468_v17 = vmax.f32 %v459_v15, %v464_v16 }
 0x145   : > { %v470_v18 = vsub.f32 %v459_v15, %v468_v17  ;;  %549 = vst.msk [vmem:[#allocation2] sm:$0xff] %vm420_vm0, %v468_v17  ;;  %478 = vperm.xlu1 %900, %v468_v17  }
 0x147   : > { %v472_v19 = vmul.f32 1.442695, %v470_v18 }
 0x149   : > { %903 = vpow2.f32 %v472_v19 }
 0x14a   : > { %v467_v21 = vpop.xlane.xlu0 %466 }
 0x14b   : > { %v469_v22 = vmax.f32 %v460_v20, %v467_v21 }
 0x14d   : > { %v471_v23 = vsub.f32 %v460_v20, %v469_v22  ;;  %550 = vst.msk [vmem:[#allocation2 + $0x8] sm:$0xff] %vm420_vm0, %v469_v22  ;;  %483 = vperm.xlu1 %900, %v469_v22  }
 0x14f   : > { %v904_v24 = vpop.eup %903  ;;  %v474_v25 = vmul.f32 1.442695, %v471_v23 }
 0x150   : > { %511 = vperm.xlu0 %901, %v904_v24   ;;  %v494_v40 = vmul.f32 %v904_v24, %v492_v39 }
 0x151   : > { %905 = vpow2.f32 %v474_v25 }
 0x157   : > { %v906_v26 = vpop.eup %905 }
 0x158   : > { %516 = vperm.xlu1 %900, %v906_v26   ;;  %v495_v44 = vmul.f32 %v906_v26, %v493_v43 }
 0x1b7   : > { %v479_v28 = vpop.permute.xlu1 %478 }
 0x1b8   : > { %v486_v29 = vsub.f32 %v454_v9, %v479_v28 }
 0x1ba   : > { %v488_v30 = vmul.f32 1.442695, %v486_v29 }
 0x1bc   : > { %907 = vpow2.f32 %v488_v30 }
 0x1bf   : > { %v484_v31 = vpop.permute.xlu1 %483 }
 0x1c0   : > { %v487_v32 = vsub.f32 %v456_v11, %v484_v31 }
 0x1c2   : > { %v908_v33 = vpop.eup %907  ;;  %v490_v34 = vmul.f32 1.442695, %v487_v32  ;;  %v512_v53 = vpop.permute.xlu0 %511 }
 0x1c3   : > { %v496_v35 = vsel %vm461_vm1, %v908_v33, 0.0  ;;  %v519_v55 = vmul.f32 0.0, %v512_v53 }
 0x1c4   : > { %909 = vpow2.f32 %v490_v34  ;;  %497 = vadd.xlane.f32.xlu2 %v496_v35 }
 0x1ca   : > { %v910_v36 = vpop.eup %909  ;;  %v517_v52 = vpop.permute.xlu1 %516 }
 0x1cb   : > { %v499_v37 = vsel %vm461_vm1, %v910_v36, 0.0  ;;  %v521_v38 = vpack.c.bf16 %v910_v36, %v908_v33  ;;  %v520_v56 = vmul.f32 0.0, %v517_v52 }
 0x1cc   : > { %500 = vadd.xlane.f32.xlu2 %v499_v37 }
 0x1cd   : > { %794 = vmatmul.msk.bf16.vlgmr.msra.gmra.mxu1 %vm461_vm1, %v521_v38 }
 0x237   : > { %v498_v41 = vpop.xlane.xlu2 %497 }
 0x238   : > { %v502_v42 = vadd.f32 %v498_v41, %v494_v40 }
 0x23a   : > { %505 = vst.msk [vmem:[#allocation3] sm:$0xff] %vm420_vm0, %v502_v42 }
 0x23f   : > { %v501_v45 = vpop.xlane.xlu2 %500 }
 0x240   : > { %v503_v46 = vadd.f32 %v501_v45, %v495_v44 }
 0x241   : > { %v556_v47 = vld [vmem:[#allocation3] sm:$0xff] }
 0x242   : > { %506 = vst.msk [vmem:[#allocation3 + $0x8] sm:$0xff] %vm420_vm0, %v503_v46  ;;  %911 = vrcp.f32 %v556_v47 }
 0x248   : > { %v912_v48 = vpop.eup %911 }
 0x249   : > { %562 = vperm.xlu2 %902, %v912_v48   ;;  %v557_v49 = vld [vmem:[#allocation3 + $0x8] sm:$0xff] }
 0x24a   : > { %913 = vrcp.f32 %v557_v49  ;;  %v540_v51 = vpop.f32.mrf.mxu1 }
 0x24b   : > { %v545_v58 = vadd.f32 %v540_v51, %v519_v55 }
 0x250   : > { %v914_v50 = vpop.eup %913 }
 0x251   : > { %567 = vperm.xlu1 %900, %v914_v50  }
 0x252   : > { %v542_v54 = vpop.f32.mrf.mxu1 }
 0x253   : > { %v546_v59 = vadd.f32 %v542_v54, %v520_v56 }
 0x2a3   : > { %v563_v57 = vpop.permute.xlu2 %562 }
 0x2a4   : > { %v570_v61 = vmul.f32 %v563_v57, %v545_v58 }
 0x2c3   : > { %v568_v60 = vpop.permute.xlu1 %567 }
 0x2c4   : > { %v571_v62 = vmul.f32 %v568_v60, %v546_v59  ;;  %582 = sbr.rel (!%p1139_p13) target bundleno = 722 (0x2d2), region = 167 }
 0x2c6   : > { %v806_v63 = vpack.c.bf16 %v571_v62, %v570_v61 }
 0x2c8   : > { %807 = vst [vmem:[%s408_s12] sm:$0xff] %v806_v63  }
 0x2cf   : > { %v606_v0 = vld [vmem:[%s408_s12] sm:$0xf]  ;;  %v608_v1 = vld [vmem:[%s408_s12 + $0x4] sm:$0xf] }
 0x2d0   : > { %607 = vst [vmem:[%s589_s25] sm:$0xf] %v606_v0 }
 0x2d1   : > { %609 = vst [vmem:[%s589_s25 + $0x8] sm:$0xf] %v608_v1 }
 0x2d2 PF: > { %s13_s22 = sadd.s32 1, %s1001_s22   ;;  %s1249_s18 = sld [smem:[#allocation11_spill]] }
 0x2d3   : > { %p10_p4 = scmp.ge.s32.totalorder %s13_s22, 6   ;;  %s1250_s7 = sld [smem:[#allocation9_spill]] }
 0x2d4   : > { %s1251_s4 = sld [smem:[#allocation10_spill]]  ;;  %s1252_s12 = smov %s965_s13 }
 0x2d5   : > { %s1253_s13 = smov %s1144_s26  ;;  %s1254_s14 = smov %s973_s15 }
 0x2d6   : > { %s1255_s15 = smov %s1122_s28  ;;  %s1256_s16 = smov %s981_s17 }
 0x2d7   : > { %s1259_s19 = smov %s997_s21  ;;  %12 = sbr.rel (!%p10_p4) target bundleno = 8 (0x8), region = 255 }
 0x2d8   : > { %s1257_s17 = smov %s1249_s18  ;;  %s1258_s18 = smov %s993_s20 }
 0x2d9   : > { %s1260_s20 = smov %s1250_s7 }
 0x2da   : > { %s1261_s21 = smov %s1251_s4 }

// kernel: residual_attention_block.7
= control target key start
LH: loop header
LB: loop body
LE: loop exit
PB: predicated region body
PF: predicated region fallthrough
CT: control target
= control target key end

     0   :  { %9 = vsyncpa [#allocation3], 0  ;;  %s703_s0 = inlined_call_operand.vmem [shape: bf16[32,256], index: 0, kind: input, shape index: {}]   ;;  %s704_s1 = inlined_call_operand.hbm [shape: bf16[256,256], index: 1, kind: input, shape index: {}]   ;;  %s705_s2 = inlined_call_operand.vmem [shape: f32[1,256], index: 2, kind: input, shape index: {}]   ;;  %s706_s3 = inlined_call_operand.hbm [shape: f32[32,256], index: 3, kind: input, shape index: {}]   ;;  %s707_s4 = inlined_call_operand.vmem [shape: f32[32,256], index: 4, kind: output, shape index: {}]  }
   0x1   :  { %s17_s17 = sshll.u32 %s704_s1, 4  ;;  %s18_s17 = int_to_ptr.hbm [resolvable:$true] %s17_s17 }
   0x2   :  { %10 = vsyncpa [#allocation5], 0  ;;  %s615_s18 = smov [#allocation2]   ;;  %s32_s22 = sshll.u32 %s706_s3, 4  ;;  %s33_s22 = int_to_ptr.hbm [resolvable:$true] %s32_s22 }
   0x3   :  { %s19_s19 = sshll.u32 %s615_s18, 4  ;;  %s616_s23 = smov 128   ;;  %s20_s19 = int_to_ptr.vmem [resolvable:$true] %s19_s19 }
   0x4   :  { %s617_s24 = smov 8   ;;  %s618_s25 = smov [#allocation4]  }
   0x5   :  { %25 = dma.hbm_to_vmem [thread:$0]  %s18_s17, 4096, %s20_s19, [#allocation3], %s616_s23, %s616_s23, %s617_s24  }
   0x6   :  { %s34_s26 = sshll.u32 %s618_s25, 4  ;;  %s619_s27 = smov 256   ;;  %s35_s26 = int_to_ptr.vmem [resolvable:$true] %s34_s26 }
   0x7   :  { %s620_s28 = smov 16  }
   0x8   :  { %40 = dma.hbm_to_vmem [thread:$0]  %s33_s22, 1024, %s35_s26, [#allocation5], %s619_s27, %s619_s27, %s620_s28  }
   0x9   :  { %611 = dma.done.wait [#allocation3], 4096  }
   0xa   :  { %612 = vsyncadd [#allocation3], 4294963200 }
   0xb   :  { %613 = dma.done.wait [#allocation5], 1024  }
   0xc   :  { %614 = vsyncadd [#allocation5], 4294966272  ;;  %v451_v0 = vld [vmem:[#allocation2 + $0x70] sm:$0xf]  ;;  %v540_v1 = vld [vmem:[#allocation2 + $0x74] sm:$0xf0] }
   0xd   :  { %v515_v2 = vld [vmem:[#allocation2 + $0xf0] sm:$0xf]  ;;  %v452_v3 = vor.u32 %v540_v1, %v451_v0  ;;  %v556_v4 = vld [vmem:[#allocation2 + $0xf4] sm:$0xf0]  ;;  %v539_v5 = vld [vmem:[#allocation2 + $0x74] sm:$0xf] }
   0xe   :  { %v453_v6 = vld [vmem:[#allocation2 + $0x78] sm:$0xf0]  ;;  %v516_v7 = vor.u32 %v556_v4, %v515_v2  ;;  %v555_v9 = vld [vmem:[#allocation2 + $0xf4] sm:$0xf]  ;;  %v443_v11 = vld [vmem:[#allocation2 + $0x60] sm:$0xf] }
   0xf   :  { %v456_v8 = vor.u32 %v539_v5, %v453_v6  ;;  %v517_v10 = vld [vmem:[#allocation2 + $0xf8] sm:$0xf0]  ;;  %271 = vmatpush.bf16.msra.mxu0 %v452_v3  ;;  %v538_v13 = vld [vmem:[#allocation2 + $0x64] sm:$0xf0]  ;;  %v507_v14 = vld [vmem:[#allocation2 + $0xe0] sm:$0xf] }
  0x10   :  { %v520_v12 = vor.u32 %v555_v9, %v517_v10  ;;  %v554_v15 = vld [vmem:[#allocation2 + $0xe4] sm:$0xf0]  ;;  %290 = vmatpush.bf16.msra.mxu1 %v516_v7  ;;  %v444_v16 = vor.u32 %v538_v13, %v443_v11  ;;  %v537_v18 = vld [vmem:[#allocation2 + $0x64] sm:$0xf]  ;;  %v445_v19 = vld [vmem:[#allocation2 + $0x68] sm:$0xf0] }
  0x11   :  { %309 = vmatpush.bf16.msra.mxu2 %v456_v8  ;;  %v508_v17 = vor.u32 %v554_v15, %v507_v14  ;;  %v553_v20 = vld [vmem:[#allocation2 + $0xe4] sm:$0xf]  ;;  %v448_v21 = vor.u32 %v537_v18, %v445_v19  ;;  %v509_v22 = vld [vmem:[#allocation2 + $0xe8] sm:$0xf0]  ;;  %v435_v23 = vld [vmem:[#allocation2 + $0x50] sm:$0xf] }
  0x12   :  { %328 = vmatpush.bf16.msra.mxu3 %v520_v12  ;;  %v536_v24 = vld [vmem:[#allocation2 + $0x54] sm:$0xf0]  ;;  %v512_v25 = vor.u32 %v553_v20, %v509_v22  ;;  %v499_v26 = vld [vmem:[#allocation2 + $0xd0] sm:$0xf]  ;;  %v535_v28 = vld [vmem:[#allocation2 + $0x54] sm:$0xf] }
  0x13   :  { %v552_v27 = vld [vmem:[#allocation2 + $0xd4] sm:$0xf0]  ;;  %272 = vmatpush.bf16.msra.mxu0 %v444_v16  ;;  %v436_v29 = vor.u32 %v536_v24, %v435_v23  ;;  %v437_v30 = vld [vmem:[#allocation2 + $0x58] sm:$0xf0]  ;;  %v551_v31 = vld [vmem:[#allocation2 + $0xd4] sm:$0xf] }
  0x14   :  { %v501_v32 = vld [vmem:[#allocation2 + $0xd8] sm:$0xf0]  ;;  %291 = vmatpush.bf16.msra.mxu1 %v508_v17  ;;  %v500_v33 = vor.u32 %v552_v27, %v499_v26  ;;  %v440_v34 = vor.u32 %v535_v28, %v437_v30  ;;  %v427_v35 = vld [vmem:[#allocation2 + $0x40] sm:$0xf]  ;;  %v534_v36 = vld [vmem:[#allocation2 + $0x44] sm:$0xf0] }
  0x15   :  { %310 = vmatpush.bf16.msra.mxu2 %v448_v21  ;;  %v491_v37 = vld [vmem:[#allocation2 + $0xc0] sm:$0xf]  ;;  %v504_v38 = vor.u32 %v551_v31, %v501_v32  ;;  %v550_v39 = vld [vmem:[#allocation2 + $0xc4] sm:$0xf0]  ;;  %v533_v40 = vld [vmem:[#allocation2 + $0x44] sm:$0xf]  ;;  %v428_v44 = vor.u32 %v534_v36, %v427_v35 }
  0x16   :  { %329 = vmatpush.bf16.msra.mxu3 %v512_v25  ;;  %v429_v41 = vld [vmem:[#allocation2 + $0x48] sm:$0xf0]  ;;  %v549_v42 = vld [vmem:[#allocation2 + $0xc4] sm:$0xf]  ;;  %v492_v45 = vor.u32 %v550_v39, %v491_v37  ;;  %v419_v47 = vld [vmem:[#allocation2 + $0x30] sm:$0xf] }
  0x17   :  { %v493_v43 = vld [vmem:[#allocation2 + $0xc8] sm:$0xf0]  ;;  %273 = vmatpush.bf16.msra.mxu0 %v436_v29  ;;  %v432_v46 = vor.u32 %v533_v40, %v429_v41  ;;  %v532_v48 = vld [vmem:[#allocation2 + $0x34] sm:$0xf0]  ;;  %v483_v49 = vld [vmem:[#allocation2 + $0xb0] sm:$0xf] }
  0x18   :  { %292 = vmatpush.bf16.msra.mxu1 %v500_v33  ;;  %v496_v50 = vor.u32 %v549_v42, %v493_v43  ;;  %v548_v51 = vld [vmem:[#allocation2 + $0xb4] sm:$0xf0]  ;;  %v531_v52 = vld [vmem:[#allocation2 + $0x34] sm:$0xf]  ;;  %v421_v53 = vld [vmem:[#allocation2 + $0x38] sm:$0xf0]  ;;  %v420_v56 = vor.u32 %v532_v48, %v419_v47 }
  0x19   :  { %311 = vmatpush.bf16.msra.mxu2 %v440_v34  ;;  %v547_v54 = vld [vmem:[#allocation2 + $0xb4] sm:$0xf]  ;;  %v485_v55 = vld [vmem:[#allocation2 + $0xb8] sm:$0xf0]  ;;  %v484_v57 = vor.u32 %v548_v51, %v483_v49  ;;  %v424_v58 = vor.u32 %v531_v52, %v421_v53  ;;  %v411_v59 = vld [vmem:[#allocation2 + $0x20] sm:$0xf] }
  0x1a   :  { %330 = vmatpush.bf16.msra.mxu3 %v504_v38  ;;  %v530_v60 = vld [vmem:[#allocation2 + $0x24] sm:$0xf0]  ;;  %v475_v61 = vld [vmem:[#allocation2 + $0xa0] sm:$0xf]  ;;  %v488_v62 = vor.u32 %v547_v54, %v485_v55  ;;  %v529_v0 = vld [vmem:[#allocation2 + $0x24] sm:$0xf] }
  0x1b   :  { %274 = vmatpush.bf16.msra.mxu0 %v428_v44  ;;  %v546_v63 = vld [vmem:[#allocation2 + $0xa4] sm:$0xf0]  ;;  %v413_v1 = vld [vmem:[#allocation2 + $0x28] sm:$0xf0]  ;;  %v545_v2 = vld [vmem:[#allocation2 + $0xa4] sm:$0xf]  ;;  %v412_v4 = vor.u32 %v530_v60, %v411_v59 }
  0x1c   :  { %293 = vmatpush.bf16.msra.mxu1 %v492_v45  ;;  %v477_v3 = vld [vmem:[#allocation2 + $0xa8] sm:$0xf0]  ;;  %v476_v5 = vor.u32 %v546_v63, %v475_v61  ;;  %v416_v6 = vor.u32 %v529_v0, %v413_v1  ;;  %v403_v7 = vld [vmem:[#allocation2 + $0x10] sm:$0xf]  ;;  %v528_v8 = vld [vmem:[#allocation2 + $0x14] sm:$0xf0] }
  0x1d   :  { %312 = vmatpush.bf16.msra.mxu2 %v432_v46  ;;  %v467_v9 = vld [vmem:[#allocation2 + $0x90] sm:$0xf]  ;;  %v480_v10 = vor.u32 %v545_v2, %v477_v3  ;;  %v544_v11 = vld [vmem:[#allocation2 + $0x94] sm:$0xf0]  ;;  %v527_v12 = vld [vmem:[#allocation2 + $0x14] sm:$0xf]  ;;  %v404_v16 = vor.u32 %v528_v8, %v403_v7 }
  0x1e   :  { %331 = vmatpush.bf16.msra.mxu3 %v496_v50  ;;  %v405_v13 = vld [vmem:[#allocation2 + $0x18] sm:$0xf0]  ;;  %v543_v14 = vld [vmem:[#allocation2 + $0x94] sm:$0xf]  ;;  %v468_v17 = vor.u32 %v544_v11, %v467_v9  ;;  %v395_v19 = vld [vmem:[#allocation2] sm:$0xf] }
  0x1f   :  { %275 = vmatpush.bf16.msra.mxu0 %v420_v56  ;;  %v469_v15 = vld [vmem:[#allocation2 + $0x98] sm:$0xf0]  ;;  %v408_v18 = vor.u32 %v527_v12, %v405_v13  ;;  %v526_v20 = vld [vmem:[#allocation2 + $0x4] sm:$0xf0]  ;;  %v459_v21 = vld [vmem:[#allocation2 + $0x80] sm:$0xf] }
  0x20   :  { %294 = vmatpush.bf16.msra.mxu1 %v484_v57  ;;  %v472_v22 = vor.u32 %v543_v14, %v469_v15  ;;  %v542_v23 = vld [vmem:[#allocation2 + $0x84] sm:$0xf0]  ;;  %v525_v24 = vld [vmem:[#allocation2 + $0x4] sm:$0xf]  ;;  %v397_v25 = vld [vmem:[#allocation2 + $0x8] sm:$0xf0]  ;;  %v396_v28 = vor.u32 %v526_v20, %v395_v19 }
  0x21   :  { %313 = vmatpush.bf16.msra.mxu2 %v424_v58  ;;  %v541_v26 = vld [vmem:[#allocation2 + $0x84] sm:$0xf]  ;;  %v461_v27 = vld [vmem:[#allocation2 + $0x88] sm:$0xf0]  ;;  %v379_v29 = vld [vmem:[%s703_s0] sm:$0xf]  ;;  %v460_v31 = vor.u32 %v542_v23, %v459_v21  ;;  %v400_v32 = vor.u32 %v525_v24, %v397_v25 }
  0x22   :  { %332 = vmatpush.bf16.msra.mxu3 %v488_v62  ;;  %v522_v30 = vld [vmem:[%s703_s0 + $0x4] sm:$0xf0]  ;;  %v521_v33 = vld [vmem:[%s703_s0 + $0x4] sm:$0xf]  ;;  %v381_v34 = vld [vmem:[%s703_s0 + $0x8] sm:$0xf0]  ;;  %v464_v35 = vor.u32 %v541_v26, %v461_v27 }
  0x23   :  { %276 = vmatpush.bf16.msra.mxu0 %v412_v4  ;;  %v380_v36 = vor.u32 %v522_v30, %v379_v29  ;;  %v384_v37 = vor.u32 %v521_v33, %v381_v34  ;;  %v387_v38 = vld [vmem:[%s703_s0 + $0x10] sm:$0xf]  ;;  %v524_v39 = vld [vmem:[%s703_s0 + $0x14] sm:$0xf0]  ;;  %v523_v40 = vld [vmem:[%s703_s0 + $0x14] sm:$0xf] }
  0x24   :  { %295 = vmatpush.bf16.msra.mxu1 %v476_v5  ;;  %v389_v41 = vld [vmem:[%s703_s0 + $0x18] sm:$0xf0]  ;;  %v388_v42 = vor.u32 %v524_v39, %v387_v38  ;;  %v85_v44 = vld [vmem:[%s705_s2] sm:$0x3]  ;;  %v348_v57 = vld [vmem:[#allocation4 + $0x8] sm:$0xff] }
  0x25   :  { %314 = vmatpush.bf16.msra.mxu2 %v416_v6  ;;  %v392_v43 = vor.u32 %v523_v40, %v389_v41  ;;  %v87_v45 = vperm.slane %v85_v44, 0  ;;  %v347_v49 = vld [vmem:[#allocation4] sm:$0xff]  ;;  %v88_v51 = vperm.slane %v85_v44, 1  ;;  %v349_v61 = vld [vmem:[#allocation4 + $0x10] sm:$0xff]  ;;  %v350_v5 = vld [vmem:[#allocation4 + $0x18] sm:$0xff] }
  0x26   :  { %333 = vmatpush.bf16.msra.mxu3 %v480_v10  ;;  %v351_v9 = vld [vmem:[#allocation4 + $0x20] sm:$0xff]  ;;  %v353_v21 = vld [vmem:[#allocation4 + $0x30] sm:$0xff] }
  0x27   :  { %277 = vmatpush.bf16.msra.mxu0 %v404_v16 }
  0x28   :  { %296 = vmatpush.bf16.msra.mxu1 %v468_v17  ;;  %v352_v17 = vld [vmem:[#allocation4 + $0x28] sm:$0xff] }
  0x29   :  { %315 = vmatpush.bf16.msra.mxu2 %v408_v18 }
  0x2a   :  { %334 = vmatpush.bf16.msra.mxu3 %v472_v22 }
  0x2b   :  { %278 = vmatpush.bf16.msra.mxu0 %v396_v28  ;;  %v354_v28 = vld [vmem:[#allocation4 + $0x38] sm:$0xff] }
  0x2c   :  { %297 = vmatpush.bf16.msra.mxu1 %v460_v31 }
  0x2d   :  { %316 = vmatpush.bf16.msra.mxu2 %v400_v32 }
  0x2e   :  { %335 = vmatpush.bf16.msra.mxu3 %v464_v35  ;;  %279 = vmatmul.bf16.vlgmr.msra.gmra.mxu0 %v380_v36 }
  0x2f   :  { %298 = vmatmul.bf16.vlgmr.msra.gmra.mxu1 %v384_v37 }
  0x30   :  { %317 = vmatmul.bf16.vlgmr.msra.gmra.mxu2 %v380_v36 }
  0x31   :  { %336 = vmatmul.bf16.vlgmr.msra.gmra.mxu3 %v384_v37 }
  0x3e   :  { %284 = vmatmul.bf16.gmra.mxu0 %v388_v42 }
  0x3f   :  { %303 = vmatmul.bf16.gmra.mxu1 %v392_v43 }
  0x40   :  { %322 = vmatmul.bf16.gmra.mxu2 %v388_v42 }
  0x41   :  { %341 = vmatmul.bf16.gmra.mxu3 %v392_v43 }
  0xab   :  { %v280_v46 = vpop.f32.mrf.mxu0 }
  0xac   :  { %v281_v47 = vadd.f32 %v280_v46, %v87_v45  ;;  %v299_v48 = vpop.f32.mrf.mxu1 }
  0xae   :  { %v300_v50 = vadd.f32 %v299_v48, %v281_v47 }
  0xb0   :  { %v355_v52 = vadd.f32 %v347_v49, %v300_v50 }
  0xb2   :  { %363 = vst [vmem:[%s707_s4] sm:$0xff] %v355_v52 }
  0xb3   :  { %v318_v53 = vpop.f32.mrf.mxu2  ;;  %v282_v56 = vpop.f32.mrf.mxu0 }
  0xb4   :  { %v319_v54 = vadd.f32 %v318_v53, %v88_v51  ;;  %v337_v55 = vpop.f32.mrf.mxu3  ;;  %v283_v58 = vadd.f32 %v282_v56, %v87_v45  ;;  %v301_v59 = vpop.f32.mrf.mxu1 }
  0xb6   :  { %v338_v60 = vadd.f32 %v337_v55, %v319_v54  ;;  %v302_v62 = vadd.f32 %v301_v59, %v283_v58 }
  0xb8   :  { %v356_v63 = vadd.f32 %v348_v57, %v338_v60  ;;  %v357_v0 = vadd.f32 %v349_v61, %v302_v62 }
  0xba   :  { %364 = vst [vmem:[%s707_s4 + $0x8] sm:$0xff] %v356_v63 }
  0xbb   :  { %365 = vst [vmem:[%s707_s4 + $0x10] sm:$0xff] %v357_v0  ;;  %v320_v1 = vpop.f32.mrf.mxu2  ;;  %v285_v4 = vpop.f32.mrf.mxu0 }
  0xbc   :  { %v321_v2 = vadd.f32 %v320_v1, %v88_v51  ;;  %v339_v3 = vpop.f32.mrf.mxu3  ;;  %v286_v6 = vadd.f32 %v285_v4, %v87_v45  ;;  %v304_v7 = vpop.f32.mrf.mxu1 }
  0xbe   :  { %v340_v8 = vadd.f32 %v339_v3, %v321_v2  ;;  %v305_v10 = vadd.f32 %v304_v7, %v286_v6 }
  0xc0   :  { %v358_v11 = vadd.f32 %v350_v5, %v340_v8  ;;  %v359_v12 = vadd.f32 %v351_v9, %v305_v10 }
  0xc2   :  { %366 = vst [vmem:[%s707_s4 + $0x18] sm:$0xff] %v358_v11 }
  0xc3   :  { %367 = vst [vmem:[%s707_s4 + $0x20] sm:$0xff] %v359_v12  ;;  %v323_v13 = vpop.f32.mrf.mxu2  ;;  %v287_v16 = vpop.f32.mrf.mxu0 }
  0xc4   :  { %v324_v14 = vadd.f32 %v323_v13, %v88_v51  ;;  %v342_v15 = vpop.f32.mrf.mxu3  ;;  %v288_v18 = vadd.f32 %v287_v16, %v87_v45  ;;  %v306_v20 = vpop.f32.mrf.mxu1 }
  0xc6   :  { %v343_v19 = vadd.f32 %v342_v15, %v324_v14  ;;  %v307_v22 = vadd.f32 %v306_v20, %v288_v18 }
  0xc8   :  { %v360_v23 = vadd.f32 %v352_v17, %v343_v19  ;;  %v361_v24 = vadd.f32 %v353_v21, %v307_v22 }
  0xca   :  { %368 = vst [vmem:[%s707_s4 + $0x28] sm:$0xff] %v360_v23 }
  0xcb   :  { %369 = vst [vmem:[%s707_s4 + $0x30] sm:$0xff] %v361_v24  ;;  %v325_v25 = vpop.f32.mrf.mxu2 }
  0xcc   :  { %v326_v26 = vadd.f32 %v325_v25, %v88_v51  ;;  %v344_v27 = vpop.f32.mrf.mxu3 }
  0xce   :  { %v345_v29 = vadd.f32 %v344_v27, %v326_v26 }
  0xd0   :  { %v362_v30 = vadd.f32 %v354_v28, %v345_v29 }
  0xd2   :  { %370 = vst [vmem:[%s707_s4 + $0x38] sm:$0xff] %v362_v30 }
  0xd3   :  { %375 = vsyncpa [#allocation3], 1 }
  0xd4   :  { %376 = vsyncpa [#allocation5], 1 }

// kernel: residual_attention_block.8
= control target key start
LH: loop header
LB: loop body
LE: loop exit
PB: predicated region body
PF: predicated region fallthrough
CT: control target
= control target key end

     0   :  { %10 = vsyncpa [#allocation3], 0  ;;  %s2141_s0 = inlined_call_operand.vmem [shape: f32[32,256], index: 0, kind: input, shape index: {}]   ;;  %s2142_s1 = inlined_call_operand.vmem [shape: f32[1,256], index: 1, kind: input, shape index: {}]   ;;  %s2143_s2 = inlined_call_operand.vmem [shape: f32[1,256], index: 2, kind: input, shape index: {}]   ;;  %s2144_s3 = inlined_call_operand.hbm [shape: bf16[256,1024], index: 3, kind: input, shape index: {}]   ;;  %s2145_s4 = inlined_call_operand.vmem [shape: f32[1,1024], index: 4, kind: input, shape index: {}]   ;;  %s2146_s5 = inlined_call_operand.vmem [shape: bf16[32,1024], index: 5, kind: output, shape index: {}]  }
   0x1   :  { %12 = vsyncpa [#allocation3 + $0x1], 0  ;;  %s1626_s18 = smov 0   ;;  %s1628_s19 = smov 0  }
   0x2   :  { %s1630_s20 = smov 0   ;;  %s1632_s21 = smov 0  }
   0x3   :  { %s1634_s22 = smov 0   ;;  %s1636_s23 = smov 0  }
   0x4 LB: > { %s1238_s24 = sadd.s32 4294967295, %s1590_s23   ;;  %s27_s25 = sadd.s32 1, %s1586_s22  ;;  %s1590_s23 = sphi %s1636_s23, %s18_s23   ;;  %s1586_s22 = sphi %s1634_s22, %s2158_s22   ;;  %s1582_s21 = sphi %s1632_s21, %s2157_s21   ;;  %s1578_s20 = sphi %s1630_s20, %s2156_s20   ;;  %s1574_s19 = sphi %s1628_s19, %s2155_s19   ;;  %s1570_s18 = sphi %s1626_s18, %s2154_s18  }
   0x5   : > { %p28_p0 = scmp.ge.s32.totalorder %s27_s25, 4  ;;  %s105_s26 = sadd.s32 1, %s1578_s20 }
   0x6   : > { %p112_p1 = scmp.ne.s32.totalorder %s1578_s20, %s1574_s19  ;;  %p113_p2 = scmp.eq.s32.totalorder %s1590_s23, 0 }
   0x7   : > { %s2160_s25 = smov (%p28_p0, %s27_s25), 0  ;;  %p118_p4 = scmp.ne.s32.totalorder %s1574_s19, %s1570_s18 }
   0x8   : > { %p1662_p3 = por %p113_p2, %p112_p1  ;;  %s102_s28 = ssub.s32 %s1586_s22, %s2160_s25 }
   0x9   : > { %p119_p5 = scmp.eq.s32.totalorder %s1238_s24, 0  ;;  %p103_p6 = scmp.eq.s32.totalorder %s102_s28, 0 }
   0xa   : > { %p170_p7 = scmp.eq.s32.totalorder %s1238_s24, 3  ;;  %p1431_p10 = scmp.lt.s32.totalorder %s1590_s23, 4 }
   0xb   : > { %p1669_p8 = por %p119_p5, %p118_p4  ;;  %s212_s7 = sand.u32 1, %s1578_s20  }
   0xc   : > { %s1674_s30 = scalar_select %p103_p6, %s1578_s20, %s105_s26  }
   0xd   : > { %p1676_p9 = por %p170_p7, %p112_p1  ;;  %s1391_s8 = sshll.u32 %s1586_s22, 3 }
   0xe   : > { %s1243_s9 = sshll.u32 %s212_s7, 8  ;;  %s221_s12 = scalar_lea.hbm %s2144_s3, %s1391_s8 }
   0xf   : > { %s222_s13 = sshll.u32 %s221_s12, 4  ;;  %s216_s14 = scalar_lea.vmem [#allocation2], %s1243_s9  ;;  %s223_s13 = int_to_ptr.hbm [resolvable:$true] %s222_s13 }
  0x10   : > { %s224_s15 = sshll.u32 %s216_s14, 4  ;;  %p1428_p11 = pnand %p1431_p10, %p1662_p3  ;;  %s225_s15 = int_to_ptr.vmem [resolvable:$true] %s224_s15 }
  0x11   : > { %p1246_p12 = scmp.ge.s32.totalorder %s1590_s23, 1  ;;  %s213_s16 = scalar_lea.sflag [#allocation3], %s212_s7 }
  0x12   : > { %s1592_s17 = smov 512   ;;  %s1593_s18 = smov 128  }
  0x13   : > { %s1594_s24 = smov 8   ;;  %p240_p13 = scmp.lt.s32.totalorder %s1590_s23, 5 }
  0x14   : > { %1430 = dma.hbm_to_vmem [thread:$0]  (!%p1428_p11), %s223_s13, 4096, %s225_s15, %s213_s16, %s1592_s17, %s1593_s18, %s1594_s24  }
  0x15   : > { %p241_p0 = pnand %p1246_p12, %p240_p13 }
  0x16   : > { %s1691_s26 = sand.u32 (!%p241_p0), 1, %s1574_s19  }
  0x17   : > { %244 = sbr.rel (%p241_p0) target bundleno = 564 (0x234), region = 40  ;;  %s1247_s28 = sshll.u32 (!%p241_p0), %s1691_s26, 8 }
  0x18   : > { %s247_s8 = scalar_lea.sflag (!%p241_p0), [#allocation3], %s1691_s26  ;;  %s1695_s9 = scalar_lea.vmem (!%p241_p0), [#allocation2], %s1247_s28 }
  0x1c   : > { %1565 = dma.done.wait (%p1669_p8), %s247_s8, 4096  }
  0x1d   : > { %1567 = vsyncadd (%p1669_p8), %s247_s8, 4294963200  ;;  %v306_v0 = vld [vmem:[%s2141_s0 + $0x20] sm:$0xff]  ;;  %v307_v1 = vld [vmem:[%s2141_s0 + $0x28] sm:$0xff]  ;;  %v1595_v12 = vmov 256.0   ;;  %s1249_s12 = sshll.u32 %s1582_s21, 1  ;;  %s1248_s29 = sshll.u32 %s1691_s26, 5 }
  0x1e   : > { %v302_v2 = vld [vmem:[%s2141_s0] sm:$0xff]  ;;  %v316_v3 = vadd.f32 %v307_v1, %v306_v0  ;;  %v303_v4 = vld [vmem:[%s2141_s0 + $0x8] sm:$0xff]  ;;  %v308_v6 = vld [vmem:[%s2141_s0 + $0x30] sm:$0xff]  ;;  %1484 = vrcp.f32 %v1595_v12  ;;  %p296_p1 = scmp.lt.s32.totalorder %s1249_s12, 7  ;;  %s2037_s26 = scalar_lea.vmem [#allocation4], %s1248_s29 }
  0x1f   : > { %v310_v5 = vadd.f32 %v303_v4, %v302_v2  ;;  %v309_v7 = vld [vmem:[%s2141_s0 + $0x38] sm:$0xff]  ;;  %v304_v8 = vld [vmem:[%s2141_s0 + $0x10] sm:$0xff]  ;;  %v1300_v59 = vld [vmem:[%s1695_s9 + $0x60] sm:$0xf]  ;;  %s1424_s16 = sshll.u32 (%p1676_p9), %s1582_s21, 3 }
  0x20   : > { %317 = vadd.xlane.f32.xlu1 %v316_v3  ;;  %v305_v9 = vld [vmem:[%s2141_s0 + $0x18] sm:$0xff]  ;;  %v319_v10 = vadd.f32 %v309_v7, %v308_v6  ;;  %v1308_v47 = vld [vmem:[%s1695_s9 + $0x70] sm:$0xf]  ;;  %v1406_v52 = vld [vmem:[%s1695_s9 + $0x74] sm:$0xf]  ;;  %s2162_s12 = smov (!%p296_p1, %s1249_s12), 7  ;;  %s1095_s24 = scalar_lea.vmem (%p1676_p9), %s2146_s5, %s1424_s16 }
  0x21   : > { %311 = vadd.xlane.f32.xlu0 %v310_v5  ;;  %v313_v11 = vadd.f32 %v305_v9, %v304_v8  ;;  %v1407_v48 = vld [vmem:[%s1695_s9 + $0x74] sm:$0xf0]  ;;  %v1372_v49 = vld [vmem:[%s1695_s9 + $0xf0] sm:$0xf]  ;;  %v1310_v53 = vld [vmem:[%s1695_s9 + $0x78] sm:$0xf0]  ;;  %s298_s15 = scalar_lea.vmem %s2145_s4, %s2162_s12 }
  0x22   : > { %v1309_v50 = vor.u32 %v1407_v48, %v1308_v47  ;;  %v1423_v51 = vld [vmem:[%s1695_s9 + $0xf4] sm:$0xf0]  ;;  %v1313_v55 = vor.u32 %v1406_v52, %v1310_v53  ;;  %v1422_v56 = vld [vmem:[%s1695_s9 + $0xf4] sm:$0xf]  ;;  %v1374_v57 = vld [vmem:[%s1695_s9 + $0xf8] sm:$0xf0] }
  0x23   : > { %v1373_v54 = vor.u32 %v1423_v51, %v1372_v49  ;;  %v1377_v58 = vor.u32 %v1422_v56, %v1374_v57  ;;  %v1405_v60 = vld [vmem:[%s1695_s9 + $0x64] sm:$0xf0]  ;;  %v1364_v61 = vld [vmem:[%s1695_s9 + $0xe0] sm:$0xf]  ;;  %v1366_v5 = vld [vmem:[%s1695_s9 + $0xe8] sm:$0xf0] }
  0x24   : > { %v1485_v13 = vpop.eup %1484  ;;  %647 = vmatpush.bf16.msra.mxu0 %v1309_v50  ;;  %685 = vmatpush.bf16.msra.mxu2 %v1313_v55  ;;  %v1301_v62 = vor.u32 %v1405_v60, %v1300_v59  ;;  %v1421_v63 = vld [vmem:[%s1695_s9 + $0xe4] sm:$0xf0]  ;;  %v1402_v12 = vld [vmem:[%s1695_s9 + $0x54] sm:$0xf]  ;;  %v1342_v50 = vld [vmem:[%s1695_s9 + $0xb8] sm:$0xf0] }
  0x25   : > { %v323_v14 = vmul.f32 256.0, %v1485_v13  ;;  %vm327_vm0 = vweird.f32 %v1485_v13  ;;  %666 = vmatpush.bf16.msra.mxu1 %v1373_v54  ;;  %704 = vmatpush.bf16.msra.mxu3 %v1377_v58  ;;  %v1414_v49 = vld [vmem:[%s1695_s9 + $0xb4] sm:$0xf]  ;;  %v1268_v52 = vld [vmem:[%s1695_s9 + $0x20] sm:$0xf] }
  0x26   : > { %v1345_v51 = vor.u32 %v1414_v49, %v1342_v50  ;;  %v1397_v53 = vld [vmem:[%s1695_s9 + $0x24] sm:$0xf0]  ;;  %v1332_v54 = vld [vmem:[%s1695_s9 + $0xa0] sm:$0xf]  ;;  %v1396_v57 = vld [vmem:[%s1695_s9 + $0x24] sm:$0xf] }
  0x27   : > { %v324_v15 = vsub.f32 1.0, %v323_v14  ;;  %v1269_v55 = vor.u32 %v1397_v53, %v1268_v52  ;;  %v1413_v56 = vld [vmem:[%s1695_s9 + $0xa4] sm:$0xf0]  ;;  %v1270_v58 = vld [vmem:[%s1695_s9 + $0x28] sm:$0xf0] }
  0x28   : > { %320 = vadd.xlane.f32.xlu1 %v319_v10  ;;  %648 = vmatpush.bf16.msra.mxu0 %v1301_v62  ;;  %v1333_v59 = vor.u32 %v1413_v56, %v1332_v54  ;;  %v1273_v60 = vor.u32 %v1396_v57, %v1270_v58  ;;  %v1334_v62 = vld [vmem:[%s1695_s9 + $0xa8] sm:$0xf0] }
  0x29   : > { %314 = vadd.xlane.f32.xlu0 %v313_v11  ;;  %v325_v16 = vmul.f32 %v1485_v13, %v324_v15  ;;  %v1419_v11 = vld [vmem:[%s1695_s9 + $0xd4] sm:$0xf0] }
  0x2b   : > { %v326_v17 = vadd.f32 %v1485_v13, %v325_v16  ;;  %v1418_v16 = vld [vmem:[%s1695_s9 + $0xd4] sm:$0xf] }
  0x2d   : > { %v1725_v18 = vsel %vm327_vm0, %v1485_v13, %v326_v17  ;;  %v1294_v13 = vld [vmem:[%s1695_s9 + $0x58] sm:$0xf0] }
  0x2e   : > { %v1297_v15 = vor.u32 %v1402_v12, %v1294_v13  ;;  %v1358_v17 = vld [vmem:[%s1695_s9 + $0xd8] sm:$0xf0]  ;;  %v1393_v13 = vld [vmem:[%s1695_s9 + $0x4] sm:$0xf0] }
  0x93   : > { %v318_v19 = vpop.xlane.xlu1 %317 }
  0x94   : > { %v331_v20 = vmul.f32 %v1725_v18, %v318_v19  ;;  %v312_v21 = vpop.xlane.xlu0 %311  ;;  %v1361_v19 = vor.u32 %v1418_v16, %v1358_v17 }
  0x95   : > { %v329_v22 = vmul.f32 %v1725_v18, %v312_v21  ;;  %v1401_v21 = vld [vmem:[%s1695_s9 + $0x44] sm:$0xf0] }
  0x96   : > { %v1729_v23 = vsub.f32 %v306_v0, %v331_v20  ;;  %v1731_v24 = vsub.f32 %v307_v1, %v331_v20  ;;  %v1404_v0 = vld [vmem:[%s1695_s9 + $0x64] sm:$0xf]  ;;  %v1302_v1 = vld [vmem:[%s1695_s9 + $0x68] sm:$0xf0]  ;;  %v1284_v20 = vld [vmem:[%s1695_s9 + $0x40] sm:$0xf] }
  0x97   : > { %v1733_v25 = vsub.f32 %v302_v2, %v329_v22  ;;  %v1735_v26 = vsub.f32 %v303_v4, %v329_v22  ;;  %v1365_v2 = vor.u32 %v1421_v63, %v1364_v61  ;;  %v1305_v3 = vor.u32 %v1404_v0, %v1302_v1  ;;  %v1420_v4 = vld [vmem:[%s1695_s9 + $0xe4] sm:$0xf]  ;;  %v1348_v22 = vld [vmem:[%s1695_s9 + $0xc0] sm:$0xf]  ;;  %v1260_v0 = vld [vmem:[%s1695_s9 + $0x10] sm:$0xf] }
  0x98   : > { %v345_v27 = vmul.f32 %v1729_v23, %v1729_v23  ;;  %v346_v28 = vmul.f32 %v1731_v24, %v1731_v24  ;;  %v1412_v61 = vld [vmem:[%s1695_s9 + $0xa4] sm:$0xf]  ;;  %v1395_v1 = vld [vmem:[%s1695_s9 + $0x14] sm:$0xf0] }
  0x99   : > { %v341_v29 = vmul.f32 %v1733_v25, %v1733_v25  ;;  %v342_v30 = vmul.f32 %v1735_v26, %v1735_v26  ;;  %667 = vmatpush.bf16.msra.mxu1 %v1365_v2  ;;  %686 = vmatpush.bf16.msra.mxu2 %v1305_v3  ;;  %v1337_v63 = vor.u32 %v1412_v61, %v1334_v62  ;;  %v1324_v2 = vld [vmem:[%s1695_s9 + $0x90] sm:$0xf]  ;;  %v417_v61 = vld [vmem:[%s2142_s1] sm:$0x3] }
  0x9a   : > { %v355_v31 = vadd.f32 %v346_v28, %v345_v27  ;;  %v1285_v27 = vor.u32 %v1401_v21, %v1284_v20  ;;  %v1417_v28 = vld [vmem:[%s1695_s9 + $0xc4] sm:$0xf0]  ;;  %v1261_v3 = vor.u32 %v1395_v1, %v1260_v0  ;;  %v1392_v20 = vld [vmem:[%s1695_s9 + $0x4] sm:$0xf]  ;;  %v1254_v21 = vld [vmem:[%s1695_s9 + $0x8] sm:$0xf0] }
  0x9b   : > { %v321_v32 = vpop.xlane.xlu1 %320  ;;  %v349_v33 = vadd.f32 %v342_v30, %v341_v29  ;;  %v1400_v29 = vld [vmem:[%s1695_s9 + $0x44] sm:$0xf]  ;;  %v1286_v30 = vld [vmem:[%s1695_s9 + $0x48] sm:$0xf0]  ;;  %v419_v1 = vperm.slane %v417_v61, 0 }
  0x9c   : > { %v332_v34 = vmul.f32 %v1725_v18, %v321_v32  ;;  %v315_v35 = vpop.xlane.xlu0 %314  ;;  %356 = vadd.xlane.f32.xlu0 %v355_v31  ;;  %v1349_v31 = vor.u32 %v1417_v28, %v1348_v22  ;;  %v1289_v32 = vor.u32 %v1400_v29, %v1286_v30  ;;  %v1408_v22 = vld [vmem:[%s1695_s9 + $0x84] sm:$0xf]  ;;  %v1257_v29 = vor.u32 %v1392_v20, %v1254_v21  ;;  %v1318_v30 = vld [vmem:[%s1695_s9 + $0x88] sm:$0xf0] }
  0x9d   : > { %v330_v36 = vmul.f32 %v1725_v18, %v315_v35  ;;  %350 = vadd.xlane.f32.xlu2 %v349_v33  ;;  %687 = vmatpush.bf16.msra.mxu2 %v1297_v15  ;;  %v1416_v33 = vld [vmem:[%s1695_s9 + $0xc4] sm:$0xf]  ;;  %v1409_v15 = vld [vmem:[%s1695_s9 + $0x84] sm:$0xf0] }
  0x9e   : > { %v1747_v37 = vsub.f32 %v308_v6, %v332_v34  ;;  %v1749_v38 = vsub.f32 %v309_v7, %v332_v34  ;;  %v1369_v6 = vor.u32 %v1420_v4, %v1366_v5  ;;  %v1292_v7 = vld [vmem:[%s1695_s9 + $0x50] sm:$0xf]  ;;  %v1350_v34 = vld [vmem:[%s1695_s9 + $0xc8] sm:$0xf0]  ;;  %v1411_v4 = vld [vmem:[%s1695_s9 + $0x94] sm:$0xf0] }
  0x9f   : > { %v1751_v39 = vsub.f32 %v304_v8, %v330_v36  ;;  %v1753_v40 = vsub.f32 %v305_v9, %v330_v36  ;;  %v1403_v8 = vld [vmem:[%s1695_s9 + $0x54] sm:$0xf0]  ;;  %v1356_v9 = vld [vmem:[%s1695_s9 + $0xd0] sm:$0xf]  ;;  %v1353_v35 = vor.u32 %v1416_v33, %v1350_v34  ;;  %v1394_v5 = vld [vmem:[%s1695_s9 + $0x14] sm:$0xf] }
  0xa0   : > { %v347_v41 = vmul.f32 %v1747_v37, %v1747_v37  ;;  %v348_v42 = vmul.f32 %v1749_v38, %v1749_v38  ;;  %705 = vmatpush.bf16.msra.mxu3 %v1369_v6  ;;  %v1293_v10 = vor.u32 %v1403_v8, %v1292_v7  ;;  %v1357_v14 = vor.u32 %v1419_v11, %v1356_v9  ;;  %v1276_v36 = vld [vmem:[%s1695_s9 + $0x30] sm:$0xf]  ;;  %v1262_v6 = vld [vmem:[%s1695_s9 + $0x18] sm:$0xf0]  ;;  %v1410_v9 = vld [vmem:[%s1695_s9 + $0x94] sm:$0xf] }
  0xa1   : > { %v343_v43 = vmul.f32 %v1751_v39, %v1751_v39  ;;  %v344_v44 = vmul.f32 %v1753_v40, %v1753_v40  ;;  %688 = vmatpush.bf16.msra.mxu2 %v1289_v32  ;;  %v1325_v7 = vor.u32 %v1411_v4, %v1324_v2  ;;  %v1265_v8 = vor.u32 %v1394_v5, %v1262_v6  ;;  %v1252_v11 = vld [vmem:[%s1695_s9] sm:$0xf] }
  0xa2   : > { %v358_v45 = vadd.f32 %v348_v42, %v347_v41  ;;  %649 = vmatpush.bf16.msra.mxu0 %v1293_v10  ;;  %668 = vmatpush.bf16.msra.mxu1 %v1357_v14  ;;  %v1399_v41 = vld [vmem:[%s1695_s9 + $0x34] sm:$0xf0]  ;;  %v1340_v42 = vld [vmem:[%s1695_s9 + $0xb0] sm:$0xf]  ;;  %v1326_v10 = vld [vmem:[%s1695_s9 + $0x98] sm:$0xf0] }
  0xa3   : > { %v352_v46 = vadd.f32 %v344_v44, %v343_v43  ;;  %v1277_v43 = vor.u32 %v1399_v41, %v1276_v36  ;;  %v1415_v44 = vld [vmem:[%s1695_s9 + $0xb4] sm:$0xf0]  ;;  %v1329_v12 = vor.u32 %v1410_v9, %v1326_v10  ;;  %v1316_v14 = vld [vmem:[%s1695_s9 + $0x80] sm:$0xf]  ;;  %v420_v4 = vperm.slane %v417_v61, 1 }
  0xa4   : > { %359 = vadd.xlane.f32.xlu1 %v358_v45  ;;  %706 = vmatpush.bf16.msra.mxu3 %v1361_v19  ;;  %v1398_v45 = vld [vmem:[%s1695_s9 + $0x34] sm:$0xf]  ;;  %v1341_v47 = vor.u32 %v1415_v44, %v1340_v42  ;;  %v1253_v19 = vor.u32 %v1393_v13, %v1252_v11  ;;  %v1317_v28 = vor.u32 %v1409_v15, %v1316_v14  ;;  %v431_v2 = vld [vmem:[%s2143_s2] sm:$0x3] }
  0xa5   : > { %353 = vadd.xlane.f32.xlu2 %v352_v46  ;;  %v1278_v46 = vld [vmem:[%s1695_s9 + $0x38] sm:$0xf0]  ;;  %v433_v9 = vperm.slane %v431_v2, 0  ;;  %v434_v10 = vperm.slane %v431_v2, 1 }
  0xa6   : > { %650 = vmatpush.bf16.msra.mxu0 %v1285_v27  ;;  %669 = vmatpush.bf16.msra.mxu1 %v1349_v31  ;;  %v1281_v48 = vor.u32 %v1398_v45, %v1278_v46  ;;  %v1321_v31 = vor.u32 %v1408_v22, %v1318_v30 }
  0xa8   : > { %707 = vmatpush.bf16.msra.mxu3 %v1353_v35  ;;  %689 = vmatpush.bf16.msra.mxu2 %v1281_v48 }
  0xaa   : > { %651 = vmatpush.bf16.msra.mxu0 %v1277_v43  ;;  %670 = vmatpush.bf16.msra.mxu1 %v1341_v47 }
  0xac   : > { %708 = vmatpush.bf16.msra.mxu3 %v1345_v51  ;;  %690 = vmatpush.bf16.msra.mxu2 %v1273_v60 }
  0xae   : > { %652 = vmatpush.bf16.msra.mxu0 %v1269_v55  ;;  %671 = vmatpush.bf16.msra.mxu1 %v1333_v59 }
  0xb0   : > { %709 = vmatpush.bf16.msra.mxu3 %v1337_v63  ;;  %691 = vmatpush.bf16.msra.mxu2 %v1265_v8 }
  0xb2   : > { %653 = vmatpush.bf16.msra.mxu0 %v1261_v3  ;;  %672 = vmatpush.bf16.msra.mxu1 %v1325_v7 }
  0xb4   : > { %710 = vmatpush.bf16.msra.mxu3 %v1329_v12  ;;  %692 = vmatpush.bf16.msra.mxu2 %v1257_v29 }
  0xb6   : > { %654 = vmatpush.bf16.msra.mxu0 %v1253_v19  ;;  %673 = vmatpush.bf16.msra.mxu1 %v1317_v28 }
  0xb8   : > { %711 = vmatpush.bf16.msra.mxu3 %v1321_v31 }
 0x10f   : > { %v357_v17 = vpop.xlane.xlu0 %356 }
 0x110   : > { %v351_v16 = vpop.xlane.xlu2 %350  ;;  %v363_v33 = vmul.f32 %v357_v17, %v1725_v18 }
 0x111   : > { %v361_v27 = vmul.f32 %v351_v16, %v1725_v18 }
 0x112   : > { %v1829_v34 = vadd.f32 1e-05, %v363_v33 }
 0x113   : > { %v365_v32 = vadd.f32 1e-05, %v361_v27 }
 0x114   : > { %vm395_vm9 = vweird.f32 %v1829_v34 }
 0x115   : > { %1486 = vrsqrt.f32 %v365_v32  ;;  %vm375_vm2 = vweird.f32 %v365_v32 }
 0x116   : > { %1488 = vrsqrt.f32 %v1829_v34 }
 0x117   : > { %v360_v35 = vpop.xlane.xlu1 %359 }
 0x118   : > { %v364_v36 = vmul.f32 %v360_v35, %v1725_v18  ;;  %v354_v41 = vpop.xlane.xlu2 %353 }
 0x119   : > { %v362_v42 = vmul.f32 %v354_v41, %v1725_v18 }
 0x11a   : > { %v368_v43 = vadd.f32 1e-05, %v364_v36 }
 0x11b   : > { %v1487_v44 = vpop.eup %1486  ;;  %v366_v45 = vadd.f32 1e-05, %v362_v42 }
 0x11c   : > { %v370_v46 = vmul.f32 %v1487_v44, %v365_v32  ;;  %1490 = vrsqrt.f32 %v368_v43  ;;  %v1489_v49 = vpop.eup %1488  ;;  %vm376_vm1 = vweird.f32 %v1487_v44  ;;  %vm405_vm7 = vweird.f32 %v368_v43 }
 0x11d   : > { %1492 = vrsqrt.f32 %v366_v45  ;;  %v390_v55 = vmul.f32 %v1489_v49, %v1829_v34  ;;  %vm377_vm3 = vmor %vm375_vm2, %vm376_vm1  ;;  %vm385_vm5 = vweird.f32 %v366_v45  ;;  %vm396_vm10 = vweird.f32 %v1489_v49 }
 0x11e   : > { %v371_v47 = vmul.f32 %v1487_v44, %v370_v46  ;;  %vm397_vm12 = vmor %vm395_vm9, %vm396_vm10 }
 0x11f   : > { %v391_v58 = vmul.f32 %v1489_v49, %v390_v55 }
 0x120   : > { %v372_v48 = vmul.f32 0.5, %v371_v47 }
 0x121   : > { %v392_v5 = vmul.f32 0.5, %v391_v58 }
 0x122   : > { %v1491_v50 = vpop.eup %1490  ;;  %v373_v51 = vsub.f32 1.5, %v372_v48 }
 0x123   : > { %v1493_v52 = vpop.eup %1492  ;;  %v400_v53 = vmul.f32 %v1491_v50, %v368_v43  ;;  %v393_v14 = vsub.f32 1.5, %v392_v5  ;;  %vm406_vm8 = vweird.f32 %v1491_v50 }
 0x124   : > { %v374_v54 = vmul.f32 %v1487_v44, %v373_v51  ;;  %v380_v18 = vmul.f32 %v1493_v52, %v366_v45  ;;  %vm386_vm4 = vweird.f32 %v1493_v52  ;;  %vm407_vm11 = vmor %vm405_vm7, %vm406_vm8 }
 0x125   : > { %v401_v56 = vmul.f32 %v1491_v50, %v400_v53  ;;  %vm387_vm6 = vmor %vm385_vm5, %vm386_vm4  ;;  %v394_v22 = vmul.f32 %v1489_v49, %v393_v14 }
 0x126   : > { %v381_v57 = vmul.f32 %v1493_v52, %v380_v18  ;;  %v378_v60 = vsel %vm377_vm3, %v1487_v44, %v374_v54 }
 0x127   : > { %v402_v62 = vmul.f32 0.5, %v401_v56  ;;  %v409_v0 = vmul.f32 %v378_v60, %v1733_v25  ;;  %v410_v3 = vmul.f32 %v378_v60, %v1735_v26  ;;  %v398_v28 = vsel %vm397_vm12, %v1489_v49, %v394_v22 }
 0x128   : > { %v382_v59 = vmul.f32 0.5, %v381_v57  ;;  %v413_v31 = vmul.f32 %v398_v28, %v1729_v23  ;;  %v414_v32 = vmul.f32 %v398_v28, %v1731_v24  ;;  %v481_v23 = vld [vmem:[%s298_s15] sm:$0x3] }
 0x129   : > { %v403_v7 = vsub.f32 1.5, %v402_v62  ;;  %v423_v12 = vmul.f32 %v419_v1, %v409_v0  ;;  %v424_v13 = vmul.f32 %v420_v4, %v410_v3  ;;  %v1854_v24 = vperm.slane %v481_v23, 0 }
 0x12a   : > { %v383_v63 = vsub.f32 1.5, %v382_v59  ;;  %v427_v35 = vmul.f32 %v419_v1, %v413_v31  ;;  %v428_v36 = vmul.f32 %v420_v4, %v414_v32  ;;  %v1859_v49 = vperm.slane %v481_v23, 1 }
 0x12b   : > { %v404_v16 = vmul.f32 %v1491_v50, %v403_v7  ;;  %v437_v17 = vadd.f32 %v433_v9, %v423_v12  ;;  %v438_v20 = vadd.f32 %v434_v10, %v424_v13 }
 0x12c   : > { %v384_v6 = vmul.f32 %v1493_v52, %v383_v63  ;;  %v441_v43 = vadd.f32 %v433_v9, %v427_v35  ;;  %v442_v44 = vadd.f32 %v434_v10, %v428_v36 }
 0x12e   : > { %v388_v8 = vsel %vm387_vm6, %v1493_v52, %v384_v6 }
 0x12f   : > { %v411_v11 = vmul.f32 %v388_v8, %v1751_v39  ;;  %v412_v25 = vmul.f32 %v388_v8, %v1753_v40  ;;  %v408_v40 = vsel %vm407_vm11, %v1491_v50, %v404_v16 }
 0x130   : > { %v415_v29 = vmul.f32 %v408_v40, %v1747_v37  ;;  %v416_v30 = vmul.f32 %v408_v40, %v1749_v38 }
 0x131   : > { %v425_v15 = vmul.f32 %v419_v1, %v411_v11  ;;  %v426_v26 = vmul.f32 %v420_v4, %v412_v25 }
 0x132   : > { %v429_v33 = vmul.f32 %v419_v1, %v415_v29  ;;  %v430_v34 = vmul.f32 %v420_v4, %v416_v30 }
 0x133   : > { %v439_v19 = vadd.f32 %v433_v9, %v425_v15  ;;  %v440_v21 = vadd.f32 %v434_v10, %v426_v26 }
 0x134   : > { %v443_v41 = vadd.f32 %v433_v9, %v429_v33  ;;  %v444_v42 = vadd.f32 %v434_v10, %v430_v34 }
 0x135   : > { %v445_v39 = vpack.c.bf16 %v439_v19, %v437_v17  ;;  %v446_v27 = vpack.c.bf16 %v440_v21, %v438_v20 }
 0x136   : > { %v447_v45 = vpack.c.bf16 %v443_v41, %v441_v43  ;;  %v448_v46 = vpack.c.bf16 %v444_v42, %v442_v44 }
 0x137   : > { %655 = vmatmul.bf16.vlgmr.msra.gmra.mxu0 %v445_v39  ;;  %674 = vmatmul.bf16.vlgmr.msra.gmra.mxu1 %v446_v27 }
 0x138   : > { %693 = vmatmul.bf16.vlgmr.msra.gmra.mxu2 %v445_v39  ;;  %712 = vmatmul.bf16.vlgmr.msra.gmra.mxu3 %v446_v27 }
 0x147   : > { %660 = vmatmul.bf16.gmra.mxu0 %v447_v45  ;;  %679 = vmatmul.bf16.gmra.mxu1 %v448_v46 }
 0x148   : > { %698 = vmatmul.bf16.gmra.mxu2 %v447_v45  ;;  %717 = vmatmul.bf16.gmra.mxu3 %v448_v46 }
 0x1b4   : > { %v656_v37 = vpop.f32.mrf.mxu0  ;;  %v675_v38 = vpop.f32.mrf.mxu1 }
 0x1b5   : > { %v657_v47 = vadd.f32 %v656_v37, %v1854_v24 }
 0x1b7   : > { %v1857_v48 = vadd.f32 %v675_v38, %v657_v47 }
 0x1b9   : > { %v1862_v50 = vmul.f32 0.70710677, %v1857_v48 }
 0x1bb   : > { %v739_v51 = vmul.f32 %v1862_v50, %v1862_v50  ;;  %v694_v52 = vpop.f32.mrf.mxu2  ;;  %v713_v54 = vpop.f32.mrf.mxu3 }
 0x1bc   : > { %v695_v53 = vadd.f32 %v694_v52, %v1859_v49  ;;  %v658_v55 = vpop.f32.mrf.mxu0  ;;  %v677_v58 = vpop.f32.mrf.mxu1 }
 0x1bd   : > { %v1867_v18 = vmin.f32 %v739_v51, 16.0  ;;  %v659_v56 = vadd.f32 %v658_v55, %v1854_v24 }
 0x1be   : > { %v1870_v57 = vadd.f32 %v713_v54, %v695_v53 }
 0x1bf   : > { %v741_v59 = vmul.f32 2.1237322e-06, %v1867_v18  ;;  %v752_v60 = vmul.f32 3.8918573e-05, %v1867_v18  ;;  %v1874_v61 = vadd.f32 %v677_v58, %v659_v56 }
 0x1c0   : > { %v1877_v62 = vmul.f32 0.70710677, %v1870_v57 }
 0x1c1   : > { %v742_v63 = vadd.f32 0.00028619796, %v741_v59  ;;  %v753_v0 = vadd.f32 0.001143296, %v752_v60  ;;  %v1882_v2 = vmul.f32 0.70710677, %v1874_v61 }
 0x1c2   : > { %v779_v1 = vmul.f32 %v1877_v62, %v1877_v62 }
 0x1c3   : > { %v743_v3 = vmul.f32 %v742_v63, %v1867_v18  ;;  %v754_v4 = vmul.f32 %v753_v0, %v1867_v18  ;;  %v696_v5 = vpop.f32.mrf.mxu2  ;;  %v819_v7 = vmul.f32 %v1882_v2, %v1882_v2  ;;  %v715_v14 = vpop.f32.mrf.mxu3 }
 0x1c4   : > { %v1886_v6 = vmin.f32 %v779_v1, 16.0  ;;  %v697_v8 = vadd.f32 %v696_v5, %v1859_v49  ;;  %v661_v11 = vpop.f32.mrf.mxu0  ;;  %v680_v33 = vpop.f32.mrf.mxu1 }
 0x1c5   : > { %v744_v9 = vadd.f32 0.0036580483, %v743_v3  ;;  %v755_v10 = vadd.f32 0.014752088, %v754_v4  ;;  %v1893_v13 = vmin.f32 %v819_v7, 16.0  ;;  %v662_v21 = vadd.f32 %v661_v11, %v1854_v24 }
 0x1c6   : > { %v781_v12 = vmul.f32 2.1237322e-06, %v1886_v6  ;;  %v792_v25 = vmul.f32 3.8918573e-05, %v1886_v6  ;;  %v1897_v16 = vadd.f32 %v715_v14, %v697_v8 }
 0x1c7   : > { %v745_v15 = vmul.f32 %v744_v9, %v1867_v18  ;;  %v756_v26 = vmul.f32 %v755_v10, %v1867_v18  ;;  %v821_v20 = vmul.f32 2.1237322e-06, %v1893_v13  ;;  %v832_v39 = vmul.f32 3.8918573e-05, %v1893_v13 }
 0x1c8   : > { %v782_v17 = vadd.f32 0.00028619796, %v781_v12  ;;  %v793_v19 = vadd.f32 0.001143296, %v792_v25  ;;  %v1906_v32 = vmul.f32 0.70710677, %v1897_v16  ;;  %v1909_v41 = vadd.f32 %v680_v33, %v662_v21 }
 0x1c9   : > { %v757_v22 = vadd.f32 0.112945676, %v756_v26  ;;  %v822_v28 = vadd.f32 0.00028619796, %v821_v20  ;;  %v746_v29 = vadd.f32 0.05243302, %v745_v15 }
 0x1ca   : > { %v783_v27 = vmul.f32 %v782_v17, %v1886_v6  ;;  %v794_v40 = vmul.f32 %v793_v19, %v1886_v6  ;;  %v833_v31 = vadd.f32 0.001143296, %v832_v39  ;;  %v859_v44 = vmul.f32 %v1906_v32, %v1906_v32 }
 0x1cb   : > { %v758_v30 = vmul.f32 %v757_v22, %v1867_v18  ;;  %v823_v36 = vmul.f32 %v822_v28, %v1893_v13  ;;  %v747_v37 = vmul.f32 %v746_v29, %v1867_v18  ;;  %v1922_v55 = vmul.f32 0.70710677, %v1909_v41 }
 0x1cc   : > { %v784_v34 = vadd.f32 0.0036580483, %v783_v27  ;;  %v795_v35 = vadd.f32 0.014752088, %v794_v40  ;;  %v834_v43 = vmul.f32 %v833_v31, %v1893_v13  ;;  %v1918_v51 = vmin.f32 %v859_v44, 16.0 }
 0x1cd   : > { %v759_v42 = vadd.f32 0.4994258, %v758_v30  ;;  %v824_v23 = vadd.f32 0.0036580483, %v823_v36  ;;  %v748_v0 = vadd.f32 0.18741608, %v747_v37  ;;  %v899_v5 = vmul.f32 %v1922_v55, %v1922_v55 }
 0x1ce   : > { %v785_v45 = vmul.f32 %v784_v34, %v1886_v6  ;;  %v796_v46 = vmul.f32 %v795_v35, %v1886_v6  ;;  %v835_v47 = vadd.f32 0.014752088, %v834_v43  ;;  %v861_v59 = vmul.f32 2.1237322e-06, %v1918_v51 }
 0x1cf   : > { %v760_v38 = vmul.f32 %v759_v42, %v1867_v18  ;;  %v825_v54 = vmul.f32 %v824_v23, %v1893_v13  ;;  %v872_v1 = vmul.f32 3.8918573e-05, %v1918_v51  ;;  %v749_v11 = vmul.f32 %v748_v0, %v1867_v18 }
 0x1d0   : > { %v786_v52 = vadd.f32 0.05243302, %v785_v45  ;;  %v797_v53 = vadd.f32 0.112945676, %v796_v46  ;;  %v836_v58 = vmul.f32 %v835_v47, %v1893_v13  ;;  %v862_v9 = vadd.f32 0.00028619796, %v861_v59 }
 0x1d1   : > { %v761_v56 = vadd.f32 1.0, %v760_v38  ;;  %v826_v4 = vadd.f32 0.05243302, %v825_v54  ;;  %v873_v14 = vadd.f32 0.001143296, %v872_v1  ;;  %v1937_v26 = vmin.f32 %v899_v5, 16.0 }
 0x1d2   : > { %v787_v60 = vmul.f32 %v786_v52, %v1886_v6  ;;  %v798_v63 = vmul.f32 %v797_v53, %v1886_v6  ;;  %v837_v8 = vadd.f32 0.112945676, %v836_v58  ;;  %v863_v25 = vmul.f32 %v862_v9, %v1918_v51  ;;  %v699_v52 = vpop.f32.mrf.mxu2 }
 0x1d3   : > { %1494 = vrcp.f32 %v761_v56  ;;  %v827_v20 = vmul.f32 %v826_v4, %v1893_v13  ;;  %v874_v22 = vmul.f32 %v873_v14, %v1918_v51  ;;  %v750_v27 = vadd.f32 1.1283791, %v749_v11  ;;  %v718_v14 = vpop.f32.mrf.mxu3 }
 0x1d4   : > { %v799_v3 = vadd.f32 0.4994258, %v798_v63  ;;  %v788_v7 = vadd.f32 0.18741608, %v787_v60  ;;  %v838_v12 = vmul.f32 %v837_v8, %v1893_v13  ;;  %v864_v18 = vadd.f32 0.0036580483, %v863_v25  ;;  %v663_v8 = vpop.f32.mrf.mxu0 }
 0x1d5   : > { %v771_v40 = vand.u32 2147483647, %v761_v56  ;;  %v773_v28 = vand.u32 2147483648, %v761_v56  ;;  %v875_v31 = vadd.f32 0.014752088, %v874_v22  ;;  %v1951_v45 = vmul.f32 0.5, %v1857_v48 }
 0x1d6   : > { %v800_v10 = vmul.f32 %v799_v3, %v1886_v6  ;;  %v789_v19 = vmul.f32 %v788_v7, %v1886_v6  ;;  %v839_v21 = vadd.f32 0.4994258, %v838_v12  ;;  %v912_v33 = vmul.f32 3.8918573e-05, %v1937_v26 }
 0x1d7   : > { %v828_v34 = vadd.f32 0.18741608, %v827_v20  ;;  %v901_v35 = vmul.f32 2.1237322e-06, %v1937_v26  ;;  %v865_v43 = vmul.f32 %v864_v18, %v1918_v51  ;;  %v876_v44 = vmul.f32 %v875_v31, %v1918_v51 }
 0x1d8   : > { %v1935_v15 = vadd.f32 1.0, %v800_v10  ;;  %v840_v30 = vmul.f32 %v839_v21, %v1893_v13  ;;  %v790_v6 = vadd.f32 1.1283791, %v789_v19  ;;  %v751_v46 = vmul.f32 %v750_v27, %v1862_v50 }
 0x1d9   : > { %v1495_v17 = vpop.eup %1494  ;;  %vm767_vm14 = vweird.f32 %v761_v56  ;;  %v1955_v23 = vmul.f32 0.5, %v1870_v57  ;;  %vm772_vm15 = vcmp.eq.f32.partialorder %v771_v40, 8.507059e+37  ;;  %v913_v47 = vadd.f32 0.001143296, %v912_v33 }
 0x1da   : > { %v763_v39 = vmul.f32 %v1495_v17, %v761_v56  ;;  %1496 = vrcp.f32 %v1935_v15  ;;  %vm768_vm13 = vweird.f32 %v1495_v17  ;;  %v1946_v42 = vadd.f32 1.0, %v840_v30 }
 0x1db   : > { %vm769_vm0 = vmor %vm767_vm14, %vm768_vm13  ;;  %v774_v53 = vor.u32 1.1754944e-38, %v773_v28  ;;  %v829_v48 = vmul.f32 %v828_v34, %v1893_v13  ;;  %v902_v58 = vadd.f32 0.00028619796, %v901_v35  ;;  %v791_v56 = vmul.f32 %v790_v6, %v1877_v62 }
 0x1dc   : > { %v764_v29 = vsub.f32 1.0, %v763_v39  ;;  %1498 = vrcp.f32 %v1946_v42  ;;  %v866_v57 = vadd.f32 0.05243302, %v865_v43  ;;  %v877_v59 = vadd.f32 0.112945676, %v876_v44  ;;  %v682_v43 = vpop.f32.mrf.mxu1 }
 0x1dd   : > { %v811_v0 = vand.u32 2147483647, %v1935_v15  ;;  %v700_v1 = vadd.f32 %v699_v52, %v1859_v49  ;;  %vm807_vm1 = vweird.f32 %v1935_v15  ;;  %v813_v3 = vand.u32 2147483648, %v1935_v15  ;;  %v701_v52 = vpop.f32.mrf.mxu2 }
 0x1de   : > { %v765_v36 = vmul.f32 %v1495_v17, %v764_v29  ;;  %v878_v4 = vmul.f32 %v877_v59, %v1918_v51  ;;  %v914_v13 = vmul.f32 %v913_v47, %v1937_v26  ;;  %v903_v62 = vmul.f32 %v902_v58, %v1937_v26 }
 0x1df   : > { %v830_v10 = vadd.f32 1.1283791, %v829_v48  ;;  %v867_v11 = vmul.f32 %v866_v57, %v1918_v51  ;;  %vm812_vm3 = vcmp.eq.f32.partialorder %v811_v0, 8.507059e+37  ;;  %v1974_v20 = vadd.f32 %v718_v14, %v700_v1 }
 0x1e0   : > { %v1497_v37 = vpop.eup %1496  ;;  %v766_v38 = vadd.f32 %v1495_v17, %v765_v36  ;;  %v879_v12 = vadd.f32 0.4994258, %v878_v4  ;;  %v915_v25 = vadd.f32 0.014752088, %v914_v13  ;;  %v814_v21 = vor.u32 1.1754944e-38, %v813_v3  ;;  %v720_v4 = vpop.f32.mrf.mxu3 }
 0x1e1   : > { %v803_v54 = vmul.f32 %v1497_v37, %v1935_v15  ;;  %vm808_vm2 = vweird.f32 %v1497_v37  ;;  %v664_v18 = vadd.f32 %v663_v8, %v1854_v24  ;;  %v904_v29 = vadd.f32 0.0036580483, %v903_v62 }
 0x1e2   : > { %v770_v50 = vsel %vm769_vm0, %v1495_v17, %v766_v38  ;;  %v1969_v9 = vpop.eup %1498  ;;  %vm809_vm4 = vmor %vm807_vm1, %vm808_vm2  ;;  %v880_v22 = vmul.f32 %v879_v12, %v1918_v51  ;;  %v916_v39 = vmul.f32 %v915_v25, %v1937_v26  ;;  %v851_v31 = vand.u32 2147483647, %v1946_v42 }
 0x1e3   : > { %v775_v60 = vsel %vm772_vm15, %v774_v53, %v770_v50  ;;  %v804_v63 = vsub.f32 1.0, %v803_v54  ;;  %v843_v19 = vmul.f32 %v1969_v9, %v1946_v42  ;;  %v868_v33 = vadd.f32 0.18741608, %v867_v11 }
 0x1e4   : > { %v776_v5 = vmul.f32 %v775_v60, %v751_v46  ;;  %v1982_v6 = vadd.f32 1.0, %v880_v22  ;;  %v917_v35 = vadd.f32 0.112945676, %v916_v39  ;;  %v1986_v36 = vmul.f32 0.70710677, %v1974_v20 }
 0x1e5   : > { %v805_v7 = vmul.f32 %v1497_v37, %v804_v63  ;;  %v844_v28 = vsub.f32 1.0, %v843_v19  ;;  %vm848_vm5 = vweird.f32 %v1969_v9  ;;  %v853_v24 = vand.u32 2147483648, %v1946_v42 }
 0x1e6   : > { %v1378_v27 = vclamps-f32 %v776_v5, 1.0  ;;  %1500 = vrcp.f32 %v1982_v6  ;;  %v1991_v44 = vadd.f32 %v682_v43, %v664_v18  ;;  %v918_v47 = vmul.f32 %v917_v35, %v1937_v26 }
 0x1e7   : > { %v806_v17 = vadd.f32 %v1497_v37, %v805_v7  ;;  %v845_v15 = vmul.f32 %v1969_v9, %v844_v28  ;;  %v831_v53 = vmul.f32 %v830_v10, %v1882_v2  ;;  %vm847_vm6 = vweird.f32 %v1946_v42 }
 0x1e8   : > { %v1059_v46 = vadd.f32 1.0, %v1378_v27  ;;  %vm1997_vm7 = vcmp.eq.f32.partialorder %v851_v31, 8.507059e+37  ;;  %v939_v48 = vmul.f32 %v1986_v36, %v1986_v36  ;;  %vm2006_vm8 = vmor %vm847_vm6, %vm848_vm5  ;;  %v905_v2 = vmul.f32 %v904_v29, %v1937_v26 }
 0x1e9   : > { %v810_v40 = vsel %vm809_vm4, %v1497_v37, %v806_v17  ;;  %v846_v38 = vadd.f32 %v1969_v9, %v845_v15  ;;  %v919_v42 = vadd.f32 0.4994258, %v918_v47  ;;  %v2018_v60 = vmul.f32 0.70710677, %v1991_v44 }
 0x1ea   : > { %v815_v30 = vsel %vm812_vm3, %v814_v21, %v810_v40  ;;  %v2015_v59 = vmin.f32 %v939_v48, 16.0  ;;  %v702_v63 = vadd.f32 %v701_v52, %v1859_v49  ;;  %v1067_v0 = vmul.f32 %v1059_v46, %v1951_v45 }
 0x1eb   : > { %v816_v34 = vmul.f32 %v815_v30, %v791_v56  ;;  %v869_v56 = vmul.f32 %v868_v33, %v1918_v51  ;;  %v850_v57 = vsel %vm2006_vm8, %v1969_v9, %v846_v38  ;;  %v854_v3 = vor.u32 1.1754944e-38, %v853_v24 }
 0x1ec   : > { %v920_v51 = vmul.f32 %v919_v42, %v1937_v26  ;;  %v1501_v13 = vpop.eup %1500  ;;  %v941_v5 = vmul.f32 2.1237322e-06, %v2015_v59  ;;  %v952_v7 = vmul.f32 3.8918573e-05, %v2015_v59  ;;  %v979_v62 = vmul.f32 %v2018_v60, %v2018_v60 }
 0x1ed   : > { %v1379_v37 = vclamps-f32 %v816_v34, 1.0  ;;  %v2028_v8 = vadd.f32 %v720_v4, %v702_v63  ;;  %v855_v49 = vsel %vm1997_vm7, %v854_v3, %v850_v57  ;;  %v870_v45 = vadd.f32 1.1283791, %v869_v56 }
 0x1ee   : > { %v2033_v10 = vadd.f32 1.0, %v920_v51  ;;  %v942_v11 = vadd.f32 0.00028619796, %v941_v5  ;;  %v953_v12 = vadd.f32 0.001143296, %v952_v7  ;;  %v2035_v25 = vmin.f32 %v979_v62, 16.0 }
 0x1ef   : > { %v1060_v58 = vadd.f32 1.0, %v1379_v37  ;;  %v2041_v17 = vmul.f32 0.70710677, %v2028_v8  ;;  %v856_v19 = vmul.f32 %v855_v49, %v831_v53  ;;  %v891_v21 = vand.u32 2147483647, %v1982_v6 }
 0x1f0   : > { %v893_v22 = vand.u32 2147483648, %v1982_v6  ;;  %1502 = vrcp.f32 %v2033_v10  ;;  %vm888_vm9 = vweird.f32 %v1501_v13  ;;  %v943_v18 = vmul.f32 %v942_v11, %v2015_v59 }
 0x1f1   : > { %v1068_v1 = vmul.f32 %v1060_v58, %v1955_v23  ;;  %v883_v23 = vmul.f32 %v1501_v13, %v1982_v6  ;;  %v954_v27 = vmul.f32 %v953_v12, %v2015_v59  ;;  %v871_v40 = vmul.f32 %v870_v45, %v1906_v32 }
 0x1f2   : > { %vm887_vm10 = vweird.f32 %v1982_v6  ;;  %v906_v28 = vadd.f32 0.05243302, %v905_v2  ;;  %v992_v29 = vmul.f32 3.8918573e-05, %v2035_v25  ;;  %v981_v33 = vmul.f32 2.1237322e-06, %v2035_v25 }
 0x1f3   : > { %v1075_v9 = vpack.c.bf16 %v1068_v1, %v1067_v0  ;;  %v884_v14 = vsub.f32 1.0, %v883_v23  ;;  %v955_v31 = vadd.f32 0.014752088, %v954_v27  ;;  %v1019_v34 = vmul.f32 %v2041_v17, %v2041_v17  ;;  %vm889_vm11 = vmor %vm887_vm10, %vm888_vm9 }
 0x1f4   : > { %vm892_vm12 = vcmp.eq.f32.partialorder %v891_v21, 8.507059e+37  ;;  %v894_v15 = vor.u32 1.1754944e-38, %v893_v22  ;;  %v944_v35 = vadd.f32 0.0036580483, %v943_v18  ;;  %v993_v43 = vadd.f32 0.001143296, %v992_v29 }
 0x1f5   : > { %1079 = vst [vmem:[%s2037_s26] sm:$0xff] %v1075_v9  ;;  %v885_v39 = vmul.f32 %v1501_v13, %v884_v14  ;;  %v1380_v24 = vclamps-f32 %v856_v19, 1.0  ;;  %v956_v32 = vmul.f32 %v955_v31, %v2015_v59  ;;  %v2055_v6 = vmin.f32 %v1019_v34, 16.0 }
 0x1f6   : > { %v2057_v37 = vpop.eup %1502  ;;  %v994_v47 = vmul.f32 %v993_v43, %v2035_v25  ;;  %v982_v54 = vadd.f32 0.00028619796, %v981_v33  ;;  %v945_v48 = vmul.f32 %v944_v35, %v2015_v59  ;;  %v907_v42 = vmul.f32 %v906_v28, %v1937_v26 }
 0x1f7   : > { %v886_v30 = vadd.f32 %v1501_v13, %v885_v39  ;;  %v923_v53 = vmul.f32 %v2057_v37, %v2033_v10  ;;  %v957_v58 = vadd.f32 0.112945676, %v956_v32  ;;  %v1061_v56 = vadd.f32 1.0, %v1380_v24 }
 0x1f8   : > { %v995_v50 = vadd.f32 0.014752088, %v994_v47  ;;  %v1021_v57 = vmul.f32 2.1237322e-06, %v2055_v6  ;;  %v1032_v3 = vmul.f32 3.8918573e-05, %v2055_v6  ;;  %v983_v5 = vmul.f32 %v982_v54, %v2035_v25 }
 0x1f9   : > { %v890_v46 = vsel %vm889_vm11, %v1501_v13, %v886_v30  ;;  %v924_v63 = vsub.f32 1.0, %v923_v53  ;;  %v958_v0 = vmul.f32 %v957_v58, %v2015_v59  ;;  %v725_v51 = vmul.f32 0.5, %v1874_v61 }
 0x1fa   : > { %v895_v38 = vsel %vm892_vm12, %v894_v15, %v890_v46  ;;  %v996_v1 = vmul.f32 %v995_v50, %v2035_v25  ;;  %v726_v4 = vmul.f32 0.5, %v1897_v16  ;;  %v946_v7 = vadd.f32 0.05243302, %v945_v48 }
 0x1fb   : > { %v896_v52 = vmul.f32 %v895_v38, %v871_v40  ;;  %v959_v62 = vadd.f32 0.4994258, %v958_v0  ;;  %v1069_v49 = vmul.f32 %v1061_v56, %v725_v51  ;;  %v908_v23 = vadd.f32 0.18741608, %v907_v42 }
 0x1fc   : > { %v997_v9 = vadd.f32 0.112945676, %v996_v1  ;;  %v1022_v11 = vadd.f32 0.00028619796, %v1021_v57  ;;  %v925_v12 = vmul.f32 %v2057_v37, %v924_v63  ;;  %v1033_v61 = vadd.f32 0.001143296, %v1032_v3 }
 0x1fd   : > { %v1381_v2 = vclamps-f32 %v896_v52, 1.0  ;;  %v960_v14 = vmul.f32 %v959_v62, %v2015_v59  ;;  %v984_v16 = vadd.f32 0.0036580483, %v983_v5  ;;  %v947_v22 = vmul.f32 %v946_v7, %v2015_v59 }
 0x1fe   : > { %v998_v19 = vmul.f32 %v997_v9, %v2035_v25  ;;  %v1023_v27 = vmul.f32 %v1022_v11, %v2055_v6  ;;  %v1034_v40 = vmul.f32 %v1033_v61, %v2055_v6  ;;  %v909_v28 = vmul.f32 %v908_v23, %v1937_v26 }
 0x1ff   : > { %v1062_v13 = vadd.f32 1.0, %v1381_v2  ;;  %v961_v39 = vadd.f32 1.0, %v960_v14  ;;  %v926_v29 = vadd.f32 %v2057_v37, %v925_v12  ;;  %vm928_vm13 = vweird.f32 %v2057_v37 }
 0x200   : > { %v999_v18 = vadd.f32 0.4994258, %v998_v19  ;;  %v933_v30 = vand.u32 2147483648, %v2033_v10  ;;  %v985_v31 = vmul.f32 %v984_v16, %v2035_v25  ;;  %vm927_vm14 = vweird.f32 %v2033_v10 }
 0x201   : > { %v1070_v45 = vmul.f32 %v1062_v13, %v726_v4  ;;  %1504 = vrcp.f32 %v961_v39  ;;  %v931_v34 = vand.u32 2147483647, %v2033_v10  ;;  %v948_v15 = vadd.f32 0.18741608, %v947_v22  ;;  %vm929_vm15 = vmor %vm927_vm14, %vm928_vm13 }
 0x202   : > { %v1000_v33 = vmul.f32 %v999_v18, %v2035_v25  ;;  %v1035_v35 = vadd.f32 0.014752088, %v1034_v40  ;;  %v1024_v26 = vadd.f32 0.0036580483, %v1023_v27  ;;  %v910_v24 = vadd.f32 1.1283791, %v909_v28 }
 0x203   : > { %v1076_v21 = vpack.c.bf16 %v1070_v45, %v1069_v49  ;;  %v930_v46 = vsel %vm929_vm15, %v2057_v37, %v926_v29  ;;  %v934_v38 = vor.u32 1.1754944e-38, %v933_v30  ;;  %v986_v47 = vadd.f32 0.05243302, %v985_v31 }
 0x204   : > { %v2086_v43 = vadd.f32 1.0, %v1000_v33  ;;  %v1036_v32 = vmul.f32 %v1035_v35, %v2055_v6  ;;  %vm932_vm0 = vcmp.eq.f32.partialorder %v931_v34, 8.507059e+37  ;;  %v949_v53 = vmul.f32 %v948_v15, %v2015_v59 }
 0x205   : > { %1080 = vst [vmem:[%s2037_s26 + $0x8] sm:$0xff] %v1076_v21  ;;  %v935_v10 = vsel %vm932_vm0, %v934_v38, %v930_v46  ;;  %v1025_v48 = vmul.f32 %v1024_v26, %v2055_v6  ;;  %v911_v50 = vmul.f32 %v910_v24, %v1922_v55  ;;  %v987_v37 = vmul.f32 %v986_v47, %v2035_v25 }
 0x206   : > { %1506 = vrcp.f32 %v2086_v43  ;;  %v1037_v58 = vadd.f32 0.112945676, %v1036_v32  ;;  %v950_v57 = vadd.f32 1.1283791, %v949_v53  ;;  %v971_v63 = vand.u32 2147483647, %v961_v39 }
 0x207   : > { %v1505_v52 = vpop.eup %1504  ;;  %v936_v42 = vmul.f32 %v935_v10, %v911_v50  ;;  %v973_v0 = vand.u32 2147483648, %v961_v39  ;;  %v1026_v59 = vadd.f32 0.05243302, %v1025_v48  ;;  %vm967_vm2 = vweird.f32 %v961_v39 }
 0x208   : > { %v963_v54 = vmul.f32 %v1505_v52, %v961_v39  ;;  %v1038_v2 = vmul.f32 %v1037_v58, %v2055_v6  ;;  %vm968_vm1 = vweird.f32 %v1505_v52  ;;  %v988_v5 = vadd.f32 0.18741608, %v987_v37 }
 0x209   : > { %v1382_v7 = vclamps-f32 %v936_v42, 1.0  ;;  %v951_v62 = vmul.f32 %v950_v57, %v1986_v36  ;;  %vm969_vm3 = vmor %vm967_vm2, %vm968_vm1  ;;  %v974_v9 = vor.u32 1.1754944e-38, %v973_v0  ;;  %vm972_vm4 = vcmp.eq.f32.partialorder %v971_v63, 8.507059e+37 }
 0x20a   : > { %v964_v56 = vsub.f32 1.0, %v963_v54  ;;  %v1039_v51 = vadd.f32 0.4994258, %v1038_v2  ;;  %v1027_v23 = vmul.f32 %v1026_v59, %v2055_v6  ;;  %v989_v61 = vmul.f32 %v988_v5, %v2035_v25 }
 0x20b   : > { %v1063_v16 = vadd.f32 1.0, %v1382_v7  ;;  %v1013_v36 = vand.u32 2147483648, %v2086_v43  ;;  %vm1007_vm6 = vweird.f32 %v2086_v43  ;;  %v1011_v18 = vand.u32 2147483647, %v2086_v43 }
 0x20c   : > { %v1507_v1 = vpop.eup %1506  ;;  %v965_v3 = vmul.f32 %v1505_v52, %v964_v56  ;;  %v1040_v55 = vmul.f32 %v1039_v51, %v2055_v6  ;;  %v1028_v39 = vadd.f32 0.18741608, %v1027_v23  ;;  %v727_v27 = vmul.f32 0.5, %v1909_v41  ;;  %v1132_v0 = vld [vmem:[%s2037_s26 + $0x8] sm:$0xff] (%p1676_p9) }
 0x20d   : > { %v1003_v4 = vmul.f32 %v1507_v1, %v2086_v43  ;;  %vm1008_vm5 = vweird.f32 %v1507_v1  ;;  %v728_v40 = vmul.f32 0.5, %v1974_v20  ;;  %v990_v29 = vadd.f32 1.1283791, %v989_v61  ;;  %1133 = vst [vmem:[%s1095_s24 + $0x20] sm:$0xff] (%p1676_p9), %v1132_v0 }
 0x20e   : > { %v966_v13 = vadd.f32 %v1505_v52, %v965_v3  ;;  %v1041_v11 = vadd.f32 1.0, %v1040_v55  ;;  %vm1009_vm7 = vmor %vm1007_vm6, %vm1008_vm5  ;;  %v1071_v31 = vmul.f32 %v1063_v16, %v727_v27  ;;  %v1014_v34 = vor.u32 1.1754944e-38, %v1013_v36 }
 0x20f   : > { %v1004_v49 = vsub.f32 1.0, %v1003_v4  ;;  %v1029_v15 = vmul.f32 %v1028_v39, %v2055_v6  ;;  %vm1012_vm8 = vcmp.eq.f32.partialorder %v1011_v18, 8.507059e+37  ;;  %v991_v43 = vmul.f32 %v990_v29, %v2018_v60 }
 0x210   : > { %v970_v45 = vsel %vm969_vm3, %v1505_v52, %v966_v13  ;;  %1508 = vrcp.f32 %v1041_v11  ;;  %v1053_v46 = vand.u32 2147483648, %v1041_v11  ;;  %v1051_v47 = vand.u32 2147483647, %v1041_v11 }
 0x211   : > { %v975_v12 = vsel %vm972_vm4, %v974_v9, %v970_v45  ;;  %v1005_v14 = vmul.f32 %v1507_v1, %v1004_v49  ;;  %v1030_v20 = vadd.f32 1.1283791, %v1029_v15  ;;  %vm1047_vm10 = vweird.f32 %v1041_v11 }
 0x212   : > { %v976_v19 = vmul.f32 %v975_v12, %v951_v62  ;;  %v1054_v53 = vor.u32 1.1754944e-38, %v1053_v46  ;;  %vm1052_vm12 = vcmp.eq.f32.partialorder %v1051_v47, 8.507059e+37  ;;  %v729_v56 = vmul.f32 0.5, %v1991_v44 }
 0x213   : > { %v1006_v21 = vadd.f32 %v1507_v1, %v1005_v14  ;;  %v1031_v10 = vmul.f32 %v1030_v20, %v2041_v17  ;;  %v730_v37 = vmul.f32 0.5, %v2028_v8  ;;  %v1130_v17 = vld [vmem:[%s2037_s26] sm:$0xff] (%p1676_p9) }
 0x214   : > { %v1383_v22 = vclamps-f32 %v976_v19, 1.0  ;;  %1131 = vst [vmem:[%s1095_s24] sm:$0xff] (%p1676_p9), %v1130_v17 }
 0x215   : > { %v1010_v25 = vsel %vm1009_vm7, %v1507_v1, %v1006_v21 }
 0x216   : > { %v1064_v28 = vadd.f32 1.0, %v1383_v22  ;;  %v1509_v30 = vpop.eup %1508  ;;  %v1015_v24 = vsel %vm1012_vm8, %v1014_v34, %v1010_v25 }
 0x217   : > { %v1043_v35 = vmul.f32 %v1509_v30, %v1041_v11  ;;  %v1016_v32 = vmul.f32 %v1015_v24, %v991_v43  ;;  %vm1048_vm9 = vweird.f32 %v1509_v30 }
 0x218   : > { %v1072_v33 = vmul.f32 %v1064_v28, %v728_v40  ;;  %vm1049_vm11 = vmor %vm1047_vm10, %vm1048_vm9 }
 0x219   : > { %v1044_v41 = vsub.f32 1.0, %v1043_v35  ;;  %v1384_v6 = vclamps-f32 %v1016_v32, 1.0 }
 0x21a   : > { %v1077_v26 = vpack.c.bf16 %v1072_v33, %v1071_v31 }
 0x21b   : > { %v1045_v38 = vmul.f32 %v1509_v30, %v1044_v41  ;;  %v1065_v58 = vadd.f32 1.0, %v1384_v6 }
 0x21c   : > { %1081 = vst [vmem:[%s2037_s26 + $0x10] sm:$0xff] %v1077_v26 }
 0x21d   : > { %v1046_v52 = vadd.f32 %v1509_v30, %v1045_v38  ;;  %v1073_v42 = vmul.f32 %v1065_v58, %v729_v56 }
 0x21f   : > { %v1050_v54 = vsel %vm1049_vm11, %v1509_v30, %v1046_v52 }
 0x220   : > { %v1055_v48 = vsel %vm1052_vm12, %v1054_v53, %v1050_v54 }
 0x221   : > { %v1056_v60 = vmul.f32 %v1055_v48, %v1031_v10 }
 0x223   : > { %v1385_v50 = vclamps-f32 %v1056_v60, 1.0  ;;  %v1134_v44 = vld [vmem:[%s2037_s26 + $0x10] sm:$0xff] (%p1676_p9) }
 0x224   : > { %1135 = vst [vmem:[%s1095_s24 + $0x40] sm:$0xff] (%p1676_p9), %v1134_v44 }
 0x225   : > { %v1066_v2 = vadd.f32 1.0, %v1385_v50 }
 0x227   : > { %v1074_v57 = vmul.f32 %v1066_v2, %v730_v37  ;;  %1089 = sbr.rel (!%p1676_p9) target bundleno = 564 (0x234), region = 48 }
 0x229   : > { %v1078_v63 = vpack.c.bf16 %v1074_v57, %v1073_v42 }
 0x22b   : > { %1082 = vst [vmem:[%s2037_s26 + $0x18] sm:$0xff] %v1078_v63 }
 0x232   : > { %v1136_v8 = vld [vmem:[%s2037_s26 + $0x18] sm:$0xff] }
 0x233   : > { %1137 = vst [vmem:[%s1095_s24 + $0x60] sm:$0xff] %v1136_v8 }
 0x234 PF: > { %s18_s23 = sadd.s32 1, %s1590_s23   ;;  %s2154_s18 = smov %s1574_s19 }
 0x235   : > { %p15_p2 = scmp.ge.s32.totalorder %s18_s23, 6   ;;  %s2155_s19 = smov %s1578_s20 }
 0x236   : > { %s2156_s20 = smov %s1674_s30  ;;  %s2157_s21 = smov %s1586_s22 }
 0x237   : > { %s2158_s22 = smov %s2160_s25  ;;  %17 = sbr.rel (!%p15_p2) target bundleno = 4 (0x4), region = 124 }
 0x23c   :  { %1153 = vsyncpa [#allocation3], 1 }
 0x23d   :  { %1155 = vsyncpa [#allocation3 + $0x1], 1 }

// kernel: residual_attention_block.9
= control target key start
LH: loop header
LB: loop body
LE: loop exit
PB: predicated region body
PF: predicated region fallthrough
CT: control target
= control target key end

     0   :  { %9 = vsyncpa [#allocation3], 0  ;;  %s2257_s0 = inlined_call_operand.vmem [shape: bf16[32,1024], index: 0, kind: input, shape index: {}]   ;;  %s2258_s1 = inlined_call_operand.hbm [shape: bf16[1024,256], index: 1, kind: input, shape index: {}]   ;;  %s2259_s2 = inlined_call_operand.vmem [shape: f32[1,256], index: 2, kind: input, shape index: {}]   ;;  %s2260_s3 = inlined_call_operand.vmem [shape: f32[32,256], index: 3, kind: input, shape index: {}]   ;;  %s2261_s4 = inlined_call_operand.hbm [shape: f32[32,256], index: 4, kind: output, shape index: {}]  }
   0x1   :  { %10 = vsyncpa [#allocation4], 0  ;;  %s17_s17 = sshll.u32 %s2258_s1, 4  ;;  %s2029_s18 = smov [#allocation2]   ;;  %s18_s17 = int_to_ptr.hbm [resolvable:$true] %s17_s17 }
   0x2   :  { %s19_s19 = sshll.u32 %s2029_s18, 4  ;;  %s2030_s20 = smov 128   ;;  %s20_s19 = int_to_ptr.vmem [resolvable:$true] %s19_s19 }
   0x3   :  { %s2031_s21 = smov 8  }
   0x4   :  { %25 = dma.hbm_to_vmem [thread:$0]  %s18_s17, 16384, %s20_s19, [#allocation3], %s2030_s20, %s2030_s20, %s2031_s21  }
   0x5   :  { %2025 = dma.done.wait [#allocation3], 16384  }
   0x6   :  { %2026 = vsyncadd [#allocation3], 4294950912  ;;  %v1373_v0 = vld [vmem:[#allocation2 + $0x70] sm:$0xf]  ;;  %v1858_v1 = vld [vmem:[#allocation2 + $0x74] sm:$0xf0] }
   0x7   :  { %v1437_v2 = vld [vmem:[#allocation2 + $0xf0] sm:$0xf]  ;;  %v1374_v3 = vor.u32 %v1858_v1, %v1373_v0  ;;  %v1874_v4 = vld [vmem:[#allocation2 + $0xf4] sm:$0xf0]  ;;  %v1365_v11 = vld [vmem:[#allocation2 + $0x60] sm:$0xf] }
   0x8   :  { %v1501_v5 = vld [vmem:[#allocation2 + $0x170] sm:$0xf]  ;;  %v1890_v6 = vld [vmem:[#allocation2 + $0x174] sm:$0xf0]  ;;  %v1438_v7 = vor.u32 %v1874_v4, %v1437_v2  ;;  %v1856_v13 = vld [vmem:[#allocation2 + $0x64] sm:$0xf0] }
   0x9   :  { %v1502_v8 = vor.u32 %v1890_v6, %v1501_v5  ;;  %v1565_v9 = vld [vmem:[#allocation2 + $0x1f0] sm:$0xf]  ;;  %v1906_v10 = vld [vmem:[#allocation2 + $0x1f4] sm:$0xf0]  ;;  %904 = vmatpush.bf16.msra.mxu0 %v1374_v3  ;;  %v1429_v14 = vld [vmem:[#allocation2 + $0xe0] sm:$0xf]  ;;  %v1366_v16 = vor.u32 %v1856_v13, %v1365_v11 }
   0xa   :  { %v1566_v12 = vor.u32 %v1906_v10, %v1565_v9  ;;  %v1872_v15 = vld [vmem:[#allocation2 + $0xe4] sm:$0xf0]  ;;  %923 = vmatpush.bf16.msra.mxu1 %v1438_v7  ;;  %v1493_v18 = vld [vmem:[#allocation2 + $0x160] sm:$0xf]  ;;  %v1357_v23 = vld [vmem:[#allocation2 + $0x50] sm:$0xf] }
   0xb   :  { %942 = vmatpush.bf16.msra.mxu2 %v1502_v8  ;;  %v1430_v17 = vor.u32 %v1872_v15, %v1429_v14  ;;  %v1888_v19 = vld [vmem:[#allocation2 + $0x164] sm:$0xf0]  ;;  %v1557_v20 = vld [vmem:[#allocation2 + $0x1e0] sm:$0xf]  ;;  %v1854_v24 = vld [vmem:[#allocation2 + $0x54] sm:$0xf0] }
   0xc   :  { %961 = vmatpush.bf16.msra.mxu3 %v1566_v12  ;;  %v1494_v21 = vor.u32 %v1888_v19, %v1493_v18  ;;  %v1904_v22 = vld [vmem:[#allocation2 + $0x1e4] sm:$0xf0]  ;;  %v1421_v26 = vld [vmem:[#allocation2 + $0xd0] sm:$0xf]  ;;  %v1870_v27 = vld [vmem:[#allocation2 + $0xd4] sm:$0xf0]  ;;  %v1358_v29 = vor.u32 %v1854_v24, %v1357_v23 }
   0xd   :  { %v1558_v25 = vor.u32 %v1904_v22, %v1557_v20  ;;  %v1485_v28 = vld [vmem:[#allocation2 + $0x150] sm:$0xf]  ;;  %905 = vmatpush.bf16.msra.mxu0 %v1366_v16  ;;  %v1886_v30 = vld [vmem:[#allocation2 + $0x154] sm:$0xf0]  ;;  %v1422_v33 = vor.u32 %v1870_v27, %v1421_v26  ;;  %v1349_v35 = vld [vmem:[#allocation2 + $0x40] sm:$0xf] }
   0xe   :  { %v1549_v31 = vld [vmem:[#allocation2 + $0x1d0] sm:$0xf]  ;;  %v1902_v32 = vld [vmem:[#allocation2 + $0x1d4] sm:$0xf0]  ;;  %924 = vmatpush.bf16.msra.mxu1 %v1430_v17  ;;  %v1486_v34 = vor.u32 %v1886_v30, %v1485_v28  ;;  %v1852_v36 = vld [vmem:[#allocation2 + $0x44] sm:$0xf0] }
   0xf   :  { %943 = vmatpush.bf16.msra.mxu2 %v1494_v21  ;;  %v1413_v37 = vld [vmem:[#allocation2 + $0xc0] sm:$0xf]  ;;  %v1550_v38 = vor.u32 %v1902_v32, %v1549_v31  ;;  %v1868_v39 = vld [vmem:[#allocation2 + $0xc4] sm:$0xf0]  ;;  %v1350_v44 = vor.u32 %v1852_v36, %v1349_v35  ;;  %v1341_v47 = vld [vmem:[#allocation2 + $0x30] sm:$0xf] }
  0x10   :  { %962 = vmatpush.bf16.msra.mxu3 %v1558_v25  ;;  %v1477_v40 = vld [vmem:[#allocation2 + $0x140] sm:$0xf]  ;;  %v1884_v41 = vld [vmem:[#allocation2 + $0x144] sm:$0xf0]  ;;  %v1414_v45 = vor.u32 %v1868_v39, %v1413_v37  ;;  %v1850_v48 = vld [vmem:[#allocation2 + $0x34] sm:$0xf0] }
  0x11   :  { %v1541_v42 = vld [vmem:[#allocation2 + $0x1c0] sm:$0xf]  ;;  %v1900_v43 = vld [vmem:[#allocation2 + $0x1c4] sm:$0xf0]  ;;  %906 = vmatpush.bf16.msra.mxu0 %v1358_v29  ;;  %v1478_v46 = vor.u32 %v1884_v41, %v1477_v40  ;;  %v1405_v49 = vld [vmem:[#allocation2 + $0xb0] sm:$0xf]  ;;  %v1342_v56 = vor.u32 %v1850_v48, %v1341_v47 }
  0x12   :  { %925 = vmatpush.bf16.msra.mxu1 %v1422_v33  ;;  %v1542_v50 = vor.u32 %v1900_v43, %v1541_v42  ;;  %v1866_v51 = vld [vmem:[#allocation2 + $0xb4] sm:$0xf0]  ;;  %v1469_v52 = vld [vmem:[#allocation2 + $0x130] sm:$0xf]  ;;  %v1333_v59 = vld [vmem:[#allocation2 + $0x20] sm:$0xf] }
  0x13   :  { %944 = vmatpush.bf16.msra.mxu2 %v1486_v34  ;;  %v1882_v53 = vld [vmem:[#allocation2 + $0x134] sm:$0xf0]  ;;  %v1533_v54 = vld [vmem:[#allocation2 + $0x1b0] sm:$0xf]  ;;  %v1406_v57 = vor.u32 %v1866_v51, %v1405_v49  ;;  %v1848_v60 = vld [vmem:[#allocation2 + $0x24] sm:$0xf0] }
  0x14   :  { %963 = vmatpush.bf16.msra.mxu3 %v1550_v38  ;;  %v1898_v55 = vld [vmem:[#allocation2 + $0x1b4] sm:$0xf0]  ;;  %v1470_v58 = vor.u32 %v1882_v53, %v1469_v52  ;;  %v1397_v61 = vld [vmem:[#allocation2 + $0xa0] sm:$0xf]  ;;  %v1864_v63 = vld [vmem:[#allocation2 + $0xa4] sm:$0xf0]  ;;  %v1334_v4 = vor.u32 %v1848_v60, %v1333_v59 }
  0x15   :  { %907 = vmatpush.bf16.msra.mxu0 %v1350_v44  ;;  %v1534_v62 = vor.u32 %v1898_v55, %v1533_v54  ;;  %v1461_v0 = vld [vmem:[#allocation2 + $0x120] sm:$0xf]  ;;  %v1880_v1 = vld [vmem:[#allocation2 + $0x124] sm:$0xf0]  ;;  %v1398_v5 = vor.u32 %v1864_v63, %v1397_v61  ;;  %v1325_v7 = vld [vmem:[#allocation2 + $0x10] sm:$0xf] }
  0x16   :  { %926 = vmatpush.bf16.msra.mxu1 %v1414_v45  ;;  %v1525_v2 = vld [vmem:[#allocation2 + $0x1a0] sm:$0xf]  ;;  %v1896_v3 = vld [vmem:[#allocation2 + $0x1a4] sm:$0xf0]  ;;  %v1462_v6 = vor.u32 %v1880_v1, %v1461_v0  ;;  %v1846_v8 = vld [vmem:[#allocation2 + $0x14] sm:$0xf0] }
  0x17   :  { %945 = vmatpush.bf16.msra.mxu2 %v1478_v46  ;;  %v1389_v9 = vld [vmem:[#allocation2 + $0x90] sm:$0xf]  ;;  %v1526_v10 = vor.u32 %v1896_v3, %v1525_v2  ;;  %v1862_v11 = vld [vmem:[#allocation2 + $0x94] sm:$0xf0]  ;;  %v1317_v16 = vld [vmem:[#allocation2] sm:$0xf]  ;;  %v1326_v17 = vor.u32 %v1846_v8, %v1325_v7 }
  0x18   :  { %964 = vmatpush.bf16.msra.mxu3 %v1542_v50  ;;  %v1453_v12 = vld [vmem:[#allocation2 + $0x110] sm:$0xf]  ;;  %v1878_v13 = vld [vmem:[#allocation2 + $0x114] sm:$0xf0]  ;;  %v1844_v18 = vld [vmem:[#allocation2 + $0x4] sm:$0xf0]  ;;  %v1390_v21 = vor.u32 %v1862_v11, %v1389_v9 }
  0x19   :  { %908 = vmatpush.bf16.msra.mxu0 %v1342_v56  ;;  %v1517_v14 = vld [vmem:[#allocation2 + $0x190] sm:$0xf]  ;;  %v1894_v15 = vld [vmem:[#allocation2 + $0x194] sm:$0xf0]  ;;  %v1381_v19 = vld [vmem:[#allocation2 + $0x80] sm:$0xf]  ;;  %v1454_v22 = vor.u32 %v1878_v13, %v1453_v12  ;;  %v1318_v34 = vor.u32 %v1844_v18, %v1317_v16 }
  0x1a   :  { %927 = vmatpush.bf16.msra.mxu1 %v1406_v57  ;;  %v1860_v20 = vld [vmem:[#allocation2 + $0x84] sm:$0xf0]  ;;  %v1445_v23 = vld [vmem:[#allocation2 + $0x100] sm:$0xf]  ;;  %v1518_v26 = vor.u32 %v1894_v15, %v1517_v14  ;;  %v1827_v30 = vld [vmem:[%s2257_s0 + $0x4] sm:$0xf] }
  0x1b   :  { %946 = vmatpush.bf16.msra.mxu2 %v1470_v58  ;;  %v1876_v24 = vld [vmem:[#allocation2 + $0x104] sm:$0xf0]  ;;  %v1509_v25 = vld [vmem:[#allocation2 + $0x180] sm:$0xf]  ;;  %v1255_v31 = vld [vmem:[%s2257_s0 + $0x20] sm:$0xf0]  ;;  %v1382_v38 = vor.u32 %v1860_v20, %v1381_v19 }
  0x1c   :  { %965 = vmatpush.bf16.msra.mxu3 %v1534_v62  ;;  %v1892_v27 = vld [vmem:[#allocation2 + $0x184] sm:$0xf0]  ;;  %v1253_v28 = vld [vmem:[%s2257_s0] sm:$0xf]  ;;  %v1757_v32 = vld [vmem:[#allocation2 + $0x370] sm:$0xf]  ;;  %v1446_v39 = vor.u32 %v1876_v24, %v1445_v23  ;;  %v2089_v53 = vor.u32 %v1827_v30, %v1255_v31 }
  0x1d   :  { %909 = vmatpush.bf16.msra.mxu0 %v1334_v4  ;;  %v1831_v29 = vld [vmem:[%s2257_s0 + $0x1c] sm:$0xf0]  ;;  %v1954_v33 = vld [vmem:[#allocation2 + $0x374] sm:$0xf0]  ;;  %v1261_v35 = vld [vmem:[%s2257_s0 + $0x8] sm:$0xf]  ;;  %v1510_v43 = vor.u32 %v1892_v27, %v1509_v25 }
  0x1e   :  { %928 = vmatpush.bf16.msra.mxu1 %v1398_v5  ;;  %v1693_v36 = vld [vmem:[#allocation2 + $0x2f0] sm:$0xf]  ;;  %v1938_v37 = vld [vmem:[#allocation2 + $0x2f4] sm:$0xf0]  ;;  %v1832_v40 = vld [vmem:[%s2257_s0 + $0x24] sm:$0xf0]  ;;  %v1758_v44 = vor.u32 %v1954_v33, %v1757_v32  ;;  %v2087_v48 = vor.u32 %v1831_v29, %v1253_v28 }
  0x1f   :  { %947 = vmatpush.bf16.msra.mxu2 %v1462_v6  ;;  %v1828_v41 = vld [vmem:[%s2257_s0 + $0xc] sm:$0xf]  ;;  %v1629_v45 = vld [vmem:[#allocation2 + $0x270] sm:$0xf]  ;;  %v1922_v46 = vld [vmem:[#allocation2 + $0x274] sm:$0xf0]  ;;  %v1694_v49 = vor.u32 %v1938_v37, %v1693_v36  ;;  %v2091_v54 = vor.u32 %v1832_v40, %v1261_v35 }
  0x20   :  { %966 = vmatpush.bf16.msra.mxu3 %v1526_v10  ;;  %v1263_v42 = vld [vmem:[%s2257_s0 + $0x28] sm:$0xf0]  ;;  %v1821_v47 = vld [vmem:[#allocation2 + $0x3f0] sm:$0xf]  ;;  %v1970_v50 = vld [vmem:[#allocation2 + $0x3f4] sm:$0xf0]  ;;  %v1630_v58 = vor.u32 %v1922_v46, %v1629_v45 }
  0x21   :  { %910 = vmatpush.bf16.msra.mxu0 %v1326_v17  ;;  %v1749_v51 = vld [vmem:[#allocation2 + $0x360] sm:$0xf]  ;;  %v1952_v52 = vld [vmem:[#allocation2 + $0x364] sm:$0xf0]  ;;  %v2093_v57 = vor.u32 %v1828_v41, %v1263_v42  ;;  %v1822_v59 = vor.u32 %v1970_v50, %v1821_v47  ;;  %v1741_v2 = vld [vmem:[#allocation2 + $0x350] sm:$0xf] }
  0x22   :  { %929 = vmatpush.bf16.msra.mxu1 %v1390_v21  ;;  %v1685_v55 = vld [vmem:[#allocation2 + $0x2e0] sm:$0xf]  ;;  %v1936_v56 = vld [vmem:[#allocation2 + $0x2e4] sm:$0xf0]  ;;  %v1750_v60 = vor.u32 %v1952_v52, %v1749_v51  ;;  %v1950_v3 = vld [vmem:[#allocation2 + $0x354] sm:$0xf0] }
  0x23   :  { %948 = vmatpush.bf16.msra.mxu2 %v1454_v22  ;;  %v1621_v61 = vld [vmem:[#allocation2 + $0x260] sm:$0xf]  ;;  %v1920_v62 = vld [vmem:[#allocation2 + $0x264] sm:$0xf0]  ;;  %v1686_v0 = vor.u32 %v1936_v56, %v1685_v55  ;;  %v1677_v4 = vld [vmem:[#allocation2 + $0x2d0] sm:$0xf]  ;;  %v1742_v8 = vor.u32 %v1950_v3, %v1741_v2 }
  0x24   :  { %967 = vmatpush.bf16.msra.mxu3 %v1518_v26  ;;  %v1813_v63 = vld [vmem:[#allocation2 + $0x3e0] sm:$0xf]  ;;  %v1968_v1 = vld [vmem:[#allocation2 + $0x3e4] sm:$0xf0]  ;;  %v1934_v5 = vld [vmem:[#allocation2 + $0x2d4] sm:$0xf0]  ;;  %v1622_v6 = vor.u32 %v1920_v62, %v1621_v61 }
  0x25   :  { %911 = vmatpush.bf16.msra.mxu0 %v1318_v34  ;;  %v1814_v7 = vor.u32 %v1968_v1, %v1813_v63  ;;  %v1613_v9 = vld [vmem:[#allocation2 + $0x250] sm:$0xf]  ;;  %v1918_v10 = vld [vmem:[#allocation2 + $0x254] sm:$0xf0]  ;;  %v1678_v12 = vor.u32 %v1934_v5, %v1677_v4  ;;  %v1733_v14 = vld [vmem:[#allocation2 + $0x340] sm:$0xf] }
  0x26   :  { %930 = vmatpush.bf16.msra.mxu1 %v1382_v38  ;;  %v1805_v11 = vld [vmem:[#allocation2 + $0x3d0] sm:$0xf]  ;;  %v1966_v13 = vld [vmem:[#allocation2 + $0x3d4] sm:$0xf0]  ;;  %v1948_v15 = vld [vmem:[#allocation2 + $0x344] sm:$0xf0]  ;;  %v1614_v18 = vor.u32 %v1918_v10, %v1613_v9 }
  0x27   :  { %949 = vmatpush.bf16.msra.mxu2 %v1446_v39  ;;  %v1669_v16 = vld [vmem:[#allocation2 + $0x2c0] sm:$0xf]  ;;  %v1932_v17 = vld [vmem:[#allocation2 + $0x2c4] sm:$0xf0]  ;;  %v1806_v22 = vor.u32 %v1966_v13, %v1805_v11  ;;  %v1734_v23 = vor.u32 %v1948_v15, %v1733_v14  ;;  %v1835_v28 = vld [vmem:[%s2257_s0 + $0x44] sm:$0xf] }
  0x28   :  { %968 = vmatpush.bf16.msra.mxu3 %v1510_v43  ;;  %912 = vmatmul.bf16.vlgmr.msra.gmra.mxu0 %v2087_v48  ;;  %v1605_v19 = vld [vmem:[#allocation2 + $0x240] sm:$0xf]  ;;  %v1916_v20 = vld [vmem:[#allocation2 + $0x244] sm:$0xf0]  ;;  %v1670_v27 = vor.u32 %v1932_v17, %v1669_v16  ;;  %v1287_v29 = vld [vmem:[%s2257_s0 + $0x60] sm:$0xf0] }
  0x29   :  { %931 = vmatmul.bf16.vlgmr.msra.gmra.mxu1 %v2089_v53  ;;  %980 = vmatpush.bf16.msrb.mxu0 %v1630_v58  ;;  %v1797_v21 = vld [vmem:[#allocation2 + $0x3c0] sm:$0xf]  ;;  %v1964_v24 = vld [vmem:[#allocation2 + $0x3c4] sm:$0xf0]  ;;  %v1725_v30 = vld [vmem:[#allocation2 + $0x330] sm:$0xf]  ;;  %v1606_v35 = vor.u32 %v1916_v20, %v1605_v19  ;;  %v2125_v50 = vor.u32 %v1835_v28, %v1287_v29 }
  0x2a   :  { %999 = vmatpush.bf16.msrb.mxu1 %v1694_v49  ;;  %950 = vmatmul.bf16.vlgmr.msra.gmra.mxu2 %v2091_v54  ;;  %v1285_v25 = vld [vmem:[%s2257_s0 + $0x40] sm:$0xf]  ;;  %v1946_v31 = vld [vmem:[#allocation2 + $0x334] sm:$0xf0]  ;;  %v1293_v32 = vld [vmem:[%s2257_s0 + $0x48] sm:$0xf]  ;;  %v1798_v39 = vor.u32 %v1964_v24, %v1797_v21 }
  0x2b   :  { %1018 = vmatpush.bf16.msrb.mxu2 %v1758_v44  ;;  %969 = vmatmul.bf16.vlgmr.msra.gmra.mxu3 %v2093_v57  ;;  %v1839_v26 = vld [vmem:[%s2257_s0 + $0x5c] sm:$0xf0]  ;;  %v1661_v33 = vld [vmem:[#allocation2 + $0x2b0] sm:$0xf]  ;;  %v1930_v34 = vld [vmem:[#allocation2 + $0x2b4] sm:$0xf0]  ;;  %v1726_v40 = vor.u32 %v1946_v31, %v1725_v30 }
  0x2c   :  { %1037 = vmatpush.bf16.msrb.mxu3 %v1822_v59  ;;  %v1840_v36 = vld [vmem:[%s2257_s0 + $0x64] sm:$0xf0]  ;;  %v1836_v37 = vld [vmem:[%s2257_s0 + $0x4c] sm:$0xf]  ;;  %v1597_v41 = vld [vmem:[#allocation2 + $0x230] sm:$0xf]  ;;  %v2123_v44 = vor.u32 %v1839_v26, %v1285_v25  ;;  %v1662_v45 = vor.u32 %v1930_v34, %v1661_v33 }
  0x2d   :  { %981 = vmatpush.bf16.msrb.mxu0 %v1622_v6  ;;  %v1295_v38 = vld [vmem:[%s2257_s0 + $0x68] sm:$0xf0]  ;;  %v1914_v42 = vld [vmem:[#allocation2 + $0x234] sm:$0xf0]  ;;  %v1789_v43 = vld [vmem:[#allocation2 + $0x3b0] sm:$0xf]  ;;  %v2127_v51 = vor.u32 %v1840_v36, %v1293_v32 }
  0x2e   :  { %1000 = vmatpush.bf16.msrb.mxu1 %v1686_v0  ;;  %v1962_v46 = vld [vmem:[#allocation2 + $0x3b4] sm:$0xf0]  ;;  %v1717_v47 = vld [vmem:[#allocation2 + $0x320] sm:$0xf]  ;;  %v1944_v49 = vld [vmem:[#allocation2 + $0x324] sm:$0xf0]  ;;  %v2129_v56 = vor.u32 %v1836_v37, %v1295_v38  ;;  %v1598_v58 = vor.u32 %v1914_v42, %v1597_v41 }
  0x2f   :  { %1019 = vmatpush.bf16.msrb.mxu2 %v1750_v60  ;;  %v1653_v52 = vld [vmem:[#allocation2 + $0x2a0] sm:$0xf]  ;;  %v1928_v55 = vld [vmem:[#allocation2 + $0x2a4] sm:$0xf0]  ;;  %v1790_v59 = vor.u32 %v1962_v46, %v1789_v43  ;;  %v1718_v60 = vor.u32 %v1944_v49, %v1717_v47  ;;  %v1709_v2 = vld [vmem:[#allocation2 + $0x310] sm:$0xf] }
  0x30   :  { %1038 = vmatpush.bf16.msrb.mxu3 %v1814_v7  ;;  %v1589_v61 = vld [vmem:[#allocation2 + $0x220] sm:$0xf]  ;;  %v1912_v62 = vld [vmem:[#allocation2 + $0x224] sm:$0xf0]  ;;  %v1654_v0 = vor.u32 %v1928_v55, %v1653_v52  ;;  %v1942_v3 = vld [vmem:[#allocation2 + $0x314] sm:$0xf0] }
  0x31   :  { %982 = vmatpush.bf16.msrb.mxu0 %v1614_v18  ;;  %v1781_v63 = vld [vmem:[#allocation2 + $0x3a0] sm:$0xf]  ;;  %v1960_v1 = vld [vmem:[#allocation2 + $0x3a4] sm:$0xf0]  ;;  %v1645_v4 = vld [vmem:[#allocation2 + $0x290] sm:$0xf]  ;;  %v1590_v6 = vor.u32 %v1912_v62, %v1589_v61  ;;  %v1710_v9 = vor.u32 %v1942_v3, %v1709_v2 }
  0x32   :  { %1001 = vmatpush.bf16.msrb.mxu1 %v1678_v12  ;;  %v1926_v5 = vld [vmem:[#allocation2 + $0x294] sm:$0xf0]  ;;  %v1581_v7 = vld [vmem:[#allocation2 + $0x210] sm:$0xf]  ;;  %v1701_v14 = vld [vmem:[#allocation2 + $0x300] sm:$0xf] }
  0x33   :  { %1020 = vmatpush.bf16.msrb.mxu2 %v1742_v8  ;;  %v1782_v8 = vor.u32 %v1960_v1, %v1781_v63  ;;  %v1910_v10 = vld [vmem:[#allocation2 + $0x214] sm:$0xf0]  ;;  %v1773_v11 = vld [vmem:[#allocation2 + $0x390] sm:$0xf]  ;;  %v1646_v13 = vor.u32 %v1926_v5, %v1645_v4  ;;  %v1940_v15 = vld [vmem:[#allocation2 + $0x304] sm:$0xf0] }
  0x34   :  { %1039 = vmatpush.bf16.msrb.mxu3 %v1806_v22  ;;  %v1958_v12 = vld [vmem:[#allocation2 + $0x394] sm:$0xf0]  ;;  %v1637_v16 = vld [vmem:[#allocation2 + $0x280] sm:$0xf]  ;;  %v1924_v17 = vld [vmem:[#allocation2 + $0x284] sm:$0xf0]  ;;  %v1582_v20 = vor.u32 %v1910_v10, %v1581_v7  ;;  %v1702_v25 = vor.u32 %v1940_v15, %v1701_v14 }
  0x35   :  { %983 = vmatpush.bf16.msrb.mxu0 %v1606_v35  ;;  %v1889_v18 = vld [vmem:[#allocation2 + $0x174] sm:$0xf]  ;;  %v1503_v19 = vld [vmem:[#allocation2 + $0x178] sm:$0xf0]  ;;  %v1573_v21 = vld [vmem:[#allocation2 + $0x200] sm:$0xf]  ;;  %v1774_v24 = vor.u32 %v1958_v12, %v1773_v11  ;;  %v1638_v29 = vor.u32 %v1924_v17, %v1637_v16 }
  0x36   :  { %1002 = vmatpush.bf16.msrb.mxu1 %v1670_v27  ;;  %v1873_v22 = vld [vmem:[#allocation2 + $0xf4] sm:$0xf]  ;;  %v1908_v26 = vld [vmem:[#allocation2 + $0x204] sm:$0xf0]  ;;  %v1765_v27 = vld [vmem:[#allocation2 + $0x380] sm:$0xf]  ;;  %v1506_v34 = vor.u32 %v1889_v18, %v1503_v19 }
  0x37   :  { %1021 = vmatpush.bf16.msrb.mxu2 %v1734_v23  ;;  %v1439_v23 = vld [vmem:[#allocation2 + $0xf8] sm:$0xf0]  ;;  %v1956_v28 = vld [vmem:[#allocation2 + $0x384] sm:$0xf0]  ;;  %v1269_v30 = vld [vmem:[%s2257_s0 + $0x10] sm:$0xf]  ;;  %v1574_v42 = vor.u32 %v1908_v26, %v1573_v21 }
  0x38   :  { %1040 = vmatpush.bf16.msrb.mxu3 %v1798_v39  ;;  %917 = vmatmul.bf16.gmra.mxu0 %v2123_v44  ;;  %v1833_v31 = vld [vmem:[%s2257_s0 + $0x2c] sm:$0xf0]  ;;  %v1829_v32 = vld [vmem:[%s2257_s0 + $0x14] sm:$0xf]  ;;  %v1375_v36 = vld [vmem:[#allocation2 + $0x78] sm:$0xf0]  ;;  %v1442_v38 = vor.u32 %v1873_v22, %v1439_v23  ;;  %v1766_v47 = vor.u32 %v1956_v28, %v1765_v27 }
  0x39   :  { %936 = vmatmul.bf16.gmra.mxu1 %v2125_v50  ;;  %984 = vmatpush.bf16.msrb.mxu0 %v1598_v58  ;;  %v1271_v33 = vld [vmem:[%s2257_s0 + $0x30] sm:$0xf0]  ;;  %v1567_v39 = vld [vmem:[#allocation2 + $0x1f8] sm:$0xf0]  ;;  %v1495_v41 = vld [vmem:[#allocation2 + $0x168] sm:$0xf0] }
  0x3a   :  { %1003 = vmatpush.bf16.msrb.mxu1 %v1662_v45  ;;  %955 = vmatmul.bf16.gmra.mxu2 %v2127_v51  ;;  %v1857_v35 = vld [vmem:[#allocation2 + $0x74] sm:$0xf]  ;;  %v1277_v43 = vld [vmem:[%s2257_s0 + $0x18] sm:$0xf]  ;;  %v1830_v46 = vld [vmem:[%s2257_s0 + $0x1c] sm:$0xf]  ;;  %v2161_v1 = vor.u32 %v1829_v32, %v1271_v33 }
  0x3b   :  { %1022 = vmatpush.bf16.msrb.mxu2 %v1726_v40  ;;  %974 = vmatmul.bf16.gmra.mxu3 %v2129_v56  ;;  %v1905_v37 = vld [vmem:[#allocation2 + $0x1f4] sm:$0xf]  ;;  %v1887_v40 = vld [vmem:[#allocation2 + $0x164] sm:$0xf]  ;;  %v1834_v45 = vld [vmem:[%s2257_s0 + $0x34] sm:$0xf0]  ;;  %v1378_v52 = vor.u32 %v1857_v35, %v1375_v36 }
  0x3c   :  { %1041 = vmatpush.bf16.msrb.mxu3 %v1790_v59  ;;  %v1279_v49 = vld [vmem:[%s2257_s0 + $0x38] sm:$0xf0]  ;;  %v1855_v55 = vld [vmem:[#allocation2 + $0x64] sm:$0xf]  ;;  %v1367_v58 = vld [vmem:[#allocation2 + $0x68] sm:$0xf0]  ;;  %v1570_v59 = vor.u32 %v1905_v37, %v1567_v39  ;;  %v2163_v5 = vor.u32 %v1834_v45, %v1277_v43 }
  0x3d   :  { %985 = vmatpush.bf16.msrb.mxu0 %v1590_v6  ;;  %v1871_v61 = vld [vmem:[#allocation2 + $0xe4] sm:$0xf]  ;;  %v1431_v62 = vld [vmem:[#allocation2 + $0xe8] sm:$0xf0]  ;;  %v1885_v3 = vld [vmem:[#allocation2 + $0x154] sm:$0xf]  ;;  %v2165_v6 = vor.u32 %v1830_v46, %v1279_v49  ;;  %v1370_v7 = vor.u32 %v1855_v55, %v1367_v58 }
  0x3e   :  { %1004 = vmatpush.bf16.msrb.mxu1 %v1654_v0  ;;  %v1903_v63 = vld [vmem:[#allocation2 + $0x1e4] sm:$0xf]  ;;  %v2159_v0 = vor.u32 %v1833_v31, %v1269_v30  ;;  %v1559_v2 = vld [vmem:[#allocation2 + $0x1e8] sm:$0xf0]  ;;  %v1487_v4 = vld [vmem:[#allocation2 + $0x158] sm:$0xf0] }
  0x3f   :  { %1023 = vmatpush.bf16.msrb.mxu2 %v1718_v60  ;;  %v1498_v60 = vor.u32 %v1887_v40, %v1495_v41  ;;  %v1359_v10 = vld [vmem:[#allocation2 + $0x58] sm:$0xf0]  ;;  %v1562_v11 = vor.u32 %v1903_v63, %v1559_v2  ;;  %v1490_v12 = vor.u32 %v1885_v3, %v1487_v4  ;;  %v1901_v15 = vld [vmem:[#allocation2 + $0x1d4] sm:$0xf]  ;;  %v1883_v17 = vld [vmem:[#allocation2 + $0x144] sm:$0xf] }
  0x40   :  { %1042 = vmatpush.bf16.msrb.mxu3 %v1782_v8  ;;  %v1434_v8 = vor.u32 %v1871_v61, %v1431_v62  ;;  %v1423_v14 = vld [vmem:[#allocation2 + $0xd8] sm:$0xf0]  ;;  %v1479_v18 = vld [vmem:[#allocation2 + $0x148] sm:$0xf0]  ;;  %v1851_v21 = vld [vmem:[#allocation2 + $0x44] sm:$0xf] }
  0x41   :  { %986 = vmatpush.bf16.msrb.mxu0 %v1582_v20  ;;  %v1551_v16 = vld [vmem:[#allocation2 + $0x1d8] sm:$0xf0]  ;;  %v1351_v22 = vld [vmem:[#allocation2 + $0x48] sm:$0xf0]  ;;  %v1899_v27 = vld [vmem:[#allocation2 + $0x1c4] sm:$0xf] }
  0x42   :  { %1005 = vmatpush.bf16.msrb.mxu1 %v1646_v13  ;;  %v1869_v13 = vld [vmem:[#allocation2 + $0xd4] sm:$0xf]  ;;  %v1554_v23 = vor.u32 %v1901_v15, %v1551_v16  ;;  %v1415_v26 = vld [vmem:[#allocation2 + $0xc8] sm:$0xf0]  ;;  %v1471_v30 = vld [vmem:[#allocation2 + $0x138] sm:$0xf0]  ;;  %v1354_v31 = vor.u32 %v1851_v21, %v1351_v22 }
  0x43   :  { %1024 = vmatpush.bf16.msrb.mxu2 %v1710_v9  ;;  %v1853_v9 = vld [vmem:[#allocation2 + $0x54] sm:$0xf]  ;;  %v1426_v20 = vor.u32 %v1869_v13, %v1423_v14  ;;  %v1543_v28 = vld [vmem:[#allocation2 + $0x1c8] sm:$0xf0]  ;;  %v1301_v36 = vld [vmem:[%s2257_s0 + $0x50] sm:$0xf] }
  0x44   :  { %1043 = vmatpush.bf16.msrb.mxu3 %v1774_v24  ;;  %v1362_v19 = vor.u32 %v1853_v9, %v1359_v10  ;;  %v1482_v24 = vor.u32 %v1883_v17, %v1479_v18  ;;  %v1849_v33 = vld [vmem:[#allocation2 + $0x34] sm:$0xf]  ;;  %v1546_v35 = vor.u32 %v1899_v27, %v1543_v28  ;;  %v1841_v37 = vld [vmem:[%s2257_s0 + $0x6c] sm:$0xf0]  ;;  %v1535_v45 = vld [vmem:[#allocation2 + $0x1b8] sm:$0xf0] }
  0x45   :  { %987 = vmatpush.bf16.msrb.mxu0 %v1574_v42  ;;  %v1303_v39 = vld [vmem:[%s2257_s0 + $0x70] sm:$0xf0]  ;;  %v1407_v42 = vld [vmem:[#allocation2 + $0xb8] sm:$0xf0]  ;;  %v1879_v46 = vld [vmem:[#allocation2 + $0x124] sm:$0xf] }
  0x46   :  { %1006 = vmatpush.bf16.msrb.mxu1 %v1638_v29  ;;  %v1881_v29 = vld [vmem:[#allocation2 + $0x134] sm:$0xf]  ;;  %v1309_v49 = vld [vmem:[%s2257_s0 + $0x58] sm:$0xf]  ;;  %v1838_v55 = vld [vmem:[%s2257_s0 + $0x5c] sm:$0xf] }
  0x47   :  { %1025 = vmatpush.bf16.msrb.mxu2 %v1702_v25  ;;  %v1867_v25 = vld [vmem:[#allocation2 + $0xc4] sm:$0xf]  ;;  %v1474_v40 = vor.u32 %v1881_v29, %v1471_v30  ;;  %v1865_v41 = vld [vmem:[#allocation2 + $0xb4] sm:$0xf]  ;;  %v1311_v58 = vld [vmem:[%s2257_s0 + $0x78] sm:$0xf0] }
  0x48   :  { %1044 = vmatpush.bf16.msrb.mxu3 %v1766_v47  ;;  %988 = vmatmul.bf16.vlgmr.msrb.gmra.mxu0 %v2159_v0  ;;  %v1418_v32 = vor.u32 %v1867_v25, %v1415_v26  ;;  %v1897_v43 = vld [vmem:[#allocation2 + $0x1b4] sm:$0xf]  ;;  %v1463_v47 = vld [vmem:[#allocation2 + $0x128] sm:$0xf0]  ;;  %v1847_v61 = vld [vmem:[#allocation2 + $0x24] sm:$0xf]  ;;  %v2201_v14 = vor.u32 %v1838_v55, %v1311_v58 }
  0x49   :  { %1056 = vmatpush.bf16.msra.mxu0 %v1378_v52  ;;  %1007 = vmatmul.bf16.vlgmr.msrb.gmra.mxu1 %v2161_v1  ;;  %v1842_v52 = vld [vmem:[%s2257_s0 + $0x74] sm:$0xf0]  ;;  %v1335_v62 = vld [vmem:[#allocation2 + $0x28] sm:$0xf0]  ;;  %v1538_v63 = vor.u32 %v1897_v43, %v1535_v45  ;;  %v1466_v2 = vor.u32 %v1879_v46, %v1463_v47  ;;  %v1863_v3 = vld [vmem:[#allocation2 + $0xa4] sm:$0xf] }
  0x4a   :  { %1075 = vmatpush.bf16.msra.mxu1 %v1442_v38  ;;  %1026 = vmatmul.bf16.vlgmr.msrb.gmra.mxu2 %v2163_v5  ;;  %v1837_v38 = vld [vmem:[%s2257_s0 + $0x54] sm:$0xf]  ;;  %v1399_v4 = vld [vmem:[#allocation2 + $0xa8] sm:$0xf0]  ;;  %v2199_v13 = vor.u32 %v1842_v52, %v1309_v49  ;;  %v1338_v15 = vor.u32 %v1847_v61, %v1335_v62  ;;  %v1327_v18 = vld [vmem:[#allocation2 + $0x18] sm:$0xf0] }
  0x4b   :  { %1094 = vmatpush.bf16.msra.mxu2 %v1506_v34  ;;  %1045 = vmatmul.bf16.vlgmr.msrb.gmra.mxu3 %v2165_v6  ;;  %v1343_v34 = vld [vmem:[#allocation2 + $0x38] sm:$0xf0]  ;;  %v2197_v9 = vor.u32 %v1837_v38, %v1303_v39  ;;  %v1527_v10 = vld [vmem:[#allocation2 + $0x1a8] sm:$0xf0]  ;;  %v1402_v16 = vor.u32 %v1863_v3, %v1399_v4  ;;  %v1845_v17 = vld [vmem:[#allocation2 + $0x14] sm:$0xf] }
  0x4c   :  { %1113 = vmatpush.bf16.msra.mxu3 %v1570_v59  ;;  %v1346_v59 = vor.u32 %v1849_v33, %v1343_v34  ;;  %v1861_v21 = vld [vmem:[#allocation2 + $0x94] sm:$0xf]  ;;  %v1391_v22 = vld [vmem:[#allocation2 + $0x98] sm:$0xf0]  ;;  %v1875_v25 = vld [vmem:[#allocation2 + $0x104] sm:$0xf]  ;;  %v1330_v29 = vor.u32 %v1845_v17, %v1327_v18 }
  0x4d   :  { %1057 = vmatpush.bf16.msra.mxu0 %v1370_v7  ;;  %v1895_v7 = vld [vmem:[#allocation2 + $0x1a4] sm:$0xf]  ;;  %v1447_v26 = vld [vmem:[#allocation2 + $0x108] sm:$0xf0]  ;;  %v1953_v27 = vld [vmem:[#allocation2 + $0x374] sm:$0xf]  ;;  %v1394_v30 = vor.u32 %v1861_v21, %v1391_v22 }
  0x4e   :  { %1076 = vmatpush.bf16.msra.mxu1 %v1434_v8  ;;  %v2195_v8 = vor.u32 %v1841_v37, %v1301_v36  ;;  %v1759_v28 = vld [vmem:[#allocation2 + $0x378] sm:$0xf0]  ;;  %v1859_v33 = vld [vmem:[#allocation2 + $0x84] sm:$0xf]  ;;  %v1383_v36 = vld [vmem:[#allocation2 + $0x88] sm:$0xf0] }
  0x4f   :  { %1095 = vmatpush.bf16.msra.mxu2 %v1498_v60  ;;  %v1410_v60 = vor.u32 %v1865_v41, %v1407_v42  ;;  %v1891_v37 = vld [vmem:[#allocation2 + $0x184] sm:$0xf]  ;;  %v1511_v38 = vld [vmem:[#allocation2 + $0x188] sm:$0xf0]  ;;  %v1762_v39 = vor.u32 %v1953_v27, %v1759_v28  ;;  %v1631_v41 = vld [vmem:[#allocation2 + $0x278] sm:$0xf0]  ;;  %v1386_v49 = vor.u32 %v1859_v33, %v1383_v36 }
  0x50   :  { %1114 = vmatpush.bf16.msra.mxu3 %v1562_v11  ;;  %v1877_v11 = vld [vmem:[#allocation2 + $0x114] sm:$0xf]  ;;  %v1695_v43 = vld [vmem:[#allocation2 + $0x2f8] sm:$0xf0]  ;;  %v1951_v52 = vld [vmem:[#allocation2 + $0x364] sm:$0xf]  ;;  %v1514_v58 = vor.u32 %v1891_v37, %v1511_v38 }
  0x51   :  { %1058 = vmatpush.bf16.msra.mxu0 %v1362_v19  ;;  %v1530_v19 = vor.u32 %v1895_v7, %v1527_v10  ;;  %v1937_v42 = vld [vmem:[#allocation2 + $0x2f4] sm:$0xf]  ;;  %v1823_v46 = vld [vmem:[#allocation2 + $0x3f8] sm:$0xf0]  ;;  %v1751_v55 = vld [vmem:[#allocation2 + $0x368] sm:$0xf0] }
  0x52   :  { %1077 = vmatpush.bf16.msra.mxu1 %v1426_v20  ;;  %v1969_v45 = vld [vmem:[#allocation2 + $0x3f4] sm:$0xf]  ;;  %v1919_v62 = vld [vmem:[#allocation2 + $0x264] sm:$0xf]  ;;  %v1687_v4 = vld [vmem:[#allocation2 + $0x2e8] sm:$0xf0] }
  0x53   :  { %1096 = vmatpush.bf16.msra.mxu2 %v1490_v12  ;;  %v1455_v12 = vld [vmem:[#allocation2 + $0x118] sm:$0xf0]  ;;  %v1826_v61 = vor.u32 %v1969_v45, %v1823_v46  ;;  %v1935_v3 = vld [vmem:[#allocation2 + $0x2e4] sm:$0xf]  ;;  %v1735_v27 = vld [vmem:[#allocation2 + $0x348] sm:$0xf0] }
  0x54   :  { %1115 = vmatpush.bf16.msra.mxu3 %v1554_v23  ;;  %v1458_v20 = vor.u32 %v1877_v11, %v1455_v12  ;;  %v1893_v23 = vld [vmem:[#allocation2 + $0x194] sm:$0xf]  ;;  %v1967_v10 = vld [vmem:[#allocation2 + $0x3e4] sm:$0xf]  ;;  %v1815_v11 = vld [vmem:[#allocation2 + $0x3e8] sm:$0xf0]  ;;  %v1690_v18 = vor.u32 %v1935_v3, %v1687_v4 }
  0x55   :  { %1059 = vmatpush.bf16.msra.mxu0 %v1354_v31  ;;  %v1843_v31 = vld [vmem:[#allocation2 + $0x4] sm:$0xf]  ;;  %v1949_v12 = vld [vmem:[#allocation2 + $0x354] sm:$0xf]  ;;  %v1615_v17 = vld [vmem:[#allocation2 + $0x258] sm:$0xf0] }
  0x56   :  { %1078 = vmatpush.bf16.msra.mxu1 %v1418_v32  ;;  %v1319_v32 = vld [vmem:[#allocation2 + $0x8] sm:$0xf0]  ;;  %v1679_v21 = vld [vmem:[#allocation2 + $0x2d8] sm:$0xf0]  ;;  %v1915_v28 = vld [vmem:[#allocation2 + $0x244] sm:$0xf] }
  0x57   :  { %1097 = vmatpush.bf16.msra.mxu2 %v1482_v24  ;;  %v1519_v24 = vld [vmem:[#allocation2 + $0x198] sm:$0xf0]  ;;  %v1322_v47 = vor.u32 %v1843_v31, %v1319_v32  ;;  %v1931_v32 = vld [vmem:[#allocation2 + $0x2c4] sm:$0xf]  ;;  %v1671_v33 = vld [vmem:[#allocation2 + $0x2c8] sm:$0xf0] }
  0x58   :  { %1116 = vmatpush.bf16.msra.mxu3 %v1546_v35  ;;  %993 = vmatmul.bf16.gmra.mxu0 %v2195_v8  ;;  %v1522_v34 = vor.u32 %v1893_v23, %v1519_v24  ;;  %v1450_v35 = vor.u32 %v1875_v25, %v1447_v26  ;;  %v1965_v24 = vld [vmem:[#allocation2 + $0x3d4] sm:$0xf]  ;;  %v1807_v25 = vld [vmem:[#allocation2 + $0x3d8] sm:$0xf0]  ;;  %v1947_v26 = vld [vmem:[#allocation2 + $0x344] sm:$0xf] }
  0x59   :  { %1060 = vmatpush.bf16.msra.mxu0 %v1346_v59  ;;  %1012 = vmatmul.bf16.gmra.mxu1 %v2197_v9  ;;  %v1810_v31 = vor.u32 %v1965_v24, %v1807_v25  ;;  %v1799_v36 = vld [vmem:[#allocation2 + $0x3c8] sm:$0xf0]  ;;  %v1727_v37 = vld [vmem:[#allocation2 + $0x338] sm:$0xf0]  ;;  %v1913_v38 = vld [vmem:[#allocation2 + $0x234] sm:$0xf] }
  0x5a   :  { %1079 = vmatpush.bf16.msra.mxu1 %v1410_v60  ;;  %1031 = vmatmul.bf16.gmra.mxu2 %v2199_v13  ;;  %v1698_v60 = vor.u32 %v1937_v42, %v1695_v43  ;;  %v1961_v45 = vld [vmem:[#allocation2 + $0x3b4] sm:$0xf]  ;;  %v1791_v46 = vld [vmem:[#allocation2 + $0x3b8] sm:$0xf0]  ;;  %v1783_v3 = vld [vmem:[#allocation2 + $0x3a8] sm:$0xf0] }
  0x5b   :  { %1098 = vmatpush.bf16.msra.mxu2 %v1474_v40  ;;  %1050 = vmatmul.bf16.gmra.mxu3 %v2201_v14  ;;  %v1921_v40 = vld [vmem:[#allocation2 + $0x274] sm:$0xf]  ;;  %v1907_v24 = vld [vmem:[#allocation2 + $0x204] sm:$0xf]  ;;  %v1575_v25 = vld [vmem:[#allocation2 + $0x208] sm:$0xf0] }
  0x5c   :  { %1117 = vmatpush.bf16.msra.mxu3 %v1538_v63  ;;  %v1634_v59 = vor.u32 %v1921_v40, %v1631_v41  ;;  %v1623_v63 = vld [vmem:[#allocation2 + $0x268] sm:$0xf0]  ;;  %v1929_v40 = vld [vmem:[#allocation2 + $0x2b4] sm:$0xf]  ;;  %v1663_v41 = vld [vmem:[#allocation2 + $0x2b8] sm:$0xf0] }
  0x5d   :  { %1061 = vmatpush.bf16.msra.mxu0 %v1338_v15  ;;  %v1626_v7 = vor.u32 %v1919_v62, %v1623_v63  ;;  %v1743_v15 = vld [vmem:[#allocation2 + $0x358] sm:$0xf0]  ;;  %v1941_v4 = vld [vmem:[#allocation2 + $0x314] sm:$0xf]  ;;  %s2032_s19 = smov [#allocation5]   ;;  %s1238_s22 = sshll.u32 %s2261_s4, 4  ;;  %s1239_s22 = int_to_ptr.hbm [resolvable:$true] %s1238_s22 }
  0x5e   :  { %1080 = vmatpush.bf16.msra.mxu1 %v1402_v16  ;;  %v1917_v16 = vld [vmem:[#allocation2 + $0x254] sm:$0xf]  ;;  %v1746_v22 = vor.u32 %v1949_v12, %v1743_v15  ;;  %s1236_s20 = sshll.u32 %s2032_s19, 4  ;;  %s2033_s25 = smov 256   ;;  %s1237_s20 = int_to_ptr.vmem [resolvable:$true] %s1236_s20 }
  0x5f   :  { %1099 = vmatpush.bf16.msra.mxu2 %v1466_v2  ;;  %v1754_v2 = vor.u32 %v1951_v52, %v1751_v55  ;;  %v1618_v23 = vor.u32 %v1917_v16, %v1615_v17  ;;  %v1911_v52 = vld [vmem:[#allocation2 + $0x224] sm:$0xf]  ;;  %v1591_v55 = vld [vmem:[#allocation2 + $0x228] sm:$0xf0]  ;;  %v1925_v16 = vld [vmem:[#allocation2 + $0x294] sm:$0xf] }
  0x60   :  { %1118 = vmatpush.bf16.msra.mxu3 %v1530_v19  ;;  %v1818_v19 = vor.u32 %v1967_v10, %v1815_v11  ;;  %v1594_v63 = vor.u32 %v1911_v52, %v1591_v55  ;;  %v1909_v10 = vld [vmem:[#allocation2 + $0x214] sm:$0xf]  ;;  %v1583_v11 = vld [vmem:[#allocation2 + $0x218] sm:$0xf0]  ;;  %s2034_s26 = smov 16  }
  0x61   :  { %1062 = vmatpush.bf16.msra.mxu0 %v1330_v29  ;;  %v1607_v29 = vld [vmem:[#allocation2 + $0x248] sm:$0xf0]  ;;  %v1647_v17 = vld [vmem:[#allocation2 + $0x298] sm:$0xf0] }
  0x62   :  { %1081 = vmatpush.bf16.msra.mxu1 %v1394_v30 }
  0x63   :  { %1100 = vmatpush.bf16.msra.mxu2 %v1458_v20  ;;  %v1933_v20 = vld [vmem:[#allocation2 + $0x2d4] sm:$0xf] }
  0x64   :  { %1119 = vmatpush.bf16.msra.mxu3 %v1522_v34  ;;  %v1682_v30 = vor.u32 %v1933_v20, %v1679_v21  ;;  %v1738_v34 = vor.u32 %v1947_v26, %v1735_v27  ;;  %v1957_v20 = vld [vmem:[#allocation2 + $0x394] sm:$0xf]  ;;  %v1775_v21 = vld [vmem:[#allocation2 + $0x398] sm:$0xf0]  ;;  %v1650_v26 = vor.u32 %v1925_v16, %v1647_v17 }
  0x65   :  { %1063 = vmatpush.bf16.msra.mxu0 %v1322_v47  ;;  %v1943_v47 = vld [vmem:[#allocation2 + $0x324] sm:$0xf]  ;;  %v1778_v27 = vor.u32 %v1957_v20, %v1775_v21 }
  0x66   :  { %1082 = vmatpush.bf16.msra.mxu1 %v1386_v49  ;;  %v1719_v49 = vld [vmem:[#allocation2 + $0x328] sm:$0xf0] }
  0x67   :  { %1101 = vmatpush.bf16.msra.mxu2 %v1450_v35  ;;  %v1610_v35 = vor.u32 %v1915_v28, %v1607_v29  ;;  %v1722_v62 = vor.u32 %v1943_v47, %v1719_v49  ;;  %v1923_v28 = vld [vmem:[#allocation2 + $0x284] sm:$0xf] }
  0x68   :  { %1120 = vmatpush.bf16.msra.mxu3 %v1514_v58  ;;  %1064 = vmatmul.bf16.vlgmr.msra.gmra.mxu0 %v2087_v48  ;;  %v1963_v48 = vld [vmem:[#allocation2 + $0x3c4] sm:$0xf]  ;;  %v1666_v58 = vor.u32 %v1929_v40, %v1663_v41 }
  0x69   :  { %1132 = vmatpush.bf16.msrb.mxu0 %v1634_v59  ;;  %1083 = vmatmul.bf16.vlgmr.msra.gmra.mxu1 %v2089_v53  ;;  %v1945_v53 = vld [vmem:[#allocation2 + $0x334] sm:$0xf]  ;;  %v1794_v59 = vor.u32 %v1961_v45, %v1791_v46 }
  0x6a   :  { %1151 = vmatpush.bf16.msrb.mxu1 %v1698_v60  ;;  %1102 = vmatmul.bf16.vlgmr.msra.gmra.mxu2 %v2091_v54  ;;  %v1674_v54 = vor.u32 %v1931_v32, %v1671_v33  ;;  %v1730_v42 = vor.u32 %v1945_v53, %v1727_v37  ;;  %v1927_v60 = vld [vmem:[#allocation2 + $0x2a4] sm:$0xf]  ;;  %v1767_v32 = vld [vmem:[#allocation2 + $0x388] sm:$0xf0] }
  0x6b   :  { %1170 = vmatpush.bf16.msrb.mxu2 %v1762_v39  ;;  %1121 = vmatmul.bf16.vlgmr.msra.gmra.mxu3 %v2093_v57  ;;  %v1599_v39 = vld [vmem:[#allocation2 + $0x238] sm:$0xf0]  ;;  %v1802_v57 = vor.u32 %v1963_v48, %v1799_v36 }
  0x6c   :  { %1189 = vmatpush.bf16.msrb.mxu3 %v1826_v61  ;;  %v1602_v43 = vor.u32 %v1913_v38, %v1599_v39  ;;  %v1655_v61 = vld [vmem:[#allocation2 + $0x2a8] sm:$0xf0] }
  0x6d   :  { %1133 = vmatpush.bf16.msrb.mxu0 %v1626_v7  ;;  %v1711_v7 = vld [vmem:[#allocation2 + $0x318] sm:$0xf0]  ;;  %v1658_v12 = vor.u32 %v1927_v60, %v1655_v61 }
  0x6e   :  { %1152 = vmatpush.bf16.msrb.mxu1 %v1690_v18  ;;  %v1714_v18 = vor.u32 %v1941_v4, %v1711_v7 }
  0x6f   :  { %1171 = vmatpush.bf16.msrb.mxu2 %v1754_v2  ;;  %v1959_v2 = vld [vmem:[#allocation2 + $0x3a4] sm:$0xf] }
  0x70   :  { %1190 = vmatpush.bf16.msrb.mxu3 %v1818_v19  ;;  %v1786_v15 = vor.u32 %v1959_v2, %v1783_v3  ;;  %v1586_v19 = vor.u32 %v1909_v10, %v1583_v11  ;;  %v1208_v3 = vld [vmem:[%s2260_s3] sm:$0xff] }
  0x71   :  { %1134 = vmatpush.bf16.msrb.mxu0 %v1618_v23  ;;  %v1703_v23 = vld [vmem:[#allocation2 + $0x308] sm:$0xf0] }
  0x72   :  { %1153 = vmatpush.bf16.msrb.mxu1 %v1682_v30  ;;  %v1578_v30 = vor.u32 %v1907_v24, %v1575_v25 }
  0x73   :  { %1172 = vmatpush.bf16.msrb.mxu2 %v1746_v22  ;;  %v1939_v22 = vld [vmem:[#allocation2 + $0x304] sm:$0xf] }
  0x74   :  { %1191 = vmatpush.bf16.msrb.mxu3 %v1810_v31  ;;  %v1706_v29 = vor.u32 %v1939_v22, %v1703_v23  ;;  %v1639_v31 = vld [vmem:[#allocation2 + $0x288] sm:$0xf0]  ;;  %v1210_v22 = vld [vmem:[%s2260_s3 + $0x10] sm:$0xff] }
  0x75   :  { %1135 = vmatpush.bf16.msrb.mxu0 %v1610_v35 }
  0x76   :  { %1154 = vmatpush.bf16.msrb.mxu1 %v1674_v54 }
  0x77   :  { %1173 = vmatpush.bf16.msrb.mxu2 %v1738_v34 }
  0x78   :  { %1192 = vmatpush.bf16.msrb.mxu3 %v1802_v57  ;;  %1069 = vmatmul.bf16.gmra.mxu0 %v2123_v44  ;;  %v1955_v44 = vld [vmem:[#allocation2 + $0x384] sm:$0xf] }
  0x79   :  { %1136 = vmatpush.bf16.msrb.mxu0 %v1602_v43  ;;  %1088 = vmatmul.bf16.gmra.mxu1 %v2125_v50  ;;  %v1642_v50 = vor.u32 %v1923_v28, %v1639_v31  ;;  %v1770_v33 = vor.u32 %v1955_v44, %v1767_v32 }
  0x7a   :  { %1155 = vmatpush.bf16.msrb.mxu1 %v1666_v58  ;;  %1107 = vmatmul.bf16.gmra.mxu2 %v2127_v51 }
  0x7b   :  { %1174 = vmatpush.bf16.msrb.mxu2 %v1730_v42  ;;  %1126 = vmatmul.bf16.gmra.mxu3 %v2129_v56 }
  0x7c   :  { %1193 = vmatpush.bf16.msrb.mxu3 %v1794_v59 }
  0x7d   :  { %1137 = vmatpush.bf16.msrb.mxu0 %v1594_v63 }
  0x7e   :  { %1156 = vmatpush.bf16.msrb.mxu1 %v1658_v12 }
  0x7f   :  { %1175 = vmatpush.bf16.msrb.mxu2 %v1722_v62 }
  0x80   :  { %1194 = vmatpush.bf16.msrb.mxu3 %v1786_v15 }
  0x81   :  { %1138 = vmatpush.bf16.msrb.mxu0 %v1586_v19 }
  0x82   :  { %1157 = vmatpush.bf16.msrb.mxu1 %v1650_v26 }
  0x83   :  { %1176 = vmatpush.bf16.msrb.mxu2 %v1714_v18 }
  0x84   :  { %1195 = vmatpush.bf16.msrb.mxu3 %v1778_v27 }
  0x85   :  { %1139 = vmatpush.bf16.msrb.mxu0 %v1578_v30 }
  0x86   :  { %1158 = vmatpush.bf16.msrb.mxu1 %v1642_v50 }
  0x87   :  { %1177 = vmatpush.bf16.msrb.mxu2 %v1706_v29 }
  0x88   :  { %1196 = vmatpush.bf16.msrb.mxu3 %v1770_v33  ;;  %1140 = vmatmul.bf16.vlgmr.msrb.gmra.mxu0 %v2159_v0  ;;  %v1212_v33 = vld [vmem:[%s2260_s3 + $0x20] sm:$0xff] }
  0x89   :  { %1159 = vmatmul.bf16.vlgmr.msrb.gmra.mxu1 %v2161_v1  ;;  %v2226_v1 = vld [vmem:[%s2259_s2] sm:$0x3] }
  0x8a   :  { %1178 = vmatmul.bf16.vlgmr.msrb.gmra.mxu2 %v2163_v5 }
  0x8b   :  { %1197 = vmatmul.bf16.vlgmr.msrb.gmra.mxu3 %v2165_v6 }
  0x98   :  { %1145 = vmatmul.bf16.gmra.mxu0 %v2195_v8 }
  0x99   :  { %1164 = vmatmul.bf16.gmra.mxu1 %v2197_v9  ;;  %v180_v9 = vperm.slane %v2226_v1, 0 }
  0x9a   :  { %1183 = vmatmul.bf16.gmra.mxu2 %v2199_v13 }
  0x9b   :  { %1202 = vmatmul.bf16.gmra.mxu3 %v2201_v14 }
  0xa5   :  { %v913_v51 = vpop.f32.mrf.mxu0 }
  0xa6   :  { %v932_v56 = vpop.f32.mrf.mxu1  ;;  %v914_v13 = vadd.f32 %v913_v51, %v180_v9 }
  0xa8   :  { %v933_v38 = vadd.f32 %v932_v56, %v914_v13 }
  0xad   :  { %v951_v34 = vpop.f32.mrf.mxu2  ;;  %v915_v48 = vpop.f32.mrf.mxu0 }
  0xae   :  { %v970_v35 = vpop.f32.mrf.mxu3  ;;  %v934_v0 = vpop.f32.mrf.mxu1  ;;  %v952_v54 = vadd.f32 %v951_v34, %v933_v38  ;;  %v916_v57 = vadd.f32 %v915_v48, %v180_v9 }
  0xb0   :  { %v971_v42 = vadd.f32 %v970_v35, %v952_v54  ;;  %v935_v46 = vadd.f32 %v934_v0, %v916_v57  ;;  %v181_v57 = vperm.slane %v2226_v1, 1 }
  0xb5   :  { %v953_v5 = vpop.f32.mrf.mxu2  ;;  %v918_v8 = vpop.f32.mrf.mxu0 }
  0xb6   :  { %v972_v6 = vpop.f32.mrf.mxu3  ;;  %v937_v36 = vpop.f32.mrf.mxu1  ;;  %v954_v49 = vadd.f32 %v953_v5, %v935_v46  ;;  %v919_v52 = vadd.f32 %v918_v8, %v180_v9 }
  0xb8   :  { %v973_v60 = vadd.f32 %v972_v6, %v954_v49  ;;  %v938_v61 = vadd.f32 %v937_v36, %v919_v52 }
  0xbd   :  { %v956_v53 = vpop.f32.mrf.mxu2  ;;  %v920_v37 = vpop.f32.mrf.mxu0 }
  0xbe   :  { %v975_v14 = vpop.f32.mrf.mxu3  ;;  %v939_v39 = vpop.f32.mrf.mxu1  ;;  %v957_v10 = vadd.f32 %v956_v53, %v938_v61  ;;  %v921_v12 = vadd.f32 %v920_v37, %v180_v9  ;;  %v1214_v9 = vld [vmem:[%s2260_s3 + $0x30] sm:$0xff] }
  0xc0   :  { %v976_v18 = vadd.f32 %v975_v14, %v957_v10  ;;  %v940_v23 = vadd.f32 %v939_v39, %v921_v12 }
  0xc5   :  { %v958_v40 = vpop.f32.mrf.mxu2  ;;  %v989_v43 = vpop.f32.mrf.mxu0 }
  0xc6   :  { %v977_v41 = vpop.f32.mrf.mxu3  ;;  %v1008_v45 = vpop.f32.mrf.mxu1  ;;  %v990_v47 = vadd.f32 %v989_v43, %v971_v42  ;;  %v959_v26 = vadd.f32 %v958_v40, %v940_v23 }
  0xc8   :  { %v1009_v55 = vadd.f32 %v1008_v45, %v990_v47  ;;  %v978_v31 = vadd.f32 %v977_v41, %v959_v26 }
  0xcd   :  { %v1027_v58 = vpop.f32.mrf.mxu2  ;;  %v991_v63 = vpop.f32.mrf.mxu0 }
  0xce   :  { %v1046_v59 = vpop.f32.mrf.mxu3  ;;  %v1028_v62 = vadd.f32 %v1027_v58, %v1009_v55  ;;  %v1010_v2 = vpop.f32.mrf.mxu1  ;;  %v992_v7 = vadd.f32 %v991_v63, %v973_v60 }
  0xd0   :  { %v1047_v4 = vadd.f32 %v1046_v59, %v1028_v62  ;;  %v1011_v15 = vadd.f32 %v1010_v2, %v992_v7 }
  0xd2   :  { %v1216_v11 = vadd.f32 %v1208_v3, %v1047_v4 }
  0xd4   :  { %1224 = vst [vmem:[#allocation5] sm:$0xff] %v1216_v11 }
  0xd5   :  { %v1029_v16 = vpop.f32.mrf.mxu2  ;;  %v994_v20 = vpop.f32.mrf.mxu0 }
  0xd6   :  { %v1048_v17 = vpop.f32.mrf.mxu3  ;;  %v1030_v19 = vadd.f32 %v1029_v16, %v1011_v15  ;;  %v1013_v21 = vpop.f32.mrf.mxu1  ;;  %v995_v25 = vadd.f32 %v994_v20, %v976_v18 }
  0xd8   :  { %v1049_v24 = vadd.f32 %v1048_v17, %v1030_v19  ;;  %v1014_v28 = vadd.f32 %v1013_v21, %v995_v25  ;;  %v1209_v17 = vld [vmem:[%s2260_s3 + $0x8] sm:$0xff] }
  0xda   :  { %v1218_v27 = vadd.f32 %v1210_v22, %v1049_v24 }
  0xdc   :  { %1226 = vst [vmem:[#allocation5 + $0x10] sm:$0xff] %v1218_v27 }
  0xdd   :  { %v1032_v29 = vpop.f32.mrf.mxu2  ;;  %v996_v32 = vpop.f32.mrf.mxu0 }
  0xde   :  { %v1051_v30 = vpop.f32.mrf.mxu3  ;;  %v1033_v44 = vadd.f32 %v1032_v29, %v1014_v28  ;;  %v1015_v50 = vpop.f32.mrf.mxu1  ;;  %v997_v56 = vadd.f32 %v996_v32, %v978_v31 }
  0xe0   :  { %v1052_v51 = vadd.f32 %v1051_v30, %v1033_v44  ;;  %v1016_v35 = vadd.f32 %v1015_v50, %v997_v56  ;;  %v1211_v30 = vld [vmem:[%s2260_s3 + $0x18] sm:$0xff] }
  0xe2   :  { %v1220_v34 = vadd.f32 %v1212_v33, %v1052_v51 }
  0xe4   :  { %1228 = vst [vmem:[#allocation5 + $0x20] sm:$0xff] %v1220_v34 }
  0xe5   :  { %v1034_v48 = vpop.f32.mrf.mxu2  ;;  %v1065_v6 = vpop.f32.mrf.mxu0 }
  0xe6   :  { %v1053_v0 = vpop.f32.mrf.mxu3  ;;  %v1035_v5 = vadd.f32 %v1034_v48, %v1016_v35  ;;  %v1084_v8 = vpop.f32.mrf.mxu1  ;;  %v1066_v42 = vadd.f32 %v1065_v6, %v181_v57  ;;  %v1213_v6 = vld [vmem:[%s2260_s3 + $0x28] sm:$0xff] }
  0xe8   :  { %v1054_v36 = vadd.f32 %v1053_v0, %v1035_v5  ;;  %v1085_v46 = vadd.f32 %v1084_v8, %v1066_v42 }
  0xea   :  { %v1222_v13 = vadd.f32 %v1214_v9, %v1054_v36 }
  0xec   :  { %1230 = vst [vmem:[#allocation5 + $0x30] sm:$0xff] %v1222_v13 }
  0xed   :  { %v1103_v53 = vpop.f32.mrf.mxu2  ;;  %v1067_v37 = vpop.f32.mrf.mxu0 }
  0xee   :  { %v1122_v14 = vpop.f32.mrf.mxu3  ;;  %v1086_v38 = vpop.f32.mrf.mxu1  ;;  %v1104_v52 = vadd.f32 %v1103_v53, %v1085_v46  ;;  %v1068_v55 = vadd.f32 %v1067_v37, %v181_v57 }
  0xf0   :  { %v1123_v60 = vadd.f32 %v1122_v14, %v1104_v52  ;;  %v1087_v63 = vadd.f32 %v1086_v38, %v1068_v55 }
  0xf5   :  { %v1105_v39 = vpop.f32.mrf.mxu2  ;;  %v1070_v40 = vpop.f32.mrf.mxu0 }
  0xf6   :  { %v1124_v54 = vpop.f32.mrf.mxu3  ;;  %v1089_v41 = vpop.f32.mrf.mxu1  ;;  %v1106_v3 = vadd.f32 %v1105_v39, %v1087_v63  ;;  %v1071_v4 = vadd.f32 %v1070_v40, %v181_v57  ;;  %v1215_v39 = vld [vmem:[%s2260_s3 + $0x38] sm:$0xff] }
  0xf8   :  { %v1125_v11 = vadd.f32 %v1124_v54, %v1106_v3  ;;  %v1090_v12 = vadd.f32 %v1089_v41, %v1071_v4 }
  0xfd   :  { %v1108_v43 = vpop.f32.mrf.mxu2  ;;  %v1072_v47 = vpop.f32.mrf.mxu0 }
  0xfe   :  { %v1127_v45 = vpop.f32.mrf.mxu3  ;;  %v1091_v49 = vpop.f32.mrf.mxu1  ;;  %v1109_v21 = vadd.f32 %v1108_v43, %v1090_v12  ;;  %v1073_v23 = vadd.f32 %v1072_v47, %v181_v57 }
 0x100   :  { %v1128_v27 = vadd.f32 %v1127_v45, %v1109_v21  ;;  %v1092_v31 = vadd.f32 %v1091_v49, %v1073_v23 }
 0x105   :  { %v1110_v58 = vpop.f32.mrf.mxu2  ;;  %v1141_v61 = vpop.f32.mrf.mxu0 }
 0x106   :  { %v1129_v59 = vpop.f32.mrf.mxu3  ;;  %v1160_v62 = vpop.f32.mrf.mxu1  ;;  %v1142_v2 = vadd.f32 %v1141_v61, %v1123_v60  ;;  %v1111_v33 = vadd.f32 %v1110_v58, %v1092_v31 }
 0x108   :  { %v1161_v1 = vadd.f32 %v1160_v62, %v1142_v2  ;;  %v1130_v48 = vadd.f32 %v1129_v59, %v1111_v33 }
 0x10d   :  { %v1179_v7 = vpop.f32.mrf.mxu2  ;;  %v1143_v16 = vpop.f32.mrf.mxu0 }
 0x10e   :  { %v1198_v10 = vpop.f32.mrf.mxu3  ;;  %v1180_v15 = vadd.f32 %v1179_v7, %v1161_v1  ;;  %v1162_v18 = vpop.f32.mrf.mxu1  ;;  %v1144_v20 = vadd.f32 %v1143_v16, %v1125_v11 }
 0x110   :  { %v1199_v19 = vadd.f32 %v1198_v10, %v1180_v15  ;;  %v1163_v24 = vadd.f32 %v1162_v18, %v1144_v20 }
 0x112   :  { %v1217_v22 = vadd.f32 %v1209_v17, %v1199_v19 }
 0x114   :  { %1225 = vst [vmem:[#allocation5 + $0x8] sm:$0xff] %v1217_v22 }
 0x115   :  { %v1181_v25 = vpop.f32.mrf.mxu2  ;;  %v1146_v29 = vpop.f32.mrf.mxu0 }
 0x116   :  { %v1200_v26 = vpop.f32.mrf.mxu3  ;;  %v1182_v28 = vadd.f32 %v1181_v25, %v1163_v24  ;;  %v1147_v32 = vadd.f32 %v1146_v29, %v1128_v27  ;;  %v1165_v50 = vpop.f32.mrf.mxu1 }
 0x118   :  { %v1201_v44 = vadd.f32 %v1200_v26, %v1182_v28  ;;  %v1166_v56 = vadd.f32 %v1165_v50, %v1147_v32 }
 0x11a   :  { %v1219_v51 = vadd.f32 %v1211_v30, %v1201_v44 }
 0x11c   :  { %1227 = vst [vmem:[#allocation5 + $0x18] sm:$0xff] %v1219_v51 }
 0x11d   :  { %v1184_v34 = vpop.f32.mrf.mxu2  ;;  %v1148_v5 = vpop.f32.mrf.mxu0 }
 0x11e   :  { %v1203_v35 = vpop.f32.mrf.mxu3  ;;  %v1185_v0 = vadd.f32 %v1184_v34, %v1166_v56  ;;  %v1149_v9 = vadd.f32 %v1148_v5, %v1130_v48  ;;  %v1167_v13 = vpop.f32.mrf.mxu1 }
 0x120   :  { %v1204_v8 = vadd.f32 %v1203_v35, %v1185_v0  ;;  %v1168_v53 = vadd.f32 %v1167_v13, %v1149_v9 }
 0x122   :  { %v1221_v36 = vadd.f32 %v1213_v6, %v1204_v8 }
 0x124   :  { %1229 = vst [vmem:[#allocation5 + $0x28] sm:$0xff] %v1221_v36 }
 0x125   :  { %v1186_v14 = vpop.f32.mrf.mxu2 }
 0x126   :  { %v1187_v37 = vadd.f32 %v1186_v14, %v1168_v53  ;;  %v1205_v38 = vpop.f32.mrf.mxu3 }
 0x128   :  { %v1206_v54 = vadd.f32 %v1205_v38, %v1187_v37 }
 0x12a   :  { %v1223_v57 = vadd.f32 %v1215_v39, %v1206_v54 }
 0x12c   :  { %1231 = vst [vmem:[#allocation5 + $0x38] sm:$0xff] %v1223_v57 }
 0x12d   :  { %1244 = dma.vmem_to_hbm [thread:$0]  %s1237_s20, 1024, %s1239_s22, [#allocation4], %s2033_s25, %s2033_s25, %s2034_s26  }
 0x12e   :  { %2027 = dma.done.wait [#allocation4], 1024  }
 0x12f   :  { %2028 = vsyncadd [#allocation4], 4294966272 }
 0x130   :  { %1249 = vsyncpa [#allocation3], 1 }
 0x131   :  { %1250 = vsyncpa [#allocation4], 1 }

</bundles_post_ra>
